<compile_context>
chip_gen: v7x
topology: tpu7x:2x2x1
jax: 0.10.0
libtpu: 0.0.40
codegen_flags: <defaults>
</compile_context>

<pallas_src>
import jax
import jax.numpy as jnp
from jax.experimental import pallas as pl
from jax.experimental.pallas import tpu as pltpu

EPS = 1e-5     # nn.InstanceNorm2d default eps
LPAD = 16      # left halo width = one bf16 sublane tile -> aligned interior


def _basic_block_kernel(x_ref, w1_ref, w2_ref, out_ref, pad_ref):
    # x_ref   : (1, H, W, C)   f32   unpadded input sample
    # w1_ref  : (9*C, P)       bf16  conv1 weights, taps folded into K
    # w2_ref  : (9*P, P)       bf16  conv2 weights
    # out_ref : (H*W, P)       f32   output rows for this sample
    # pad_ref : (H+2, Wp, C)   bf16  reused zero-halo scratch (conv1 & conv2 in)
    _, H, W, C = x_ref.shape
    P = w1_ref.shape[-1]
    n_pix = H * W
    inv_pix = 1.0 / n_pix
    left = LPAD          # first interior column of the scratch
    lo = LPAD - 1        # first halo column actually read by the convs

    def im2col(pad):
        # pad: (H+2, W+2, Cin) bf16 value. Build (H*W, 9*Cin) bf16; column
        # order ((kw*3 + kh)*Cin + c) matches the wrapper's weight packing.
        cin = pad.shape[-1]
        cols = []
        for kw in range(3):
            xw = pad[:, kw:kw + W, :]          # only 3 sublane-shifted views
            for kh in range(3):                # kh slices hit the major dim
                cols.append(xw[kh:kh + H].reshape(n_pix, cin))
        return jnp.concatenate(cols, axis=-1)

    def instance_norm(y):
        # per-channel stats over H*W rows of one sample; single pass, f32.
        mean = jnp.sum(y, axis=0, keepdims=True) * inv_pix
        var = jnp.sum(y * y, axis=0, keepdims=True) * inv_pix - mean * mean
        var = jnp.maximum(var, 0.0)            # guard f32 cancellation -> NaN
        return (y - mean) * jax.lax.rsqrt(var + EPS)

    # ---- zero only the 1-px halo actually read (covers both convs). Done
    # every step (not just step 0) because the batch axis is "parallel" and
    # may be sharded across TensorCores. ----
    zrow = jnp.zeros((1, W + 2, C), jnp.bfloat16)
    zcol = jnp.zeros((H, 1, C), jnp.bfloat16)
    pad_ref[0:1, lo:lo + W + 2, :] = zrow
    pad_ref[H + 1:H + 2, lo:lo + W + 2, :] = zrow
    pad_ref[1:H + 1, lo:lo + 1, :] = zcol
    pad_ref[1:H + 1, left + W:left + W + 1, :] = zcol

    # ---- stage conv1 input: single bf16 cast of the source, aligned store ----
    x = x_ref[0]                                                  # (H, W, C) f32
    pad_ref[1:H + 1, left:left + W, :] = x.astype(jnp.bfloat16)

    # ---- conv1: one im2col matmul (bf16 x bf16 -> f32 acc), IN + ReLU ----
    win = pad_ref[:, lo:lo + W + 2, :]                            # (H+2, W+2, C)
    y = jnp.dot(im2col(win), w1_ref[...],
                preferred_element_type=jnp.float32)               # (H*W, P) f32
    y = jnp.maximum(instance_norm(y), 0.0)

    # ---- stage conv2 input into the SAME scratch (halo already zero) ----
    pad_ref[1:H + 1, left:left + W, :] = y.astype(jnp.bfloat16).reshape(H, W, P)

    # ---- conv2 + InstanceNorm (f32 stats) ----
    win = pad_ref[:, lo:lo + W + 2, :]
    y = jnp.dot(im2col(win), w2_ref[...],
                preferred_element_type=jnp.float32)               # (H*W, P) f32
    y = instance_norm(y)

    # ---- residual add (f32, from the unpadded block) + final ReLU ----
    out_ref[...] = jnp.maximum(y + x.reshape(n_pix, C), 0.0)


def _pack_weight(w_oikk):
    # PyTorch (O, I, kh, kw) -> (9*I, O) bf16 with row index (kw*3 + kh)*I + i,
    # matching the im2col column order in the kernel.
    O, I = w_oikk.shape[0], w_oikk.shape[1]
    return (jnp.transpose(w_oikk.astype(jnp.float32), (3, 2, 1, 0))
            .reshape(9 * I, O).astype(jnp.bfloat16))


def _tile_bytes(shape, dtype):
    """VMEM bytes of one buffer with (sublane, lane) tile padding."""
    itemsize = jnp.dtype(dtype).itemsize
    sub = 32 // itemsize                        # 8 (f32) / 16 (bf16)
    shape = tuple(int(d) for d in shape)
    if len(shape) < 2:
        shape = (1,) * (2 - len(shape)) + shape
    lead = 1
    for d in shape[:-2]:
        lead *= d
    rows = -(-shape[-2] // sub) * sub
    cols = -(-shape[-1] // 128) * 128
    return lead * rows * cols * itemsize


def basic_block_forward_nhwc(x_nhwc, w1_oikk, w2_oikk):
    """NHWC entry point (no layout transposes). x: (N, H, W, C) f32."""
    N, H, W, C = x_nhwc.shape
    P = w1_oikk.shape[0]
    # Residual add in BasicBlock.forward requires inplanes == planes, stride=1.
    assert P == C and w1_oikk.shape == (P, C, 3, 3) and w2_oikk.shape == (P, P, 3, 3)
    assert (H * W) % 8 == 0, "per-sample output block needs H*W % 8 == 0"

    w1p = _pack_weight(w1_oikk)
    w2p = _pack_weight(w2_oikk)
    Wp = LPAD + W + 1            # scratch width: 16-col left halo + W + right halo

    # Per-step VMEM footprint (tile-padded) -> explicit scoped-VMEM limit.
    vmem_need = (
        2 * _tile_bytes((1, H, W, C), jnp.float32)        # input block (dbl buf)
        + 2 * _tile_bytes((H * W, P), jnp.float32)        # output block (dbl buf)
        + 2 * (_tile_bytes((9 * C, P), jnp.bfloat16)
               + _tile_bytes((9 * P, P), jnp.bfloat16))   # resident weights
        + _tile_bytes((H + 2, Wp, C), jnp.bfloat16)       # padded scratch
        + 2 * _tile_bytes((H * W, 9 * C), jnp.bfloat16)   # bf16 im2col temporaries
        + 4 * _tile_bytes((H * W, P), jnp.float32)        # f32 conv/IN temporaries
    )
    vmem_limit = int(min(64 << 20, max(2 * vmem_need + (8 << 20), 32 << 20)))

    cost = pl.CostEstimate(
        flops=int(2 * 2 * N * H * W * 9 * C * P),
        transcendentals=int(2 * N * P),
        bytes_accessed=int(N * H * W * (C + P) * 4 + (9 * C * P + 9 * P * P) * 2),
    )

    grid_spec = pltpu.PrefetchScalarGridSpec(
        num_scalar_prefetch=0,
        grid=(N,),                                        # one sample per grid step
        in_specs=[
            pl.BlockSpec((1, H, W, C), lambda n: (n, 0, 0, 0)),
            pl.BlockSpec((9 * C, P), lambda n: (0, 0)),   # weights stay resident
            pl.BlockSpec((9 * P, P), lambda n: (0, 0)),
        ],
        out_specs=pl.BlockSpec((H * W, P), lambda n: (n, 0)),
        scratch_shapes=[pltpu.VMEM((H + 2, Wp, C), jnp.bfloat16)],
    )
    out = pl.pallas_call(
        _basic_block_kernel,
        out_shape=jax.ShapeDtypeStruct((N * H * W, P), jnp.float32),
        grid_spec=grid_spec,
        compiler_params=pltpu.CompilerParams(
            # Batch axis is embarrassingly parallel (InstanceNorm is per-(n,c));
            # lets Mosaic shard grid steps across the 2 TensorCores on v7x.
            dimension_semantics=("parallel",),
            vmem_limit_bytes=vmem_limit,
        ),
        cost_estimate=cost,
    )(x_nhwc.astype(jnp.float32), w1p, w2p)
    return out.reshape(N, H, W, P)


def basic_block_forward(x_nchw, w1_oikk, w2_oikk):
    """PyTorch-layout wrapper: x (N, C, H, W) f32, weights (O, I, 3, 3)."""
    x = jnp.transpose(x_nchw, (0, 2, 3, 1)).astype(jnp.float32)   # NHWC
    y = basic_block_forward_nhwc(x, w1_oikk, w2_oikk)
    return jnp.transpose(y, (0, 3, 1, 2))                         # back to NCHW


def reference_forward(x, w1, w2, matmul_dtype=jnp.float32):
    """Pure-JAX NCHW reference. matmul_dtype=bfloat16 mirrors the kernel's
    mixed precision (bf16 conv operands, f32 accumulation, f32 InstanceNorm)."""
    def conv(y, w):
        return jax.lax.conv_general_dilated(
            y.astype(matmul_dtype), w.astype(matmul_dtype),
            window_strides=(1, 1), padding=((1, 1), (1, 1)),
            dimension_numbers=('NCHW', 'OIHW', 'NCHW'),
            preferred_element_type=jnp.float32)

    def inorm(y):
        mean = jnp.mean(y, axis=(2, 3), keepdims=True)
        var = jnp.mean((y - mean) ** 2, axis=(2, 3), keepdims=True)
        return (y - mean) * jax.lax.rsqrt(var + EPS)

    out = jnp.maximum(inorm(conv(x, w1)), 0.0)
    out = inorm(conv(out, w2))
    return jnp.maximum(out + x, 0.0)


if __name__ == "__main__":
    key = jax.random.PRNGKey(0)
    k1, k2, k3 = jax.random.split(key, 3)

    # Small shapes consistent with BasicBlock(inplanes=4, planes=4, stride=1).
    N, C, H, W = 2, 4, 16, 16
    planes = C

    x = jax.random.normal(k1, (N, C, H, W), jnp.float32)
    # deterministic Kaiming-style initializer, bias-free convs
    w1 = jax.random.normal(k2, (planes, C, 3, 3), jnp.float32) * (2.0 / (C * 9)) ** 0.5
    w2 = jax.random.normal(k3, (planes, planes, 3, 3), jnp.float32) * (2.0 / (planes * 9)) ** 0.5

    out = jax.block_until_ready(jax.jit(basic_block_forward)(x, w1, w2))
    assert out.shape == (N, planes, H, W)

    # Tight check vs a reference using the same bf16 matmul operands.
    ref_mixed = reference_forward(x, w1, w2, matmul_dtype=jnp.bfloat16)
    assert jnp.allclose(out, ref_mixed, rtol=5e-3, atol=5e-3), "mismatch vs mixed-precision reference"

    # Fidelity check vs the full-f32 (PyTorch-equivalent) reference.
    ref_f32 = reference_forward(x, w1, w2, matmul_dtype=jnp.float32)
    assert jnp.allclose(out, ref_f32, rtol=5e-2, atol=5e-2), "mismatch vs f32 reference"

    print("KERNEL_OK")
</pallas_src>

<mosaic_0001>
module attributes {stable_mosaic.version = 11 : i64} {
  func.func @_basic_block_kernel(%arg0: i32, %arg1: memref<1x16x16x4xf32, #tpu.memory_space<vmem>>, %arg2: memref<36x4xbf16, #tpu.memory_space<vmem>>, %arg3: memref<36x4xbf16, #tpu.memory_space<vmem>>, %arg4: memref<256x4xf32, #tpu.memory_space<vmem>>, %arg5: memref<18x33x4xbf16, #tpu.memory_space<vmem>>) attributes {dimension_semantics = [#tpu.dimension_semantics<parallel>], iteration_bounds = array<i64: 2>, scalar_prefetch = 0 : i64, scratch_operands = 1 : i64, tpu.core_type = #tpu.core_type<tc>, window_params = [{transform_indices = @transform_0, window_bounds = array<i64: 1, 16, 16, 4>}, {pipeline_mode = #tpu.pipeline_mode<synchronous>, transform_indices = @transform_1, window_bounds = array<i64: 36, 4>}, {pipeline_mode = #tpu.pipeline_mode<synchronous>, transform_indices = @transform_2, window_bounds = array<i64: 36, 4>}, {transform_indices = @transform_3, window_bounds = array<i64: 256, 4>}]} {
    %cst = arith.constant 0.000000e+00 : bf16
    %0 = vector.broadcast %cst : bf16 to vector<1x18x4xbf16>
    %cst_0 = arith.constant 0.000000e+00 : bf16
    %1 = vector.broadcast %cst_0 : bf16 to vector<16x1x4xbf16>
    %c0 = arith.constant 0 : index
    %c15 = arith.constant 15 : index
    %c0_1 = arith.constant 0 : index
    %2 = vector.load %arg5[%c0, %c15, %c0_1] : memref<18x33x4xbf16, #tpu.memory_space<vmem>>, vector<1x18x4xbf16>
    tpu.vector_store %arg5[%c0, %c15, %c0_1], %0 {strides = array<i32>} : memref<18x33x4xbf16, #tpu.memory_space<vmem>>, vector<1x18x4xbf16>,
    %c17 = arith.constant 17 : index
    %c15_2 = arith.constant 15 : index
    %c0_3 = arith.constant 0 : index
    %3 = vector.load %arg5[%c17, %c15_2, %c0_3] : memref<18x33x4xbf16, #tpu.memory_space<vmem>>, vector<1x18x4xbf16>
    tpu.vector_store %arg5[%c17, %c15_2, %c0_3], %0 {strides = array<i32>} : memref<18x33x4xbf16, #tpu.memory_space<vmem>>, vector<1x18x4xbf16>,
    %c1 = arith.constant 1 : index
    %c15_4 = arith.constant 15 : index
    %c0_5 = arith.constant 0 : index
    %4 = vector.load %arg5[%c1, %c15_4, %c0_5] : memref<18x33x4xbf16, #tpu.memory_space<vmem>>, vector<16x1x4xbf16>
    tpu.vector_store %arg5[%c1, %c15_4, %c0_5], %1 {strides = array<i32>} : memref<18x33x4xbf16, #tpu.memory_space<vmem>>, vector<16x1x4xbf16>,
    %c1_6 = arith.constant 1 : index
    %c32 = arith.constant 32 : index
    %c0_7 = arith.constant 0 : index
    %5 = vector.load %arg5[%c1_6, %c32, %c0_7] : memref<18x33x4xbf16, #tpu.memory_space<vmem>>, vector<16x1x4xbf16>
    tpu.vector_store %arg5[%c1_6, %c32, %c0_7], %1 {strides = array<i32>} : memref<18x33x4xbf16, #tpu.memory_space<vmem>>, vector<16x1x4xbf16>,
    %c0_8 = arith.constant 0 : index
    %c0_9 = arith.constant 0 : index
    %c0_10 = arith.constant 0 : index
    %c0_11 = arith.constant 0 : index
    %6 = vector.load %arg1[%c0_8, %c0_9, %c0_10, %c0_11] : memref<1x16x16x4xf32, #tpu.memory_space<vmem>>, vector<1x16x16x4xf32>
    %7 = vector.shape_cast %6 : vector<1x16x16x4xf32> to vector<16x16x4xf32>
    %8 = arith.truncf %7 : vector<16x16x4xf32> to vector<16x16x4xbf16>
    %c1_12 = arith.constant 1 : index
    %c16 = arith.constant 16 : index
    %c0_13 = arith.constant 0 : index
    %9 = vector.load %arg5[%c1_12, %c16, %c0_13] : memref<18x33x4xbf16, #tpu.memory_space<vmem>>, vector<16x16x4xbf16>
    tpu.vector_store %arg5[%c1_12, %c16, %c0_13], %8 {strides = array<i32>} : memref<18x33x4xbf16, #tpu.memory_space<vmem>>, vector<16x16x4xbf16>,
    %c0_14 = arith.constant 0 : index
    %c15_15 = arith.constant 15 : index
    %c0_16 = arith.constant 0 : index
    %10 = vector.load %arg5[%c0_14, %c15_15, %c0_16] : memref<18x33x4xbf16, #tpu.memory_space<vmem>>, vector<18x18x4xbf16>
    %11 = vector.extract_strided_slice %10 {offsets = [0, 0, 0], sizes = [18, 16, 4], strides = [1, 1, 1]} : vector<18x18x4xbf16> to vector<18x16x4xbf16>
    %12 = vector.extract_strided_slice %11 {offsets = [0, 0, 0], sizes = [16, 16, 4], strides = [1, 1, 1]} : vector<18x16x4xbf16> to vector<16x16x4xbf16>
    %13 = vector.shape_cast %12 : vector<16x16x4xbf16> to vector<256x4xbf16>
    %14 = vector.extract_strided_slice %11 {offsets = [1, 0, 0], sizes = [16, 16, 4], strides = [1, 1, 1]} : vector<18x16x4xbf16> to vector<16x16x4xbf16>
    %15 = vector.shape_cast %14 : vector<16x16x4xbf16> to vector<256x4xbf16>
    %16 = vector.extract_strided_slice %11 {offsets = [2, 0, 0], sizes = [16, 16, 4], strides = [1, 1, 1]} : vector<18x16x4xbf16> to vector<16x16x4xbf16>
    %17 = vector.shape_cast %16 : vector<16x16x4xbf16> to vector<256x4xbf16>
    %18 = vector.extract_strided_slice %10 {offsets = [0, 1, 0], sizes = [18, 16, 4], strides = [1, 1, 1]} : vector<18x18x4xbf16> to vector<18x16x4xbf16>
    %19 = vector.extract_strided_slice %18 {offsets = [0, 0, 0], sizes = [16, 16, 4], strides = [1, 1, 1]} : vector<18x16x4xbf16> to vector<16x16x4xbf16>
    %20 = vector.shape_cast %19 : vector<16x16x4xbf16> to vector<256x4xbf16>
    %21 = vector.extract_strided_slice %18 {offsets = [1, 0, 0], sizes = [16, 16, 4], strides = [1, 1, 1]} : vector<18x16x4xbf16> to vector<16x16x4xbf16>
    %22 = vector.shape_cast %21 : vector<16x16x4xbf16> to vector<256x4xbf16>
    %23 = vector.extract_strided_slice %18 {offsets = [2, 0, 0], sizes = [16, 16, 4], strides = [1, 1, 1]} : vector<18x16x4xbf16> to vector<16x16x4xbf16>
    %24 = vector.shape_cast %23 : vector<16x16x4xbf16> to vector<256x4xbf16>
    %25 = vector.extract_strided_slice %10 {offsets = [0, 2, 0], sizes = [18, 16, 4], strides = [1, 1, 1]} : vector<18x18x4xbf16> to vector<18x16x4xbf16>
    %26 = vector.extract_strided_slice %25 {offsets = [0, 0, 0], sizes = [16, 16, 4], strides = [1, 1, 1]} : vector<18x16x4xbf16> to vector<16x16x4xbf16>
    %27 = vector.shape_cast %26 : vector<16x16x4xbf16> to vector<256x4xbf16>
    %28 = vector.extract_strided_slice %25 {offsets = [1, 0, 0], sizes = [16, 16, 4], strides = [1, 1, 1]} : vector<18x16x4xbf16> to vector<16x16x4xbf16>
    %29 = vector.shape_cast %28 : vector<16x16x4xbf16> to vector<256x4xbf16>
    %30 = vector.extract_strided_slice %25 {offsets = [2, 0, 0], sizes = [16, 16, 4], strides = [1, 1, 1]} : vector<18x16x4xbf16> to vector<16x16x4xbf16>
    %31 = vector.shape_cast %30 : vector<16x16x4xbf16> to vector<256x4xbf16>
    %32 = tpu.concatenate %13, %15, %17, %20, %22, %24, %27, %29, %31 in 1 : vector<256x4xbf16>, vector<256x4xbf16>, vector<256x4xbf16>, vector<256x4xbf16>, vector<256x4xbf16>, vector<256x4xbf16>, vector<256x4xbf16>, vector<256x4xbf16>, vector<256x4xbf16> -> vector<256x36xbf16>
    %c0_17 = arith.constant 0 : index
    %c0_18 = arith.constant 0 : index
    %33 = vector.load %arg2[%c0_17, %c0_18] : memref<36x4xbf16, #tpu.memory_space<vmem>>, vector<36x4xbf16>
    %cst_19 = arith.constant dense<0.000000e+00> : vector<256x4xf32>
    %34 = tpu.matmul %32, %33, %cst_19 {dimension_numbers = #tpu.dot_dimension_numbers<[1], [0], [0], [1], [0, 0, 1, 1], [], []>} : vector<256x36xbf16>, vector<36x4xbf16>, vector<256x4xf32> -> vector<256x4xf32>
    %cst_20 = arith.constant dense<0.000000e+00> : vector<4xf32>
    %35 = vector.multi_reduction <add>, %34, %cst_20 [0] : vector<256x4xf32> to vector<4xf32>
    %36 = vector.shape_cast %35 : vector<4xf32> to vector<1x4xf32>
    %cst_21 = arith.constant 3.906250e-03 : f32
    %37 = vector.broadcast %cst_21 : f32 to vector<1x4xf32>
    %38 = arith.mulf %36, %37 : vector<1x4xf32>
    %39 = arith.mulf %34, %34 : vector<256x4xf32>
    %cst_22 = arith.constant dense<0.000000e+00> : vector<4xf32>
    %40 = vector.multi_reduction <add>, %39, %cst_22 [0] : vector<256x4xf32> to vector<4xf32>
    %41 = vector.shape_cast %40 : vector<4xf32> to vector<1x4xf32>
    %cst_23 = arith.constant 3.906250e-03 : f32
    %42 = vector.broadcast %cst_23 : f32 to vector<1x4xf32>
    %43 = arith.mulf %41, %42 : vector<1x4xf32>
    %44 = arith.mulf %38, %38 : vector<1x4xf32>
    %45 = arith.subf %43, %44 : vector<1x4xf32>
    %cst_24 = arith.constant 0.000000e+00 : f32
    %46 = vector.broadcast %cst_24 : f32 to vector<1x4xf32>
    %47 = arith.maximumf %45, %46 : vector<1x4xf32>
    %48 = vector.broadcast %38 : vector<1x4xf32> to vector<256x4xf32>
    %49 = arith.subf %34, %48 : vector<256x4xf32>
    %cst_25 = arith.constant 9.99999974E-6 : f32
    %50 = vector.broadcast %cst_25 : f32 to vector<1x4xf32>
    %51 = arith.addf %47, %50 : vector<1x4xf32>
    %52 = math.rsqrt %51 : vector<1x4xf32>
    %53 = vector.broadcast %52 : vector<1x4xf32> to vector<256x4xf32>
    %54 = arith.mulf %49, %53 : vector<256x4xf32>
    %cst_26 = arith.constant 0.000000e+00 : f32
    %55 = vector.broadcast %cst_26 : f32 to vector<256x4xf32>
    %56 = arith.maximumf %54, %55 : vector<256x4xf32>
    %57 = arith.truncf %56 : vector<256x4xf32> to vector<256x4xbf16>
    %58 = vector.shape_cast %57 : vector<256x4xbf16> to vector<16x16x4xbf16>
    %c1_27 = arith.constant 1 : index
    %c16_28 = arith.constant 16 : index
    %c0_29 = arith.constant 0 : index
    %59 = vector.load %arg5[%c1_27, %c16_28, %c0_29] : memref<18x33x4xbf16, #tpu.memory_space<vmem>>, vector<16x16x4xbf16>
    tpu.vector_store %arg5[%c1_27, %c16_28, %c0_29], %58 {strides = array<i32>} : memref<18x33x4xbf16, #tpu.memory_space<vmem>>, vector<16x16x4xbf16>,
    %c0_30 = arith.constant 0 : index
    %c15_31 = arith.constant 15 : index
    %c0_32 = arith.constant 0 : index
    %60 = vector.load %arg5[%c0_30, %c15_31, %c0_32] : memref<18x33x4xbf16, #tpu.memory_space<vmem>>, vector<18x18x4xbf16>
    %61 = vector.extract_strided_slice %60 {offsets = [0, 0, 0], sizes = [18, 16, 4], strides = [1, 1, 1]} : vector<18x18x4xbf16> to vector<18x16x4xbf16>
    %62 = vector.extract_strided_slice %61 {offsets = [0, 0, 0], sizes = [16, 16, 4], strides = [1, 1, 1]} : vector<18x16x4xbf16> to vector<16x16x4xbf16>
    %63 = vector.shape_cast %62 : vector<16x16x4xbf16> to vector<256x4xbf16>
    %64 = vector.extract_strided_slice %61 {offsets = [1, 0, 0], sizes = [16, 16, 4], strides = [1, 1, 1]} : vector<18x16x4xbf16> to vector<16x16x4xbf16>
    %65 = vector.shape_cast %64 : vector<16x16x4xbf16> to vector<256x4xbf16>
    %66 = vector.extract_strided_slice %61 {offsets = [2, 0, 0], sizes = [16, 16, 4], strides = [1, 1, 1]} : vector<18x16x4xbf16> to vector<16x16x4xbf16>
    %67 = vector.shape_cast %66 : vector<16x16x4xbf16> to vector<256x4xbf16>
    %68 = vector.extract_strided_slice %60 {offsets = [0, 1, 0], sizes = [18, 16, 4], strides = [1, 1, 1]} : vector<18x18x4xbf16> to vector<18x16x4xbf16>
    %69 = vector.extract_strided_slice %68 {offsets = [0, 0, 0], sizes = [16, 16, 4], strides = [1, 1, 1]} : vector<18x16x4xbf16> to vector<16x16x4xbf16>
    %70 = vector.shape_cast %69 : vector<16x16x4xbf16> to vector<256x4xbf16>
    %71 = vector.extract_strided_slice %68 {offsets = [1, 0, 0], sizes = [16, 16, 4], strides = [1, 1, 1]} : vector<18x16x4xbf16> to vector<16x16x4xbf16>
    %72 = vector.shape_cast %71 : vector<16x16x4xbf16> to vector<256x4xbf16>
    %73 = vector.extract_strided_slice %68 {offsets = [2, 0, 0], sizes = [16, 16, 4], strides = [1, 1, 1]} : vector<18x16x4xbf16> to vector<16x16x4xbf16>
    %74 = vector.shape_cast %73 : vector<16x16x4xbf16> to vector<256x4xbf16>
    %75 = vector.extract_strided_slice %60 {offsets = [0, 2, 0], sizes = [18, 16, 4], strides = [1, 1, 1]} : vector<18x18x4xbf16> to vector<18x16x4xbf16>
    %76 = vector.extract_strided_slice %75 {offsets = [0, 0, 0], sizes = [16, 16, 4], strides = [1, 1, 1]} : vector<18x16x4xbf16> to vector<16x16x4xbf16>
    %77 = vector.shape_cast %76 : vector<16x16x4xbf16> to vector<256x4xbf16>
    %78 = vector.extract_strided_slice %75 {offsets = [1, 0, 0], sizes = [16, 16, 4], strides = [1, 1, 1]} : vector<18x16x4xbf16> to vector<16x16x4xbf16>
    %79 = vector.shape_cast %78 : vector<16x16x4xbf16> to vector<256x4xbf16>
    %80 = vector.extract_strided_slice %75 {offsets = [2, 0, 0], sizes = [16, 16, 4], strides = [1, 1, 1]} : vector<18x16x4xbf16> to vector<16x16x4xbf16>
    %81 = vector.shape_cast %80 : vector<16x16x4xbf16> to vector<256x4xbf16>
    %82 = tpu.concatenate %63, %65, %67, %70, %72, %74, %77, %79, %81 in 1 : vector<256x4xbf16>, vector<256x4xbf16>, vector<256x4xbf16>, vector<256x4xbf16>, vector<256x4xbf16>, vector<256x4xbf16>, vector<256x4xbf16>, vector<256x4xbf16>, vector<256x4xbf16> -> vector<256x36xbf16>
    %c0_33 = arith.constant 0 : index
    %c0_34 = arith.constant 0 : index
    %83 = vector.load %arg3[%c0_33, %c0_34] : memref<36x4xbf16, #tpu.memory_space<vmem>>, vector<36x4xbf16>
    %cst_35 = arith.constant dense<0.000000e+00> : vector<256x4xf32>
    %84 = tpu.matmul %82, %83, %cst_35 {dimension_numbers = #tpu.dot_dimension_numbers<[1], [0], [0], [1], [0, 0, 1, 1], [], []>} : vector<256x36xbf16>, vector<36x4xbf16>, vector<256x4xf32> -> vector<256x4xf32>
    %cst_36 = arith.constant dense<0.000000e+00> : vector<4xf32>
    %85 = vector.multi_reduction <add>, %84, %cst_36 [0] : vector<256x4xf32> to vector<4xf32>
    %86 = vector.shape_cast %85 : vector<4xf32> to vector<1x4xf32>
    %cst_37 = arith.constant 3.906250e-03 : f32
    %87 = vector.broadcast %cst_37 : f32 to vector<1x4xf32>
    %88 = arith.mulf %86, %87 : vector<1x4xf32>
    %89 = arith.mulf %84, %84 : vector<256x4xf32>
    %cst_38 = arith.constant dense<0.000000e+00> : vector<4xf32>
    %90 = vector.multi_reduction <add>, %89, %cst_38 [0] : vector<256x4xf32> to vector<4xf32>
    %91 = vector.shape_cast %90 : vector<4xf32> to vector<1x4xf32>
    %cst_39 = arith.constant 3.906250e-03 : f32
    %92 = vector.broadcast %cst_39 : f32 to vector<1x4xf32>
    %93 = arith.mulf %91, %92 : vector<1x4xf32>
    %94 = arith.mulf %88, %88 : vector<1x4xf32>
    %95 = arith.subf %93, %94 : vector<1x4xf32>
    %cst_40 = arith.constant 0.000000e+00 : f32
    %96 = vector.broadcast %cst_40 : f32 to vector<1x4xf32>
    %97 = arith.maximumf %95, %96 : vector<1x4xf32>
    %98 = vector.broadcast %88 : vector<1x4xf32> to vector<256x4xf32>
    %99 = arith.subf %84, %98 : vector<256x4xf32>
    %cst_41 = arith.constant 9.99999974E-6 : f32
    %100 = vector.broadcast %cst_41 : f32 to vector<1x4xf32>
    %101 = arith.addf %97, %100 : vector<1x4xf32>
    %102 = math.rsqrt %101 : vector<1x4xf32>
    %103 = vector.broadcast %102 : vector<1x4xf32> to vector<256x4xf32>
    %104 = arith.mulf %99, %103 : vector<256x4xf32>
    %105 = vector.shape_cast %7 : vector<16x16x4xf32> to vector<256x4xf32>
    %106 = arith.addf %104, %105 : vector<256x4xf32>
    %cst_42 = arith.constant 0.000000e+00 : f32
    %107 = vector.broadcast %cst_42 : f32 to vector<256x4xf32>
    %108 = arith.maximumf %106, %107 : vector<256x4xf32>
    %c0_43 = arith.constant 0 : index
    %c0_44 = arith.constant 0 : index
    %109 = vector.load %arg4[%c0_43, %c0_44] : memref<256x4xf32, #tpu.memory_space<vmem>>, vector<256x4xf32>
    tpu.vector_store %arg4[%c0_43, %c0_44], %108 {strides = array<i32>} : memref<256x4xf32, #tpu.memory_space<vmem>>, vector<256x4xf32>,
    return
  }
  func.func @transform_0(%arg0: i32) -> (i32, i32, i32, i32) {
    %c0_i32 = arith.constant 0 : i32
    %c0_i32_0 = arith.constant 0 : i32
    %c0_i32_1 = arith.constant 0 : i32
    %c0_i32_2 = arith.constant 0 : i32
    return %arg0, %c0_i32, %c0_i32_0, %c0_i32_1 : i32, i32, i32, i32
  }
  func.func @transform_1(%arg0: i32) -> (i32, i32) {
    %c0_i32 = arith.constant 0 : i32
    %c0_i32_0 = arith.constant 0 : i32
    %c0_i32_1 = arith.constant 0 : i32
    return %c0_i32, %c0_i32_0 : i32, i32
  }
  func.func @transform_2(%arg0: i32) -> (i32, i32) {
    %c0_i32 = arith.constant 0 : i32
    %c0_i32_0 = arith.constant 0 : i32
    %c0_i32_1 = arith.constant 0 : i32
    return %c0_i32, %c0_i32_0 : i32, i32
  }
  func.func @transform_3(%arg0: i32) -> (i32, i32) {
    %c0_i32 = arith.constant 0 : i32
    %c0_i32_0 = arith.constant 0 : i32
    return %arg0, %c0_i32 : i32, i32
  }
}

</mosaic_0001>

<bundles_post_ra>
// kernel: basic_block_forward.1
= control target key start
LH: loop header
LB: loop body
LE: loop exit
PB: predicated region body
PF: predicated region fallthrough
CT: control target
= control target key end

     0   :  { %s5216_s12 = smov 0   ;;  %s9011_s0 = inlined_call_operand.vmem [shape: f32[2,16,16,4], index: 0, kind: input, shape index: {}]   ;;  %s9012_s1 = inlined_call_operand.vmem [shape: bf16[36,4], index: 1, kind: input, shape index: {}]   ;;  %s9013_s2 = inlined_call_operand.vmem [shape: bf16[36,4], index: 2, kind: input, shape index: {}]   ;;  %s9014_s3 = inlined_call_operand.vmem [shape: f32[512,4], index: 3, kind: output, shape index: {}]  }
   0x1 LB: > { %s5222_s13 = sadd.s32 4294967295, %s5185_s12   ;;  %p4655_p0 = scmp.ge.s32.totalorder %s5185_s12, 1  ;;  %s5185_s12 = sphi %s5216_s12, %s13_s12  }
   0x2   : > { %p137_p1 = scmp.lt.s32.totalorder %s5185_s12, 3 }
   0x4   : > { %p138_p2 = pnand %p4655_p0, %p137_p1 }
   0x6   : > { %141 = sbr.rel (%p138_p2) target bundleno = 1359 (0x54f), region = 32 }
   0xd   : > { %vm179_vm0 = vcmask 27648   ;;  %p161_p3 = scmp.lt.s32.totalorder %s5222_s13, 1  ;;  %vm182_vm1 = vcmask 24576   ;;  %v5187_v0 = vmov 0   ;;  %vm183_vm2 = vsmask.f32 256 }
   0xe   : > { %180 = vst.msk [vmem:[#allocation2 + $0x8] sm:$0xf] %vm179_vm0, %v5187_v0  ;;  %181 = vst.msk [vmem:[#allocation2 + $0xc] sm:$0xf] %vm179_vm0, %v5187_v0  ;;  %v185_v1 = vld [vmem:[#allocation2 + $0x10] sm:$0x1] }
   0xf   : > { %192 = vst.msk [vmem:[#allocation2 + $0x15c] sm:$0xf] %vm179_vm0, %v5187_v0  ;;  %193 = vst.msk [vmem:[#allocation2 + $0x160] sm:$0xf] %vm179_vm0, %v5187_v0  ;;  %s162_s14 = scalar_select %p161_p3, %s5222_s13, 1  ;;  %vm173_vm4 = vcmask 27651  }
  0x10   : > { %vm5233_vm3 = vmand %vm182_vm1, %vm183_vm2  ;;  %vm558_vm5 = vsmask.f32 4368  ;;  %vm174_vm6 = vsmask.f32 7950  ;;  %vm956_vm7 = vsmask.f32 3328 }
  0x11   : > { %v186_v3 = vsel %vm5233_vm3, 0, %v185_v1  ;;  %s4908_s15 = sshll.u32 %s162_s14, 8  ;;  %v201_v4 = vld [vmem:[#allocation2 + $0x2c] sm:$0x8]  ;;  %v198_v5 = vld [vmem:[#allocation2 + $0x18] sm:$0x8]  ;;  %vm5244_vm9 = vmand %vm173_vm4, %vm174_vm6 }
  0x12   : > { %187 = vst [vmem:[#allocation2 + $0x10] sm:$0x1] %v186_v3  ;;  %s5242_s18 = scalar_lea.vmem %s9011_s0, %s4908_s15  ;;  %vm957_vm8 = vsmask.f32 7440  ;;  %v204_v7 = vld [vmem:[#allocation2 + $0x40] sm:$0x8]  ;;  %vm5287_vm10 = vmor %vm183_vm2, %vm558_vm5 }
  0x13   : > { %v246_v8 = vld [vmem:[#allocation2 + $0x24] sm:$0x1]  ;;  %v295_v10 = vld [vmem:[%s5242_s18 + $0x8] sm:$0xff]  ;;  %v296_v11 = vld [vmem:[%s5242_s18 + $0x10] sm:$0xff]  ;;  %v202_v12 = vsel %vm5244_vm9, 0, %v201_v4  ;;  %v199_v13 = vsel %vm5244_vm9, 0, %v198_v5 }
  0x14   : > { %v294_v9 = vld [vmem:[%s5242_s18] sm:$0xff]  ;;  %v205_v14 = vsel %vm5244_vm9, 0, %v204_v7  ;;  %v4910_v16 = vpack.c.bf16 %v295_v10, %v295_v10  ;;  %v297_v17 = vld [vmem:[%s5242_s18 + $0x18] sm:$0xff]  ;;  %v4911_v18 = vpack.c.bf16 %v296_v11, %v296_v11  ;;  %v299_v20 = vld [vmem:[%s5242_s18 + $0x28] sm:$0xff]  ;;  %203 = vst [vmem:[#allocation2 + $0x2c] sm:$0x8] %v202_v12 }
  0x15   : > { %v4909_v15 = vpack.c.bf16 %v294_v9, %v294_v9  ;;  %v298_v19 = vld [vmem:[%s5242_s18 + $0x20] sm:$0xff]  ;;  %200 = vst [vmem:[#allocation2 + $0x18] sm:$0x8] %v199_v13  ;;  %206 = vst [vmem:[#allocation2 + $0x40] sm:$0x8] %v205_v14  ;;  %v247_v21 = vsel %vm5233_vm3, 0, %v246_v8  ;;  %v4912_v24 = vpack.c.bf16 %v297_v17, %v297_v17  ;;  %v4914_v26 = vpack.c.bf16 %v299_v20, %v299_v20 }
  0x16   : > { %v487_v22 = vld [vmem:[#allocation2 + $0x8] sm:$0xf]  ;;  %v488_v23 = vld [vmem:[#allocation2 + $0xc] sm:$0xf]  ;;  %v4913_v25 = vpack.c.bf16 %v298_v19, %v298_v19  ;;  %248 = vst [vmem:[#allocation2 + $0x24] sm:$0x1] %v247_v21  ;;  %vm5295_vm11 = vmor %vm956_vm7, %vm957_vm8 }
  0x17   : > { %v249_v27 = vld [vmem:[#allocation2 + $0x38] sm:$0x1]  ;;  %v575_v28 = vshrl.u32 %v488_v23, 16  ;;  %v578_v29 = vshll.u32 %v488_v23, 16  ;;  %v4728_v30 = vcombine.low %v487_v22, %v488_v23  ;;  %v566_v31 = vshrl.u32 %v487_v22, 16  ;;  %v300_v33 = vld [vmem:[%s5242_s18 + $0x30] sm:$0xff] }
  0x18   : > { %454 = vst.msk [vmem:[#allocation2 + $0x1c] sm:$0xf] %vm179_vm0, %v4909_v15  ;;  %455 = vst.msk [vmem:[#allocation2 + $0x20] sm:$0xf] %vm179_vm0, %v4910_v16  ;;  %v252_v32 = vld [vmem:[#allocation2 + $0x4c] sm:$0x1]  ;;  %v4915_v39 = vpack.c.bf16 %v300_v33, %v300_v33 }
  0x19   : > { %456 = vst.msk [vmem:[#allocation2 + $0x30] sm:$0xf] %vm179_vm0, %v4911_v18  ;;  %v569_v34 = vshll.u32 %v487_v22, 16  ;;  %457 = vst.msk [vmem:[#allocation2 + $0x34] sm:$0xf] %vm179_vm0, %v4912_v24  ;;  %v250_v35 = vsel %vm5233_vm3, 0, %v249_v27 }
  0x1a   : > { %458 = vst.msk [vmem:[#allocation2 + $0x44] sm:$0xf] %vm179_vm0, %v4913_v25  ;;  %459 = vst.msk [vmem:[#allocation2 + $0x48] sm:$0xf] %vm179_vm0, %v4914_v26  ;;  %v253_v36 = vsel %vm5233_vm3, 0, %v252_v32  ;;  %v301_v38 = vld [vmem:[%s5242_s18 + $0x38] sm:$0xff] }
  0x1b   : > { %v207_v37 = vld [vmem:[#allocation2 + $0x54] sm:$0x8]  ;;  %v577_v40 = vrot.slane %v575_v28, 7  ;;  %v5274_v41 = vrot.slane %v578_v29, 5  ;;  %v965_v42 = vrot.slane %v575_v28, 4  ;;  %s5188_s19 = smov 12   ;;  %v4916_v61 = vpack.c.bf16 %v301_v38, %v301_v38 }
  0x1c   : > { %1409 = vrot.lane.b32.xlu0 %v4728_v30, %s5188_s19  ;;  %v568_v43 = vrot.slane %v566_v31, 7  ;;  %v489_v44 = vld [vmem:[#allocation2 + $0x10] sm:$0x1]  ;;  %251 = vst [vmem:[#allocation2 + $0x38] sm:$0x1] %v250_v35  ;;  %v959_v45 = vrot.slane %v566_v31, 4 }
  0x1d   : > { %254 = vst [vmem:[#allocation2 + $0x4c] sm:$0x1] %v253_v36  ;;  %v960_v46 = vrot.slane %v569_v34, 5  ;;  %v969_v47 = vshll.u32 %v489_v44, 16  ;;  %v208_v48 = vsel %vm5244_vm9, 0, %v207_v37  ;;  %v580_v50 = vor.u32 %v578_v29, %v577_v40  ;;  %v302_v54 = vld [vmem:[%s5242_s18 + $0x40] sm:$0xff] }
  0x1e   : > { %460 = vst.msk [vmem:[#allocation2 + $0x58] sm:$0xf] %vm179_vm0, %v4915_v39  ;;  %v210_v49 = vld [vmem:[#allocation2 + $0x68] sm:$0x8]  ;;  %v5280_v51 = vor.u32 %v569_v34, %v568_v43  ;;  %v573_v52 = vrot.slane %v568_v43, 4  ;;  %v966_v53 = vor.u32 %v965_v42, %v5274_v41  ;;  %v4917_v4 = vpack.c.bf16 %v302_v54, %v302_v54  ;;  %v304_v5 = vld [vmem:[%s5242_s18 + $0x50] sm:$0xff] }
  0x1f   : > { %209 = vst [vmem:[#allocation2 + $0x54] sm:$0x8] %v208_v48  ;;  %v303_v55 = vld [vmem:[%s5242_s18 + $0x48] sm:$0xff]  ;;  %v961_v57 = vor.u32 %v960_v46, %v959_v45  ;;  %v971_v58 = vrot.slane %v969_v47, 5  ;;  %v490_v60 = vld [vmem:[#allocation2 + $0x18] sm:$0x8]  ;;  %v4919_v11 = vpack.c.bf16 %v304_v5, %v304_v5 }
  0x20   : > { %v494_v59 = vld [vmem:[#allocation2 + $0x2c] sm:$0x8]  ;;  %v211_v62 = vsel %vm5244_vm9, 0, %v210_v49  ;;  %v967_v0 = vrot.slane %v966_v53, 4  ;;  %v583_v3 = vshrl.u32 %v490_v60, 16  ;;  %v4918_v10 = vpack.c.bf16 %v303_v55, %v303_v55  ;;  %s5189_s20 = smov 16  }
  0x21   : > { %v605_v1 = vshrl.u32 %v494_v59, 16  ;;  %212 = vst [vmem:[#allocation2 + $0x68] sm:$0x8] %v211_v62  ;;  %v5300_v7 = vld [vmem:[#allocation2 + $0x1c] sm:$0xf]  ;;  %v5309_v12 = vsel %vm5287_vm10, %v573_v52, %v580_v50  ;;  %v962_v20 = vrot.slane %v961_v57, 4 }
  0x22   : > { %v5302_v8 = vld [vmem:[#allocation2 + $0x20] sm:$0xf]  ;;  %v5304_v9 = vld [vmem:[#allocation2 + $0x30] sm:$0xf]  ;;  %461 = vst.msk [vmem:[#allocation2 + $0x5c] sm:$0xf] %vm179_vm0, %v4916_v61  ;;  %v972_v21 = vsel %vm5295_vm11, %v967_v0, %v971_v58 }
  0x23   : > { %v597_v13 = vshrl.u32 %v5302_v8, 16  ;;  %v4729_v14 = vcombine.low %v5300_v7, %v5302_v8  ;;  %v588_v15 = vshrl.u32 %v5300_v7, 16  ;;  %v5315_v16 = vld [vmem:[#allocation2 + $0x34] sm:$0xf]  ;;  %v610_v17 = vshrl.u32 %v5304_v9, 16  ;;  %s5190_s21 = smov 20  }
  0x24   : > { %462 = vst.msk [vmem:[#allocation2 + $0x6c] sm:$0xf] %vm179_vm0, %v4917_v4  ;;  %v619_v18 = vshrl.u32 %v5315_v16, 16  ;;  %v5322_v19 = vcombine.low %v5304_v9, %v5315_v16  ;;  %v5326_v22 = vld [vmem:[#allocation2 + $0x44] sm:$0xf]  ;;  %v4694_v27 = vrot.slane %v605_v1, 11  ;;  %v964_v28 = vsel %vm5295_vm11, %v962_v20, %v5274_v41 }
  0x25   : > { %v5328_v23 = vld [vmem:[#allocation2 + $0x48] sm:$0xf]  ;;  %463 = vst.msk [vmem:[#allocation2 + $0x70] sm:$0xf] %vm179_vm0, %v4918_v10  ;;  %464 = vst.msk [vmem:[#allocation2 + $0x80] sm:$0xf] %vm179_vm0, %v4919_v11  ;;  %1446 = vrot.lane.b32.xlu0 %v4729_v14, %s5189_s20  ;;  %1411 = vrot.lane.b32.xlu1 %v4729_v14, %s5188_s19  ;;  %v4746_v33 = vcombine.low %v964_v28, %v972_v21 }
  0x26   : > { %v632_v24 = vshrl.u32 %v5326_v22, 16  ;;  %v641_v25 = vshrl.u32 %v5328_v23, 16  ;;  %v5338_v26 = vcombine.low %v5326_v22, %v5328_v23  ;;  %v612_v29 = vrot.slane %v610_v17, 7  ;;  %v498_v32 = vld [vmem:[#allocation2 + $0x40] sm:$0x8]  ;;  %s5191_s22 = smov 24  }
  0x27   : > { %v613_v30 = vshll.u32 %v5304_v9, 16  ;;  %v621_v31 = vrot.slane %v619_v18, 7  ;;  %v622_v34 = vshll.u32 %v5315_v16, 16  ;;  %v4693_v35 = vrot.slane %v583_v3, 11  ;;  %v493_v59 = vld [vmem:[#allocation2 + $0x24] sm:$0x1] }
  0x28   : > { %v590_v36 = vrot.slane %v588_v15, 7  ;;  %v617_v38 = vrot.slane %v612_v29, 4  ;;  %v591_v39 = vshll.u32 %v5300_v7, 16  ;;  %v599_v40 = vrot.slane %v597_v13, 7  ;;  %v497_v7 = vld [vmem:[#allocation2 + $0x38] sm:$0x1] }
  0x29   : > { %v615_v37 = vor.u32 %v613_v30, %v612_v29  ;;  %1483 = vrot.lane.b32.xlu0 %v5322_v19, %s5190_s21  ;;  %1448 = vrot.lane.b32.xlu1 %v5322_v19, %s5189_s20  ;;  %v624_v41 = vor.u32 %v622_v34, %v621_v31  ;;  %v600_v43 = vshll.u32 %v5302_v8, 16  ;;  %v627_v44 = vshrl.u32 %v498_v32, 16  ;;  %s5192_s23 = smov 8   ;;  %s5193_s24 = smov 4   ;;  %v501_v29 = vld [vmem:[#allocation2 + $0x4c] sm:$0x1] }
  0x2a   : > { %v595_v42 = vrot.slane %v590_v36, 4  ;;  %v593_v46 = vor.u32 %v591_v39, %v590_v36  ;;  %v634_v47 = vrot.slane %v632_v24, 7  ;;  %v635_v48 = vshll.u32 %v5326_v22, 16  ;;  %v502_v32 = vld [vmem:[#allocation2 + $0x54] sm:$0x8]  ;;  %s5194_s29 = smov 28  }
  0x2b   : > { %v616_v45 = vsel %vm5287_vm10, %v4694_v27, %v615_v37  ;;  %v625_v49 = vsel %vm5287_vm10, %v617_v38, %v624_v41  ;;  %v602_v50 = vor.u32 %v600_v43, %v599_v40  ;;  %v4695_v52 = vrot.slane %v627_v44, 11  ;;  %v5400_v38 = vld [vmem:[#allocation2 + $0x5c] sm:$0xf]  ;;  %v506_v44 = vld [vmem:[#allocation2 + $0x68] sm:$0x8]  ;;  %s5195_s30 = smov 32  }
  0x2c   : > { %v643_v53 = vrot.slane %v641_v25, 7  ;;  %v5366_v54 = vcombine.low %v616_v45, %v625_v49  ;;  %v594_v55 = vsel %vm5287_vm10, %v4693_v35, %v593_v46  ;;  %v637_v57 = vor.u32 %v635_v48, %v634_v47  ;;  %v5114_v45 = vld [vmem:[%s9012_s1 + $0x8] sm:$0xff]   ;;  %s4658_s14 = sshll.u32 %s5222_s13, 5 }
  0x2d   : > { %v639_v58 = vrot.slane %v634_v47, 4  ;;  %1563 = vrot.lane.b32.xlu0 %v4746_v33, %s5191_s22  ;;  %1485 = vrot.lane.b32.xlu1 %v5338_v26, %s5190_s21  ;;  %v603_v60 = vsel %vm5287_vm10, %v595_v42, %v602_v50  ;;  %v644_v61 = vshll.u32 %v5328_v23, 16  ;;  %v973_v62 = vrot.slane %v588_v15, 4  ;;  %v5394_v33 = vld [vmem:[#allocation2 + $0x58] sm:$0xf]  ;;  %p8788_p4 = scmp.lt.s32.totalorder %s4658_s14, 63 }
  0x2e   : > { %v974_v0 = vrot.slane %v591_v39, 5  ;;  %v5376_v1 = vcombine.low %v594_v55, %v603_v60  ;;  %v638_v3 = vsel %vm5287_vm10, %v4695_v52, %v637_v57  ;;  %v977_v4 = vrot.slane %v600_v43, 5  ;;  %v5113_v39 = vld [vmem:[%s9012_s1] sm:$0xff]  }
  0x2f   : > { %v979_v5 = vrot.slane %v597_v13, 4  ;;  %v646_v10 = vor.u32 %v644_v61, %v643_v53  ;;  %v983_v14 = vshll.u32 %v493_v59, 16  ;;  %v987_v20 = vrot.slane %v610_v17, 4  ;;  %5011 = vmatprep.subr.bf16.mxu0 %v5113_v39  ;;  %v5423_v59 = vld [vmem:[#allocation2 + $0x6c] sm:$0xf]  ;;  %s9379_s14 = smov (!%p8788_p4, %s4658_s14), 63 }
  0x30   : > { %v975_v11 = vor.u32 %v974_v0, %v973_v62  ;;  %v988_v27 = vrot.slane %v613_v30, 5  ;;  %v991_v15 = vrot.slane %v622_v34, 5  ;;  %v993_v28 = vrot.slane %v619_v18, 4  ;;  %5012 = vmatpush3.bf16.msra.mxu0 %v5113_v39  ;;  %v5429_v62 = vld [vmem:[#allocation2 + $0x70] sm:$0xf]  ;;  %s4659_s13 = sshll.u32 %s9379_s14, 3 }
  0x31   : > { %v980_v21 = vor.u32 %v979_v5, %v977_v4  ;;  %1297 = vrot.lane.b32.xlu1 %v5366_v54, %s5192_s23  ;;  %1262 = vrot.lane.b32.xlu0 %v5376_v1, %s5193_s24  ;;  %v647_v8 = vsel %vm5287_vm10, %v639_v58, %v646_v10  ;;  %v985_v9 = vrot.slane %v983_v14, 5  ;;  %v997_v17 = vshll.u32 %v497_v7, 16  ;;  %v213_v39 = vld [vmem:[#allocation2 + $0x7c] sm:$0x8] }
  0x32   : > { %v976_v13 = vrot.slane %v975_v11, 4  ;;  %v5392_v30 = vcombine.low %v638_v3, %v647_v8  ;;  %v989_v16 = vor.u32 %v988_v27, %v987_v20  ;;  %v994_v18 = vor.u32 %v993_v28, %v991_v15  ;;  %5013 = vmatprep.subr.bf16.mxu0 %v5114_v45 }
  0x33   : > { %v981_v31 = vrot.slane %v980_v21, 4  ;;  %v999_v35 = vrot.slane %v997_v17, 5  ;;  %v1001_v36 = vrot.slane %v632_v24, 4  ;;  %v1002_v37 = vrot.slane %v635_v48, 5 }
  0x34   : > { %v978_v34 = vsel %vm5295_vm11, %v976_v13, %v977_v4  ;;  %v990_v41 = vrot.slane %v989_v16, 4  ;;  %v995_v42 = vrot.slane %v994_v18, 4  ;;  %v1005_v43 = vrot.slane %v644_v61, 5  ;;  %5014 = vmatpush3.bf16.msra.mxu0 %v5114_v45  ;;  %v306_v45 = vld [vmem:[%s5242_s18 + $0x60] sm:$0xff] }
  0x35   : > { %v986_v40 = vsel %vm5295_vm11, %v981_v31, %v985_v9  ;;  %1299 = vrot.lane.b32.xlu1 %v5392_v30, %s5192_s23  ;;  %1264 = vrot.lane.b32.xlu0 %v5366_v54, %s5193_s24  ;;  %v1003_v24 = vor.u32 %v1002_v37, %v1001_v36  ;;  %v1007_v46 = vrot.slane %v641_v25, 4  ;;  %v1011_v47 = vshll.u32 %v501_v29, 16  ;;  %v258_v9 = vld [vmem:[#allocation2 + $0x74] sm:$0x1] }
  0x36   : > { %v4747_v22 = vcombine.low %v978_v34, %v986_v40  ;;  %v992_v48 = vsel %vm5295_vm11, %v990_v41, %v991_v15  ;;  %v1000_v49 = vsel %vm5295_vm11, %v995_v42, %v999_v35  ;;  %v649_v50 = vshrl.u32 %v502_v32, 16  ;;  %v255_v15 = vld [vmem:[#allocation2 + $0x60] sm:$0x1]  ;;  %v305_v40 = vld [vmem:[%s5242_s18 + $0x58] sm:$0xff] }
  0x37   : > { %v654_v52 = vshrl.u32 %v5394_v33, 16  ;;  %v5421_v53 = vcombine.low %v992_v48, %v1000_v49  ;;  %v1004_v55 = vrot.slane %v1003_v24, 4  ;;  %v1008_v57 = vor.u32 %v1007_v46, %v1005_v43  ;;  %v307_v46 = vld [vmem:[%s5242_s18 + $0x68] sm:$0xff] }
  0x38   : > { %v1013_v58 = vrot.slane %v1011_v47, 5  ;;  %v4696_v23 = vrot.slane %v649_v50, 11  ;;  %v657_v60 = vshll.u32 %v5394_v33, 16  ;;  %v663_v61 = vshrl.u32 %v5400_v38, 16  ;;  %v261_v47 = vld [vmem:[#allocation2 + $0x88] sm:$0x1] }
  0x39   : > { %v656_v25 = vrot.slane %v654_v52, 7  ;;  %1266 = vrot.lane.b32.xlu1 %v5392_v30, %s5193_s24  ;;  %1598 = vrot.lane.b32.xlu0 %v4747_v22, %s5194_s29  ;;  %v1006_v0 = vsel %vm5295_vm11, %v1004_v55, %v1005_v43  ;;  %v1009_v3 = vrot.slane %v1008_v57, 4  ;;  %v666_v4 = vshll.u32 %v5400_v38, 16  ;;  %v264_v55 = vld [vmem:[#allocation2 + $0x9c] sm:$0x1] }
  0x3a   : > { %v671_v5 = vshrl.u32 %v506_v44, 16  ;;  %v665_v11 = vrot.slane %v663_v61, 7  ;;  %v676_v14 = vshrl.u32 %v5423_v59, 16  ;;  %v679_v21 = vshll.u32 %v5423_v59, 16  ;;  %v216_v44 = vld [vmem:[#allocation2 + $0x90] sm:$0x8] }
  0x3b   : > { %v659_v7 = vor.u32 %v657_v60, %v656_v25  ;;  %v661_v10 = vrot.slane %v656_v25, 4  ;;  %v1014_v20 = vsel %vm5295_vm11, %v1009_v3, %v1013_v58  ;;  %v685_v27 = vshrl.u32 %v5429_v62, 16  ;;  %v219_v57 = vld [vmem:[#allocation2 + $0xa4] sm:$0x8]  ;;  %v308_v25 = vld [vmem:[%s5242_s18 + $0x70] sm:$0xff] }
  0x3c   : > { %v668_v28 = vor.u32 %v666_v4, %v665_v11  ;;  %v4697_v8 = vrot.slane %v671_v5, 11  ;;  %v678_v13 = vrot.slane %v676_v14, 7  ;;  %v5453_v17 = vcombine.low %v1006_v0, %v1014_v20  ;;  %v309_v0 = vld [vmem:[%s5242_s18 + $0x78] sm:$0xff]  ;;  %v311_v11 = vld [vmem:[%s5242_s18 + $0x88] sm:$0xff] }
  0x3d   : > { %1565 = vrot.lane.b32.xlu1 %v4747_v22, %s5191_s22  ;;  %1633 = vrot.lane.b32.xlu0 %v5421_v53, %s5195_s30  ;;  %v660_v29 = vsel %vm5287_vm10, %v4696_v23, %v659_v7  ;;  %v687_v31 = vrot.slane %v685_v27, 7  ;;  %v688_v16 = vshll.u32 %v5429_v62, 16  ;;  %v256_v35 = vsel %vm5233_vm3, 0, %v255_v15  ;;  %v222_v7 = vld [vmem:[#allocation2 + $0xb8] sm:$0x8] }
  0x3e   : > { %v669_v18 = vsel %vm5287_vm10, %v661_v10, %v668_v28  ;;  %v681_v32 = vor.u32 %v679_v21, %v678_v13  ;;  %v683_v34 = vrot.slane %v678_v13, 4  ;;  %257 = vst [vmem:[#allocation2 + $0x60] sm:$0x1] %v256_v35  ;;  %v259_v37 = vsel %vm5233_vm3, 0, %v258_v9  ;;  %v310_v10 = vld [vmem:[%s5242_s18 + $0x80] sm:$0xff]  ;;  %v312_v35 = vld [vmem:[%s5242_s18 + $0x90] sm:$0xff] }
  0x3f   : > { %v690_v36 = vor.u32 %v688_v16, %v687_v31  ;;  %v5475_v41 = vcombine.low %v660_v29, %v669_v18  ;;  %260 = vst [vmem:[#allocation2 + $0x74] sm:$0x1] %v259_v37  ;;  %v214_v22 = vsel %vm5244_vm9, 0, %v213_v39  ;;  %v4920_v24 = vpack.c.bf16 %v305_v40, %v305_v40  ;;  %v267_v28 = vld [vmem:[#allocation2 + $0xb0] sm:$0x1] }
  0x40   : > { %v682_v42 = vsel %vm5287_vm10, %v4697_v8, %v681_v32  ;;  %215 = vst [vmem:[#allocation2 + $0x7c] sm:$0x8] %v214_v22  ;;  %v217_v49 = vsel %vm5244_vm9, 0, %v216_v44  ;;  %v4921_v50 = vpack.c.bf16 %v306_v45, %v306_v45  ;;  %v4922_v58 = vpack.c.bf16 %v307_v46, %v307_v46  ;;  %v270_v13 = vld [vmem:[#allocation2 + $0xc4] sm:$0x1] }
  0x41   : > { %1600 = vrot.lane.b32.xlu1 %v5421_v53, %s5194_s29  ;;  %1635 = vrot.lane.b32.xlu0 %v5453_v17, %s5195_s30  ;;  %v691_v43 = vsel %vm5287_vm10, %v683_v34, %v690_v36  ;;  %465 = vst.msk [vmem:[#allocation2 + $0x84] sm:$0xf] %vm179_vm0, %v4920_v24  ;;  %218 = vst [vmem:[#allocation2 + $0x90] sm:$0x8] %v217_v49  ;;  %v262_v23 = vsel %vm5233_vm3, 0, %v261_v47  ;;  %v1015_v3 = vrot.slane %v654_v52, 4 }
  0x42   : > { %v5489_v48 = vcombine.low %v682_v42, %v691_v43  ;;  %v1016_v5 = vrot.slane %v657_v60, 5  ;;  %466 = vst.msk [vmem:[#allocation2 + $0x94] sm:$0xf] %vm179_vm0, %v4921_v50  ;;  %263 = vst [vmem:[#allocation2 + $0x88] sm:$0x1] %v262_v23  ;;  %v265_v20 = vsel %vm5233_vm3, 0, %v264_v55  ;;  %v4923_v8 = vpack.c.bf16 %v308_v25, %v308_v25 }
  0x43   : > { %467 = vst.msk [vmem:[#allocation2 + $0x98] sm:$0xf] %vm179_vm0, %v4922_v58  ;;  %v220_v15 = vsel %vm5244_vm9, 0, %v219_v57  ;;  %v5516_v52 = vrot.slane %v666_v4, 5  ;;  %v1021_v60 = vrot.slane %v663_v61, 4  ;;  %v4924_v31 = vpack.c.bf16 %v309_v0, %v309_v0 }
  0x44   : > { %266 = vst [vmem:[#allocation2 + $0x9c] sm:$0x1] %v265_v20  ;;  %221 = vst [vmem:[#allocation2 + $0xa4] sm:$0x8] %v220_v15  ;;  %v176_v9 = vld [vmem:[#allocation2 + $0x4] sm:$0x8]  ;;  %v4925_v32 = vpack.c.bf16 %v310_v10, %v310_v10  ;;  %v5524_v4 = vcombine.low %v5394_v33, %v5400_v38  ;;  %v1017_v34 = vor.u32 %v1016_v5, %v1015_v3 }
  0x45   : > { %1268 = vrot.lane.b32.xlu1 %v5475_v41, %s5193_s24  ;;  %1301 = vrot.lane.b32.xlu0 %v5475_v41, %s5192_s23  ;;  %v505_v29 = vld [vmem:[#allocation2 + $0x60] sm:$0x1]  ;;  %v223_v18 = vsel %vm5244_vm9, 0, %v222_v7  ;;  %468 = vst.msk [vmem:[#allocation2 + $0xa8] sm:$0xf] %vm179_vm0, %v4923_v8  ;;  %v268_v61 = vsel %vm5233_vm3, 0, %v267_v28  ;;  %v4927_v44 = vpack.c.bf16 %v312_v35, %v312_v35 }
  0x46   : > { %224 = vst [vmem:[#allocation2 + $0xb8] sm:$0x8] %v223_v18  ;;  %v1029_v36 = vrot.slane %v676_v14, 4  ;;  %v1030_v37 = vrot.slane %v679_v21, 5  ;;  %469 = vst.msk [vmem:[#allocation2 + $0xac] sm:$0xf] %vm179_vm0, %v4924_v31  ;;  %v1022_v14 = vor.u32 %v1021_v60, %v5516_v52 }
  0x47   : > { %470 = vst.msk [vmem:[#allocation2 + $0xbc] sm:$0xf] %vm179_vm0, %v4925_v32  ;;  %269 = vst [vmem:[#allocation2 + $0xb0] sm:$0x1] %v268_v61  ;;  %v271_v33 = vsel %vm5233_vm3, 0, %v270_v13  ;;  %v177_v38 = vsel %vm5244_vm9, 0, %v176_v9 }
  0x48   : > { %v1025_v21 = vshll.u32 %v505_v29, 16  ;;  %v1033_v39 = vrot.slane %v688_v16, 5  ;;  %v1035_v40 = vrot.slane %v685_v27, 4  ;;  %v5550_v42 = vld [vmem:[#allocation2 + $0x80] sm:$0xf]  ;;  %v1018_v22 = vrot.slane %v1017_v34, 4 }
  0x49   : > { %1303 = vrot.lane.b32.xlu1 %v5489_v48, %s5192_s23  ;;  %1413 = vrot.lane.b32.xlu0 %v5322_v19, %s5188_s19  ;;  %v4926_v19 = vpack.c.bf16 %v311_v11, %v311_v11  ;;  %272 = vst [vmem:[#allocation2 + $0xc4] sm:$0x1] %v271_v33  ;;  %178 = vst [vmem:[#allocation2 + $0x4] sm:$0x8] %v177_v38  ;;  %v509_v43 = vld [vmem:[#allocation2 + $0x74] sm:$0x1]  ;;  %v1031_v24 = vor.u32 %v1030_v37, %v1029_v36 }
  0x4a   : > { %v5552_v45 = vld [vmem:[#allocation2 + $0x84] sm:$0xf]  ;;  %v698_v46 = vshrl.u32 %v5550_v42, 16  ;;  %472 = vst.msk [vmem:[#allocation2 + $0xd0] sm:$0xf] %vm179_vm0, %v4927_v44  ;;  %v1023_v27 = vrot.slane %v1022_v14, 4  ;;  %v1036_v47 = vor.u32 %v1035_v40, %v1033_v39  ;;  %v1020_v57 = vsel %vm5295_vm11, %v1018_v22, %v5516_v52 }
  0x4b   : > { %471 = vst.msk [vmem:[#allocation2 + $0xc0] sm:$0xf] %vm179_vm0, %v4926_v19  ;;  %v1027_v16 = vrot.slane %v1025_v21, 5  ;;  %v1039_v49 = vshll.u32 %v509_v43, 16  ;;  %v510_v50 = vld [vmem:[#allocation2 + $0x7c] sm:$0x8] }
  0x4c   : > { %v5567_v55 = vld [vmem:[#allocation2 + $0x98] sm:$0xf]  ;;  %v1032_v58 = vrot.slane %v1031_v24, 4  ;;  %v700_v23 = vrot.slane %v698_v46, 7  ;;  %v701_v25 = vshll.u32 %v5550_v42, 16  ;;  %v1037_v3 = vrot.slane %v1036_v47, 4 }
  0x4d   : > { %1415 = vrot.lane.b32.xlu1 %v5338_v26, %s5188_s19  ;;  %1450 = vrot.lane.b32.xlu0 %v5338_v26, %s5189_s20  ;;  %v5556_v26 = vcombine.low %v5423_v59, %v5429_v62  ;;  %v707_v59 = vshrl.u32 %v5552_v45, 16  ;;  %v5565_v62 = vld [vmem:[#allocation2 + $0x94] sm:$0xf]  ;;  %v1028_v0 = vsel %vm5295_vm11, %v1023_v27, %v1027_v16  ;;  %v1041_v5 = vrot.slane %v1039_v49, 5  ;;  %v514_v20 = vld [vmem:[#allocation2 + $0x90] sm:$0x8] }
  0x4e   : > { %v693_v7 = vshrl.u32 %v510_v50, 16  ;;  %v710_v11 = vshll.u32 %v5552_v45, 16  ;;  %v720_v15 = vshrl.u32 %v5565_v62, 16  ;;  %v729_v28 = vshrl.u32 %v5567_v55, 16  ;;  %v225_v24 = vld [vmem:[#allocation2 + $0xcc] sm:$0x8] }
  0x4f   : > { %v709_v10 = vrot.slane %v707_v59, 7  ;;  %v5582_v52 = vcombine.low %v1020_v57, %v1028_v0  ;;  %v1034_v60 = vsel %vm5295_vm11, %v1032_v58, %v1033_v39  ;;  %v705_v8 = vrot.slane %v700_v23, 4  ;;  %v513_v16 = vld [vmem:[#allocation2 + $0x88] sm:$0x1]  ;;  %v313_v50 = vld [vmem:[%s5242_s18 + $0x98] sm:$0xff] }
  0x50   : > { %v1042_v13 = vsel %vm5295_vm11, %v1037_v3, %v1041_v5  ;;  %v4698_v9 = vrot.slane %v693_v7, 11  ;;  %v715_v29 = vshrl.u32 %v514_v20, 16  ;;  %v723_v31 = vshll.u32 %v5565_v62, 16  ;;  %v486_v21 = vld [vmem:[#allocation2 + $0x4] sm:$0x8]  ;;  %v315_v0 = vld [vmem:[%s5242_s18 + $0xa8] sm:$0xff] }
  0x51   : > { %1452 = vrot.lane.b32.xlu1 %v5524_v4, %s5189_s20  ;;  %1487 = vrot.lane.b32.xlu0 %v5524_v4, %s5190_s21  ;;  %v712_v18 = vor.u32 %v710_v11, %v709_v10  ;;  %v722_v32 = vrot.slane %v720_v15, 7  ;;  %v731_v19 = vrot.slane %v729_v28, 7  ;;  %v732_v34 = vshll.u32 %v5567_v55, 16  ;;  %v228_v58 = vld [vmem:[#allocation2 + $0xe0] sm:$0x8] }
  0x52   : > { %v4699_v35 = vrot.slane %v715_v29, 11  ;;  %v1043_v43 = vrot.slane %v698_v46, 4  ;;  %v1044_v44 = vrot.slane %v701_v25, 5  ;;  %v561_v22 = vshrl.u32 %v486_v21, 16  ;;  %v317_v29 = vld [vmem:[%s5242_s18 + $0xb8] sm:$0xff] }
  0x53   : > { %v713_v36 = vsel %vm5287_vm10, %v705_v8, %v712_v18  ;;  %v725_v37 = vor.u32 %v723_v31, %v722_v32  ;;  %v727_v33 = vrot.slane %v722_v32, 4  ;;  %v734_v38 = vor.u32 %v732_v34, %v731_v19  ;;  %v231_v8 = vld [vmem:[#allocation2 + $0xf4] sm:$0x8]  ;;  %v234_v18 = vld [vmem:[#allocation2 + $0x108] sm:$0x8]  ;;  %v318_v19 = vld [vmem:[%s5242_s18 + $0xc0] sm:$0xff] }
  0x54   : > { %v5622_v47 = vrot.slane %v710_v11, 5  ;;  %v1049_v49 = vrot.slane %v707_v59, 4  ;;  %v4692_v57 = vrot.slane %v561_v22, 11  ;;  %v1045_v46 = vor.u32 %v1044_v44, %v1043_v43  ;;  %v5115_v59 = vld [vmem:[%s9012_s1 + $0x10] ss:$0 sps:$4 sm:$0x33]  }
  0x55   : > { %1489 = vrot.lane.b32.xlu1 %v5556_v26, %s5190_s21  ;;  %1567 = vrot.lane.b32.xlu0 %v5421_v53, %s5191_s22  ;;  %v703_v53 = vor.u32 %v701_v25, %v700_v23  ;;  %v726_v39 = vsel %vm5287_vm10, %v4699_v35, %v725_v37  ;;  %v735_v40 = vsel %vm5287_vm10, %v727_v33, %v734_v38  ;;  %v226_v23 = vsel %vm5244_vm9, 0, %v225_v24  ;;  %v314_v25 = vld [vmem:[%s5242_s18 + $0xa0] sm:$0xff]  ;;  %v273_v11 = vld [vmem:[#allocation2 + $0xd8] sm:$0x1]  ;;  %v5658_v32 = vld [vmem:[#allocation2 + $0x9c] sm:$0x1] }
  0x56   : > { %v5620_v27 = vcombine.low %v726_v39, %v735_v40  ;;  %v1053_v3 = vshll.u32 %v513_v16, 16  ;;  %v5629_v5 = vrot.slane %v720_v15, 4  ;;  %v572_v7 = vsel %vm5287_vm10, %v4692_v57, %v5280_v51  ;;  %227 = vst [vmem:[#allocation2 + $0xcc] sm:$0x8] %v226_v23  ;;  %v320_v38 = vld [vmem:[%s5242_s18 + $0xd0] sm:$0xff]  ;;  %v321_v44 = vld [vmem:[%s5242_s18 + $0xd8] sm:$0xff] }
  0x57   : > { %v704_v61 = vsel %vm5287_vm10, %v4698_v9, %v703_v53  ;;  %v4928_v10 = vpack.c.bf16 %v313_v50, %v313_v50  ;;  %v1050_v20 = vor.u32 %v1049_v49, %v5622_v47  ;;  %v5642_v15 = vrot.slane %v723_v31, 5  ;;  %v276_v53 = vld [vmem:[#allocation2 + $0xec] sm:$0x1]  ;;  %v237_v43 = vld [vmem:[#allocation2 + $0x11c] sm:$0x8] }
  0x58   : > { %v5610_v14 = vcombine.low %v704_v61, %v713_v36  ;;  %v5645_v51 = vcombine.low %v572_v7, %v5309_v12  ;;  %v4930_v9 = vpack.c.bf16 %v315_v0, %v315_v0  ;;  %v5654_v31 = vcombine.low %v5550_v42, %v5552_v45  ;;  %v279_v61 = vld [vmem:[#allocation2 + $0x100] sm:$0x1]  ;;  %v319_v42 = vld [vmem:[%s5242_s18 + $0xc8] sm:$0xff]  ;;  %v282_v45 = vld [vmem:[#allocation2 + $0x114] sm:$0x1] }
  0x59   : > { %1569 = vrot.lane.b32.xlu1 %v5453_v17, %s5191_s22  ;;  %1602 = vrot.lane.b32.xlu0 %v5453_v17, %s5194_s29  ;;  %v5600_v17 = vcombine.low %v1034_v60, %v1042_v13  ;;  %v229_v60 = vsel %vm5244_vm9, 0, %v228_v58  ;;  %473 = vst.msk [vmem:[#allocation2 + $0xd4] sm:$0xf] %vm179_vm0, %v4928_v10  ;;  %v4929_v13 = vpack.c.bf16 %v314_v25, %v314_v25  ;;  %v5656_v12 = vrot.slane %v1045_v46, 4  ;;  %v5697_v24 = vld [vmem:[#allocation2 + $0xac] sm:$0xf] }
  0x5a   : > { %230 = vst [vmem:[#allocation2 + $0xe0] sm:$0x8] %v229_v60  ;;  %v5663_v35 = vcombine.low %v5565_v62, %v5567_v55  ;;  %v5665_v36 = vrot.slane %v1053_v3, 5  ;;  %v5667_v37 = vrot.slane %v732_v34, 5  ;;  %v5671_v33 = vrot.slane %v729_v28, 4  ;;  %v322_v0 = vld [vmem:[%s5242_s18 + $0xe0] sm:$0xff] }
  0x5b   : > { %474 = vst.msk [vmem:[#allocation2 + $0xe4] sm:$0xf] %vm179_vm0, %v4929_v13  ;;  %475 = vst.msk [vmem:[#allocation2 + $0xe8] sm:$0xf] %vm179_vm0, %v4930_v9  ;;  %v5680_v62 = vrot.slane %v1050_v20, 4  ;;  %v1059_v55 = vor.u32 %v5642_v15, %v5629_v5  ;;  %vm1998_vm12 = vcmask 1041408   ;;  %v4932_v16 = vpack.c.bf16 %v317_v29, %v317_v29 }
  0x5c   : > { %v5684_v28 = vld [vmem:[#allocation2 + $0xa8] sm:$0xf]  ;;  %v274_v34 = vsel %vm5233_vm3, 0, %v273_v11  ;;  %5087 = vmatprep.subr.msk.bf16.mxu0 %vm1998_vm12, %v5115_v59  ;;  %v2000_v21 = vsel %vm1998_vm12, %v5115_v59, 0  ;;  %v232_v39 = vsel %vm5244_vm9, 0, %v231_v8  ;;  %v1067_v22 = vshll.u32 %v5658_v32, 16 }
  0x5d   : > { %1604 = vrot.lane.b32.xlu1 %v5582_v52, %s5194_s29  ;;  %1637 = vrot.lane.b32.xlu0 %v5582_v52, %s5195_s30  ;;  %275 = vst [vmem:[#allocation2 + $0xd8] sm:$0x1] %v274_v34  ;;  %233 = vst [vmem:[#allocation2 + $0xf4] sm:$0x8] %v232_v39  ;;  %v235_v49 = vsel %vm5244_vm9, 0, %v234_v18  ;;  %v4933_v50 = vpack.c.bf16 %v318_v19, %v318_v19  ;;  %v1064_v57 = vor.u32 %v5671_v33, %v5667_v37  ;;  %v323_v3 = vld [vmem:[%s5242_s18 + $0xe8] sm:$0xff] }
  0x5e   : > { %5016 = vmatpush3.bf16.msra.mxu0 %v2000_v21  ;;  %236 = vst [vmem:[#allocation2 + $0x108] sm:$0x8] %v235_v49  ;;  %v4934_v58 = vpack.c.bf16 %v319_v42, %v319_v42  ;;  %v280_v46 = vsel %vm5233_vm3, 0, %v279_v61  ;;  %v283_v23 = vsel %vm5233_vm3, 0, %v282_v45  ;;  %v240_v25 = vld [vmem:[#allocation2 + $0x130] sm:$0x8]  ;;  %v4935_v59 = vpack.c.bf16 %v320_v38, %v320_v38 }
  0x5f   : > { %v518_v5 = vld [vmem:[#allocation2 + $0xa4] sm:$0x8]  ;;  %v742_v7 = vshrl.u32 %v5684_v28, 16  ;;  %477 = vst.msk [vmem:[#allocation2 + $0xfc] sm:$0xf] %vm179_vm0, %v4932_v16  ;;  %v238_v10 = vsel %vm5244_vm9, 0, %v237_v43  ;;  %v4936_v11 = vpack.c.bf16 %v321_v44, %v321_v44  ;;  %v4937_v8 = vpack.c.bf16 %v322_v0, %v322_v0 }
  0x60   : > { %478 = vst.msk [vmem:[#allocation2 + $0x10c] sm:$0xf] %vm179_vm0, %v4933_v50  ;;  %281 = vst [vmem:[#allocation2 + $0x100] sm:$0x1] %v280_v46  ;;  %v751_v20 = vshrl.u32 %v5697_v24, 16  ;;  %v4938_v13 = vpack.c.bf16 %v323_v3, %v323_v3  ;;  %v1048_v9 = vsel %vm5295_vm11, %v5656_v12, %v5622_v47  ;;  %v1060_v29 = vrot.slane %v1059_v55, 4 }
  0x61   : > { %1270 = vrot.lane.b32.xlu1 %v5489_v48, %s5193_s24  ;;  %1639 = vrot.lane.b32.xlu0 %v5600_v17, %s5195_s30  ;;  %284 = vst [vmem:[#allocation2 + $0x114] sm:$0x1] %v283_v23  ;;  %479 = vst.msk [vmem:[#allocation2 + $0x110] sm:$0xf] %vm179_vm0, %v4934_v58  ;;  %v5721_v15 = vld [vmem:[#allocation2 + $0xbc] sm:$0xf] }
  0x62   : > { %239 = vst [vmem:[#allocation2 + $0x11c] sm:$0x8] %v238_v10  ;;  %v5723_v60 = vld [vmem:[#allocation2 + $0xc0] sm:$0xf]  ;;  %480 = vst.msk [vmem:[#allocation2 + $0x120] sm:$0xf] %vm179_vm0, %v4935_v59 }
  0x63   : > { %481 = vst.msk [vmem:[#allocation2 + $0x124] sm:$0xf] %vm179_vm0, %v4936_v11  ;;  %v737_v18 = vshrl.u32 %v518_v5, 16  ;;  %v1065_v32 = vrot.slane %v1064_v57, 4  ;;  %v1069_v19 = vrot.slane %v1067_v22, 5  ;;  %v744_v61 = vrot.slane %v742_v7, 7 }
  0x64   : > { %v745_v47 = vshll.u32 %v5684_v28, 16  ;;  %v522_v12 = vld [vmem:[#allocation2 + $0xb8] sm:$0x8]  ;;  %482 = vst.msk [vmem:[#allocation2 + $0x134] sm:$0xf] %vm179_vm0, %v4937_v8  ;;  %v754_v33 = vshll.u32 %v5697_v24, 16 }
  0x65   : > { %1272 = vrot.lane.b32.xlu1 %v5610_v14, %s5193_s24  ;;  %1305 = vrot.lane.b32.xlu0 %v5610_v14, %s5192_s23  ;;  %483 = vst.msk [vmem:[#allocation2 + $0x138] sm:$0xf] %vm179_vm0, %v4938_v13  ;;  %v764_v42 = vshrl.u32 %v5721_v15, 16  ;;  %v773_v45 = vshrl.u32 %v5723_v60, 16  ;;  %v4700_v55 = vrot.slane %v737_v18, 11  ;;  %v759_v34 = vshrl.u32 %v522_v12, 16 }
  0x66   : > { %v1070_v38 = vsel %vm5295_vm11, %v1065_v32, %v1069_v19  ;;  %v747_v21 = vor.u32 %v745_v47, %v744_v61  ;;  %v767_v39 = vshll.u32 %v5721_v15, 16  ;;  %v1071_v3 = vrot.slane %v742_v7, 4  ;;  %v521_v11 = vld [vmem:[#allocation2 + $0xb0] sm:$0x1] }
  0x67   : > { %v766_v43 = vrot.slane %v764_v42, 7  ;;  %v775_v44 = vrot.slane %v773_v45, 7  ;;  %v4701_v16 = vrot.slane %v759_v34, 11  ;;  %v1072_v5 = vrot.slane %v745_v47, 5 }
  0x68   : > { %v1075_v10 = vrot.slane %v754_v33, 5  ;;  %v1077_v59 = vrot.slane %v751_v20, 4  ;;  %v1086_v8 = vrot.slane %v767_v39, 5  ;;  %v1091_v32 = vrot.slane %v773_v45, 4 }
  0x69   : > { %1307 = vrot.lane.b32.xlu1 %v5620_v27, %s5192_s23  ;;  %1417 = vrot.lane.b32.xlu0 %v5524_v4, %s5188_s19  ;;  %v316_v4 = vld [vmem:[%s5242_s18 + $0xb0] sm:$0xff]  ;;  %v769_v50 = vor.u32 %v767_v39, %v766_v43  ;;  %v771_v57 = vrot.slane %v766_v43, 4  ;;  %v1073_v13 = vor.u32 %v1072_v5, %v1071_v3  ;;  %v5802_v7 = vcombine.low %v5684_v28, %v5697_v24 }
  0x6a   : > { %v4931_v40 = vpack.c.bf16 %v316_v4, %v316_v4  ;;  %v1056_v4 = vsel %vm5295_vm11, %v5680_v62, %v5665_v36  ;;  %v753_v36 = vrot.slane %v751_v20, 7  ;;  %v1062_v62 = vsel %vm5295_vm11, %v1060_v29, %v5667_v37  ;;  %v525_v29 = vld [vmem:[#allocation2 + $0xc4] sm:$0x1] }
  0x6b   : > { %v776_v37 = vshll.u32 %v5723_v60, 16  ;;  %v5766_v22 = vcombine.low %v1062_v62, %v1070_v38  ;;  %v770_v23 = vsel %vm5287_vm10, %v4701_v16, %v769_v50  ;;  %v1095_v19 = vshll.u32 %v525_v29, 16  ;;  %v288_v62 = vld [vmem:[#allocation2 + $0x13c] sm:$0x1]  ;;  %v526_v38 = vld [vmem:[#allocation2 + $0xcc] sm:$0x8] }
  0x6c   : > { %476 = vst.msk [vmem:[#allocation2 + $0xf8] sm:$0xf] %vm179_vm0, %v4931_v40  ;;  %v756_v40 = vor.u32 %v754_v33, %v753_v36  ;;  %v1074_v47 = vrot.slane %v1073_v13, 4  ;;  %v5806_v33 = vld [vmem:[#allocation2 + $0xd4] sm:$0xf]  ;;  %v5818_v28 = vcombine.low %v5721_v15, %v5723_v60  ;;  %vm1665_vm13 = vcmask 31744  }
  0x6d   : > { %1419 = vrot.lane.b32.xlu1 %v5556_v26, %s5188_s19  ;;  %1454 = vrot.lane.b32.xlu0 %v5556_v26, %s5189_s20  ;;  %v277_v26 = vsel %vm5233_vm3, 0, %v276_v53  ;;  %v241_v53 = vsel %vm5244_vm9, 0, %v240_v25  ;;  %v778_v58 = vor.u32 %v776_v37, %v775_v44  ;;  %v5794_v18 = vrot.slane %v776_v37, 5  ;;  %v5827_v15 = vld [vmem:[#allocation2 + $0xe4] sm:$0xf]  ;;  %v324_v16 = vld [vmem:[%s5242_s18 + $0xf0] sm:$0xff] }
  0x6e   : > { %278 = vst [vmem:[#allocation2 + $0xec] sm:$0x1] %v277_v26  ;;  %242 = vst [vmem:[#allocation2 + $0x130] sm:$0x8] %v241_v53  ;;  %v749_v26 = vrot.slane %v744_v61, 4  ;;  %v1085_v53 = vrot.slane %v764_v42, 4 }
  0x6f   : > { %v779_v25 = vsel %vm5287_vm10, %v771_v57, %v778_v58  ;;  %v285_v61 = vld [vmem:[#allocation2 + $0x128] sm:$0x1]  ;;  %v1092_v42 = vor.u32 %v1091_v32, %v5794_v18  ;;  %v1097_v34 = vrot.slane %v1095_v19, 5  ;;  %v798_v50 = vshll.u32 %v5806_v33, 16  ;;  %v325_v57 = vld [vmem:[%s5242_s18 + $0xf8] sm:$0xff] }
  0x70   : > { %v757_v49 = vsel %vm5287_vm10, %v749_v26, %v756_v40  ;;  %v5786_v0 = vcombine.low %v770_v23, %v779_v25  ;;  %v1087_v20 = vor.u32 %v1086_v8, %v1085_v53  ;;  %v286_v24 = vsel %vm5233_vm3, 0, %v285_v61  ;;  %v5829_v60 = vld [vmem:[#allocation2 + $0xe8] sm:$0xf]  ;;  %v243_v40 = vld [vmem:[#allocation2 + $0x144] sm:$0x8] }
  0x71   : > { %1456 = vrot.lane.b32.xlu1 %v5654_v31, %s5189_s20  ;;  %1491 = vrot.lane.b32.xlu0 %v5654_v31, %s5190_s21  ;;  %287 = vst [vmem:[#allocation2 + $0x128] sm:$0x1] %v286_v24  ;;  %v1076_v26 = vsel %vm5295_vm11, %v1074_v47, %v1075_v10  ;;  %v1093_v43 = vrot.slane %v1092_v42, 4  ;;  %v189_v58 = vld [vmem:[#allocation2 + $0x158] sm:$0x8]  ;;  %v808_v3 = vshrl.u32 %v5827_v15, 16  ;;  %v4939_v8 = vpack.c.bf16 %v324_v16, %v324_v16 }
  0x72   : > { %v530_v25 = vld [vmem:[#allocation2 + $0xe0] sm:$0x8]  ;;  %v817_v5 = vshrl.u32 %v5829_v60, 16  ;;  %v190_v29 = vsel %vm5244_vm9, 0, %v189_v58  ;;  %v291_v32 = vld [vmem:[#allocation2 + $0x150] sm:$0x1] }
  0x73   : > { %v1098_v13 = vsel %vm5295_vm11, %v1093_v43, %v1097_v34  ;;  %v803_v19 = vshrl.u32 %v530_v25, 16  ;;  %v811_v61 = vshll.u32 %v5827_v15, 16  ;;  %484 = vst.msk [vmem:[#allocation2 + $0x148] sm:$0xf] %vm179_vm0, %v4939_v8  ;;  %191 = vst [vmem:[#allocation2 + $0x158] sm:$0x8] %v190_v29 }
  0x74   : > { %v194_v47 = vld [vmem:[#allocation2 + $0x164] sm:$0x1]  ;;  %vm1714_vm14 = vcmask 64512   ;;  %vm1747_vm15 = vcmask 97280   ;;  %vm1780_vm1 = vcmask 130048   ;;  %vm1813_vm2 = vcmask 162816  }
  0x75   : > { %1493 = vrot.lane.b32.xlu1 %v5663_v35, %s5190_s21  ;;  %1571 = vrot.lane.b32.xlu0 %v5582_v52, %s5191_s22  ;;  %v5749_v52 = vcombine.low %v1048_v9, %v1056_v4  ;;  %v1078_v9 = vor.u32 %v1077_v59, %v1075_v10  ;;  %v1081_v4 = vshll.u32 %v521_v11, 16  ;;  %v244_v10 = vsel %vm5244_vm9, 0, %v243_v40 }
  0x76   : > { %245 = vst [vmem:[#allocation2 + $0x144] sm:$0x8] %v244_v10  ;;  %vm1879_vm4 = vcmask 228352   ;;  %vm1912_vm5 = vcmask 261120   ;;  %vm1965_vm6 = vcmask 293888  }
  0x77   : > { %v1079_v12 = vrot.slane %v1078_v9, 4  ;;  %v1083_v36 = vrot.slane %v1081_v4, 5  ;;  %v4940_v4 = vpack.c.bf16 %v325_v57, %v325_v57 }
  0x79   : > { %1573 = vrot.lane.b32.xlu1 %v5600_v17, %s5191_s22  ;;  %1606 = vrot.lane.b32.xlu0 %v5600_v17, %s5194_s29  ;;  %v748_v17 = vsel %vm5287_vm10, %v4700_v55, %v747_v21  ;;  %v1088_v55 = vrot.slane %v1087_v20, 4  ;;  %v795_v21 = vshrl.u32 %v5806_v33, 16  ;;  %v1084_v39 = vsel %vm5295_vm11, %v1079_v12, %v1083_v36  ;;  %485 = vst.msk [vmem:[#allocation2 + $0x14c] sm:$0xf] %vm179_vm0, %v4940_v4 }
  0x7a   : > { %v5776_v46 = vcombine.low %v748_v17, %v757_v49  ;;  %v289_v17 = vsel %vm5233_vm3, 0, %v288_v62  ;;  %v781_v49 = vshrl.u32 %v526_v38, 16  ;;  %v5853_v11 = vcombine.low %v1076_v26, %v1084_v39 }
  0x7b   : > { %290 = vst [vmem:[#allocation2 + $0x13c] sm:$0x1] %v289_v17  ;;  %v797_v23 = vrot.slane %v795_v21, 7  ;;  %v1090_v53 = vsel %vm5295_vm11, %v1088_v55, %v5794_v18  ;;  %v810_v12 = vrot.slane %v808_v3, 7  ;;  %v819_v36 = vrot.slane %v817_v5, 7 }
  0x7c   : > { %v4702_v18 = vrot.slane %v781_v49, 11  ;;  %v292_v62 = vsel %vm5233_vm3, 0, %v291_v32  ;;  %v195_v55 = vsel %vm5233_vm3, 0, %v194_v47  ;;  %v5888_v34 = vcombine.low %v1090_v53, %v1098_v13 }
  0x7d   : > { %1608 = vrot.lane.b32.xlu1 %v5749_v52, %s5194_s29  ;;  %1641 = vrot.lane.b32.xlu0 %v5749_v52, %s5195_s30  ;;  %v800_v6 = vor.u32 %v798_v50, %v797_v23  ;;  %293 = vst [vmem:[#allocation2 + $0x150] sm:$0x1] %v292_v62  ;;  %v4703_v26 = vrot.slane %v803_v19, 11  ;;  %196 = vst [vmem:[#allocation2 + $0x164] sm:$0x1] %v195_v55  ;;  %v813_v2 = vor.u32 %v811_v61, %v810_v12  ;;  %vm1846_vm3 = vcmask 195584  }
  0x7e   : > { %v815_v40 = vrot.slane %v810_v12, 4 }
  0x7f   : > { %v814_v49 = vsel %vm5287_vm10, %v4703_v26, %v813_v2  ;;  %v5970_v26 = vld [vmem:[#allocation2 + $0xfc] sm:$0xf] }
  0x81   : > { %1274 = vrot.lane.b32.xlu1 %v5620_v27, %s5193_s24  ;;  %1643 = vrot.lane.b32.xlu0 %v5766_v22, %s5195_s30 }
  0x85   : > { %1276 = vrot.lane.b32.xlu1 %v5776_v46, %s5193_s24  ;;  %1309 = vrot.lane.b32.xlu0 %v5776_v46, %s5192_s23 }
  0x89   : > { %1311 = vrot.lane.b32.xlu1 %v5786_v0, %s5192_s23  ;;  %1421 = vrot.lane.b32.xlu0 %v5654_v31, %s5188_s19  ;;  %v5804_v31 = vld [vmem:[#allocation2 + $0xd0] sm:$0xf] }
  0x8a   : > { %v786_v45 = vshrl.u32 %v5804_v31, 16  ;;  %v789_v37 = vshll.u32 %v5804_v31, 16  ;;  %v5956_v12 = vcombine.low %v5804_v31, %v5806_v33 }
  0x8c   : > { %v788_v44 = vrot.slane %v786_v45, 7  ;;  %v1100_v4 = vrot.slane %v789_v37, 5 }
  0x8d   : > { %1423 = vrot.lane.b32.xlu1 %v5663_v35, %s5188_s19  ;;  %1458 = vrot.lane.b32.xlu0 %v5663_v35, %s5189_s20 }
  0x8e   : > { %v5814_v35 = vpop.permute.xlu0 %1409  ;;  %v791_v9 = vor.u32 %v789_v37, %v788_v44  ;;  %v793_v20 = vrot.slane %v788_v44, 4 }
  0x90   : > { %v792_v38 = vsel %vm5287_vm10, %v4702_v18, %v791_v9  ;;  %v801_v39 = vsel %vm5287_vm10, %v793_v20, %v800_v6  ;;  %v529_v18 = vld [vmem:[#allocation2 + $0xd8] sm:$0x1]  ;;  %v5931_v20 = vrot.slane %v798_v50, 5  ;;  %v1113_v6 = vrot.slane %v808_v3, 4 }
  0x91   : > { %1460 = vrot.lane.b32.xlu1 %v5802_v7, %s5189_s20  ;;  %1495 = vrot.lane.b32.xlu0 %v5802_v7, %s5190_s21  ;;  %v5904_v16 = vcombine.low %v792_v38, %v801_v39  ;;  %v1119_v3 = vrot.slane %v817_v5, 4 }
  0x95   : > { %1497 = vrot.lane.b32.xlu1 %v5818_v28, %s5190_s21  ;;  %1575 = vrot.lane.b32.xlu0 %v5749_v52, %s5191_s22 }
  0x97   : > { %v5849_v59 = vpop.permute.xlu0 %1446  ;;  %v5851_v52 = vpop.permute.xlu1 %1411 }
  0x99   : > { %1577 = vrot.lane.b32.xlu1 %v5766_v22, %s5191_s22  ;;  %1610 = vrot.lane.b32.xlu0 %v5766_v22, %s5194_s29  ;;  %v820_v22 = vshll.u32 %v5829_v60, 16 }
  0x9b   : > { %v1484_v42 = vpop.permute.xlu0 %1483  ;;  %v5878_v24 = vpop.permute.xlu1 %1448  ;;  %v822_v43 = vor.u32 %v820_v22, %v819_v36  ;;  %v5960_v36 = vrot.slane %v820_v22, 5 }
  0x9d   : > { %1612 = vrot.lane.b32.xlu1 %v5853_v11, %s5194_s29  ;;  %1645 = vrot.lane.b32.xlu0 %v5853_v11, %s5195_s30  ;;  %v823_v57 = vsel %vm5287_vm10, %v815_v40, %v822_v43  ;;  %v534_v40 = vld [vmem:[#allocation2 + $0xf4] sm:$0x8]  ;;  %v1120_v43 = vor.u32 %v1119_v3, %v5960_v36 }
  0x9e   : > { %v5917_v53 = vcombine.low %v814_v49, %v823_v57  ;;  %v839_v57 = vshrl.u32 %v5970_v26, 16 }
  0x9f   : > { %v1564_v44 = vpop.permute.xlu0 %1563  ;;  %v5898_v17 = vpop.permute.xlu1 %1485 }
  0xa1   : > { %1278 = vrot.lane.b32.xlu1 %v5786_v0, %s5193_s24  ;;  %1647 = vrot.lane.b32.xlu0 %v5888_v34, %s5195_s30 }
  0xa3   : > { %v1298_v58 = vpop.permute.xlu1 %1297  ;;  %v1263_v23 = vpop.permute.xlu0 %1262 }
  0xa4   : > { %v1668_v25 = vsel %vm1665_vm13, %v5645_v51, %v1263_v23  ;;  %v1099_v51 = vrot.slane %v786_v45, 4 }
  0xa5   : > { %v1716_v10 = vsel %vm1714_vm14, %v1668_v25, %v1298_v58  ;;  %1280 = vrot.lane.b32.xlu1 %v5904_v16, %s5193_s24  ;;  %1313 = vrot.lane.b32.xlu0 %v5904_v16, %s5192_s23 }
  0xa6   : > { %v1749_v8 = vsel %vm1747_vm15, %v1716_v10, %v5814_v35  ;;  %v1105_v35 = vrot.slane %v795_v21, 4  ;;  %v1101_v50 = vor.u32 %v1100_v4, %v1099_v51  ;;  %v5991_v10 = vld [vmem:[#allocation2 + $0x10c] sm:$0xf] }
  0xa7   : > { %v1300_v13 = vpop.permute.xlu1 %1299  ;;  %v1265_v9 = vpop.permute.xlu0 %1264  ;;  %v1782_v32 = vsel %vm1780_vm1, %v1749_v8, %v5849_v59  ;;  %v1109_v59 = vshll.u32 %v529_v18, 16  ;;  %v5993_v8 = vld [vmem:[#allocation2 + $0x110] sm:$0xf] }
  0xa8   : > { %v1671_v29 = vsel %vm1665_vm13, %v5376_v1, %v1265_v9  ;;  %v1815_v45 = vsel %vm1813_vm2, %v1782_v32, %v1484_v42  ;;  %v1106_v47 = vor.u32 %v1105_v35, %v5931_v20  ;;  %v5965_v42 = vld [vmem:[#allocation2 + $0xf8] sm:$0xf]  ;;  %v1102_v55 = vrot.slane %v1101_v50, 4 }
  0xa9   : > { %v1718_v19 = vsel %vm1714_vm14, %v1671_v29, %v1300_v13  ;;  %1315 = vrot.lane.b32.xlu1 %v5917_v53, %s5192_s23  ;;  %1425 = vrot.lane.b32.xlu0 %v5802_v7, %s5188_s19  ;;  %v1114_v7 = vrot.slane %v811_v61, 5  ;;  %v1848_v61 = vsel %vm1846_vm3, %v1815_v45, %v1564_v44  ;;  %v1111_v38 = vrot.slane %v1109_v59, 5 }
  0xaa   : > { %v1751_v21 = vsel %vm1747_vm15, %v1718_v19, %v5851_v52  ;;  %v533_v52 = vld [vmem:[#allocation2 + $0xec] sm:$0x1]  ;;  %v1107_v39 = vrot.slane %v1106_v47, 4  ;;  %v830_v44 = vshrl.u32 %v5965_v42, 16  ;;  %v1121_v29 = vrot.slane %v1120_v43, 4 }
  0xab   : > { %v5940_v1 = vpop.permute.xlu1 %1266  ;;  %v1599_v37 = vpop.permute.xlu0 %1598  ;;  %v1784_v31 = vsel %vm1780_vm1, %v1751_v21, %v5878_v24  ;;  %v1115_v5 = vor.u32 %v1114_v7, %v1113_v6  ;;  %v1123_v2 = vshll.u32 %v533_v52, 16  ;;  %v5979_v24 = vcombine.low %v5827_v15, %v5829_v60 }
  0xac   : > { %v1817_v49 = vsel %vm1813_vm2, %v1784_v31, %v5898_v17  ;;  %v1104_v15 = vsel %vm5295_vm11, %v1102_v55, %v5931_v20  ;;  %v825_v60 = vshrl.u32 %v534_v40, 16  ;;  %v1112_v17 = vsel %vm5295_vm11, %v1107_v39, %v1111_v38  ;;  %v538_v20 = vld [vmem:[#allocation2 + $0x108] sm:$0x8] }
  0xad   : > { %1427 = vrot.lane.b32.xlu1 %v5818_v28, %s5188_s19  ;;  %1462 = vrot.lane.b32.xlu0 %v5818_v28, %s5189_s20  ;;  %v1881_v28 = vsel %vm1879_vm4, %v1848_v61, %v1599_v37  ;;  %v1116_v9 = vrot.slane %v1115_v5, 4  ;;  %v1125_v51 = vrot.slane %v1123_v2, 5  ;;  %v832_v32 = vrot.slane %v830_v44, 7 }
  0xae   : > { %v833_v18 = vshll.u32 %v5965_v42, 16  ;;  %v841_v35 = vrot.slane %v839_v57, 7  ;;  %v842_v19 = vshll.u32 %v5970_v26, 16  ;;  %v852_v45 = vshrl.u32 %v5991_v10, 16 }
  0xaf   : > { %v1566_v62 = vpop.permute.xlu1 %1565  ;;  %v1634_v33 = vpop.permute.xlu0 %1633  ;;  %v861_v37 = vshrl.u32 %v5993_v8, 16  ;;  %v6012_v59 = vcombine.low %v1104_v15, %v1112_v17  ;;  %v1118_v21 = vsel %vm5295_vm11, %v1116_v9, %v5960_v36  ;;  %v4704_v47 = vrot.slane %v825_v60, 11 }
  0xb0   : > { %v1914_v22 = vsel %vm1912_vm5, %v1881_v28, %v1634_v33  ;;  %v1850_v58 = vsel %vm1846_vm3, %v1817_v49, %v1566_v62  ;;  %v847_v6 = vshrl.u32 %v538_v20, 16  ;;  %v1126_v7 = vsel %vm5295_vm11, %v1121_v29, %v1125_v51  ;;  %v537_v29 = vld [vmem:[#allocation2 + $0x100] sm:$0x1] }
  0xb1   : > { %1464 = vrot.lane.b32.xlu1 %v5956_v12, %s5189_s20  ;;  %1499 = vrot.lane.b32.xlu0 %v5956_v12, %s5190_s21  ;;  %v835_v52 = vor.u32 %v833_v18, %v832_v32  ;;  %v837_v3 = vrot.slane %v832_v32, 4  ;;  %v855_v61 = vshll.u32 %v5991_v10, 16  ;;  %v844_v28 = vor.u32 %v842_v19, %v841_v35 }
  0xb2   : > { %5017 = vmatprep.mubr.msk.bf16.mxu0 %vm1965_vm6, %v1914_v22  ;;  %v854_v62 = vrot.slane %v852_v45, 7  ;;  %v863_v36 = vrot.slane %v861_v37, 7  ;;  %v864_v31 = vshll.u32 %v5993_v8, 16  ;;  %v4705_v22 = vrot.slane %v847_v6, 11 }
  0xb3   : > { %v1601_v23 = vpop.permute.xlu1 %1600  ;;  %v1636_v25 = vpop.permute.xlu0 %1635  ;;  %v836_v38 = vsel %vm5287_vm10, %v4704_v47, %v835_v52  ;;  %v845_v39 = vsel %vm5287_vm10, %v837_v3, %v844_v28  ;;  %v1127_v51 = vrot.slane %v830_v44, 4  ;;  %v6055_v32 = vrot.slane %v842_v19, 5 }
  0xb4   : > { %v1883_v13 = vsel %vm1879_vm4, %v1850_v58, %v1601_v23  ;;  %v857_v5 = vor.u32 %v855_v61, %v854_v62  ;;  %v859_v2 = vrot.slane %v854_v62, 4  ;;  %v866_v40 = vor.u32 %v864_v31, %v863_v36 }
  0xb5   : > { %v1916_v4 = vsel %vm1912_vm5, %v1883_v13, %v1636_v25  ;;  %1501 = vrot.lane.b32.xlu1 %v5979_v24, %s5190_s21  ;;  %1579 = vrot.lane.b32.xlu0 %v5853_v11, %s5191_s22  ;;  %v6041_v58 = vcombine.low %v836_v38, %v845_v39  ;;  %v1133_v20 = vrot.slane %v839_v57, 4  ;;  %v1674_v35 = vsel %vm1665_vm13, %v5366_v54, %v5940_v1  ;;  %v6095_v38 = vld [vmem:[#allocation2 + $0x124] sm:$0xf] }
  0xb6   : > { %5018 = vmatmul.mubr.msk.bf16.vlgmr.msra.gmra.mrb[0].mxu0 %vm1965_vm6, %v1916_v4  ;;  %v858_v23 = vsel %vm5287_vm10, %v4705_v22, %v857_v5  ;;  %v867_v25 = vsel %vm5287_vm10, %v859_v2, %v866_v40  ;;  %v1128_v4 = vrot.slane %v833_v18, 5  ;;  %v6070_v47 = vcombine.low %v5965_v42, %v5970_v26  ;;  %v541_v42 = vld [vmem:[#allocation2 + $0x114] sm:$0x1] }
  0xb7   : > { %v1269_v50 = vpop.permute.xlu1 %1268  ;;  %v1302_v11 = vpop.permute.xlu0 %1301  ;;  %v6051_v13 = vcombine.low %v858_v23, %v867_v25  ;;  %v1137_v6 = vshll.u32 %v537_v29, 16  ;;  %v1134_v1 = vor.u32 %v1133_v20, %v6055_v32  ;;  %v1142_v52 = vrot.slane %v855_v61, 5 }
  0xb8   : > { %v1129_v57 = vor.u32 %v1128_v4, %v1127_v51  ;;  %v6081_v26 = vrot.slane %v864_v31, 5  ;;  %v1147_v3 = vrot.slane %v861_v37, 4  ;;  %v1151_v39 = vshll.u32 %v541_v42, 16 }
  0xb9   : > { %1581 = vrot.lane.b32.xlu1 %v5888_v34, %s5191_s22  ;;  %1614 = vrot.lane.b32.xlu0 %v5888_v34, %s5194_s29  ;;  %v6031_v34 = vcombine.low %v1118_v21, %v1126_v7  ;;  %v1720_v21 = vsel %vm1714_vm14, %v1674_v35, %v1302_v11  ;;  %v1141_v7 = vrot.slane %v852_v45, 4  ;;  %v1135_v5 = vrot.slane %v1134_v1, 4 }
  0xba   : > { %v1130_v31 = vrot.slane %v1129_v57, 4  ;;  %v1148_v2 = vor.u32 %v1147_v3, %v6081_v26  ;;  %v1153_v20 = vrot.slane %v1151_v39, 5  ;;  %v886_v57 = vshll.u32 %v6095_v38, 16 }
  0xbb   : > { %v1304_v33 = vpop.permute.xlu1 %1303  ;;  %v1414_v55 = vpop.permute.xlu0 %1413  ;;  %v1143_v22 = vor.u32 %v1142_v52, %v1141_v7 }
  0xbc   : > { %v1753_v44 = vsel %vm1747_vm15, %v1720_v21, %v1414_v55  ;;  %v1139_v55 = vrot.slane %v1137_v6, 5  ;;  %v1132_v4 = vsel %vm5295_vm11, %v1130_v31, %v6055_v32  ;;  %v1149_v21 = vrot.slane %v1148_v2, 4 }
  0xbd   : > { %1616 = vrot.lane.b32.xlu1 %v6012_v59, %s5194_s29  ;;  %1649 = vrot.lane.b32.xlu0 %v6012_v59, %s5195_s30  ;;  %v1144_v29 = vrot.slane %v1143_v22, 4 }
  0xbe   : > { %v1140_v35 = vsel %vm5295_vm11, %v1135_v5, %v1139_v55  ;;  %v1154_v42 = vsel %vm5295_vm11, %v1149_v21, %v1153_v20  ;;  %v6178_v21 = vrot.slane %v886_v57, 5 }
  0xbf   : > { %v1416_v43 = vpop.permute.xlu1 %1415  ;;  %v1451_v49 = vpop.permute.xlu0 %1450  ;;  %v6135_v7 = vcombine.low %v1132_v4, %v1140_v35  ;;  %v1146_v52 = vsel %vm5295_vm11, %v1144_v29, %v6081_v26 }
  0xc0   : > { %v1786_v54 = vsel %vm1780_vm1, %v1753_v44, %v1451_v49  ;;  %v883_v49 = vshrl.u32 %v6095_v38, 16 }
  0xc1   : > { %1282 = vrot.lane.b32.xlu1 %v5917_v53, %s5193_s24  ;;  %1651 = vrot.lane.b32.xlu0 %v6031_v34, %s5195_s30 }
  0xc2   : > { %v885_v32 = vrot.slane %v883_v49, 7 }
  0xc3   : > { %v1453_v15 = vpop.permute.xlu1 %1452  ;;  %v1488_v60 = vpop.permute.xlu0 %1487 }
  0xc4   : > { %v1819_v11 = vsel %vm1813_vm2, %v1786_v54, %v1488_v60 }
  0xc5   : > { %1284 = vrot.lane.b32.xlu1 %v6041_v58, %s5193_s24  ;;  %1317 = vrot.lane.b32.xlu0 %v6041_v58, %s5192_s23 }
  0xc7   : > { %v1490_v17 = vpop.permute.xlu1 %1489  ;;  %v1568_v9 = vpop.permute.xlu0 %1567 }
  0xc8   : > { %v1852_v61 = vsel %vm1846_vm3, %v1819_v11, %v1568_v9  ;;  %v6114_v9 = vld [vmem:[#allocation2 + $0x138] sm:$0xf] }
  0xc9   : > { %1319 = vrot.lane.b32.xlu1 %v6051_v13, %s5192_s23  ;;  %1429 = vrot.lane.b32.xlu0 %v5956_v12, %s5188_s19  ;;  %v1677_v12 = vsel %vm1665_vm13, %v5392_v30, %v1269_v50  ;;  %v6089_v30 = vcombine.low %v5991_v10, %v5993_v8  ;;  %v6091_v50 = vld [vmem:[#allocation2 + $0x120] sm:$0xf]  ;;  %v542_v10 = vld [vmem:[#allocation2 + $0x11c] sm:$0x8] }
  0xca   : > { %v1722_v45 = vsel %vm1714_vm14, %v1677_v12, %v1304_v33  ;;  %v874_v40 = vshrl.u32 %v6091_v50, 16  ;;  %v869_v60 = vshrl.u32 %v542_v10, 16 }
  0xcb   : > { %v1570_v18 = vpop.permute.xlu1 %1569  ;;  %v1603_v19 = vpop.permute.xlu0 %1602  ;;  %v1755_v28 = vsel %vm1747_vm15, %v1722_v45, %v1416_v43 }
  0xcc   : > { %v1788_v37 = vsel %vm1780_vm1, %v1755_v28, %v1453_v15  ;;  %v876_v44 = vrot.slane %v874_v40, 7  ;;  %v4706_v12 = vrot.slane %v869_v60, 11  ;;  %v888_v28 = vor.u32 %v886_v57, %v885_v32  ;;  %v545_v32 = vld [vmem:[#allocation2 + $0x128] sm:$0x1] }
  0xcd   : > { %1431 = vrot.lane.b32.xlu1 %v5979_v24, %s5188_s19  ;;  %1466 = vrot.lane.b32.xlu0 %v5979_v24, %s5189_s20  ;;  %v1885_v24 = vsel %vm1879_vm4, %v1852_v61, %v1603_v19  ;;  %v1821_v8 = vsel %vm1813_vm2, %v1788_v37, %v1490_v17  ;;  %v6112_v17 = vld [vmem:[#allocation2 + $0x134] sm:$0xf]  ;;  %v546_v19 = vld [vmem:[#allocation2 + $0x130] sm:$0x8]  ;;  %v1155_v35 = vrot.slane %v874_v40, 4 }
  0xce   : > { %v1854_v43 = vsel %vm1846_vm3, %v1821_v8, %v1570_v18  ;;  %v877_v18 = vshll.u32 %v6091_v50, 16  ;;  %v896_v6 = vshrl.u32 %v6112_v17, 16  ;;  %v891_v11 = vshrl.u32 %v546_v19, 16 }
  0xcf   : > { %v1605_v62 = vpop.permute.xlu1 %1604  ;;  %v1638_v36 = vpop.permute.xlu0 %1637  ;;  %v881_v45 = vrot.slane %v876_v44, 4  ;;  %v899_v61 = vshll.u32 %v6112_v17, 16 }
  0xd0   : > { %v1918_v33 = vsel %vm1912_vm5, %v1885_v24, %v1638_v36  ;;  %v1887_v23 = vsel %vm1879_vm4, %v1854_v43, %v1605_v62  ;;  %v879_v3 = vor.u32 %v877_v18, %v876_v44  ;;  %v898_v24 = vrot.slane %v896_v6, 7 }
  0xd1   : > { %1468 = vrot.lane.b32.xlu1 %v6070_v47, %s5189_s20  ;;  %1503 = vrot.lane.b32.xlu0 %v6070_v47, %s5190_s21  ;;  %v908_v62 = vshll.u32 %v6114_v9, 16  ;;  %v4707_v37 = vrot.slane %v891_v11, 11  ;;  %v1156_v4 = vrot.slane %v877_v18, 5  ;;  %v1161_v44 = vrot.slane %v883_v49, 4 }
  0xd2   : > { %5021 = vmatprep.mubr.msk.bf16.mxu0 %vm1965_vm6, %v1918_v33  ;;  %v880_v55 = vsel %vm5287_vm10, %v4706_v12, %v879_v3  ;;  %v889_v33 = vsel %vm5287_vm10, %v881_v45, %v888_v28  ;;  %v901_v22 = vor.u32 %v899_v61, %v898_v24  ;;  %v903_v39 = vrot.slane %v898_v24, 4 }
  0xd3   : > { %v6110_v25 = vpop.permute.xlu1 %1270  ;;  %v1640_v15 = vpop.permute.xlu0 %1639  ;;  %v6164_v2 = vcombine.low %v880_v55, %v889_v33  ;;  %v6193_v49 = vcombine.low %v6091_v50, %v6095_v38  ;;  %v1157_v12 = vor.u32 %v1156_v4, %v1155_v35  ;;  %v1169_v11 = vrot.slane %v896_v6, 4 }
  0xd4   : > { %v1920_v51 = vsel %vm1912_vm5, %v1887_v23, %v1640_v15  ;;  %v902_v43 = vsel %vm5287_vm10, %v4707_v37, %v901_v22  ;;  %v1680_v19 = vsel %vm1665_vm13, %v5475_v41, %v6110_v25  ;;  %v1162_v25 = vor.u32 %v1161_v44, %v6178_v21 }
  0xd5   : > { %1505 = vrot.lane.b32.xlu1 %v6089_v30, %s5190_s21  ;;  %1583 = vrot.lane.b32.xlu0 %v6012_v59, %s5191_s22  ;;  %v905_v59 = vshrl.u32 %v6114_v9, 16  ;;  %v6197_v3 = vrot.slane %v908_v62, 5  ;;  %v1165_v50 = vshll.u32 %v545_v32, 16 }
  0xd6   : > { %5022 = vmatmul.mubr.msk.bf16.gmra.mrb[4].mxu0 %vm1965_vm6, %v1920_v51  ;;  %v1163_v55 = vrot.slane %v1162_v25, 4  ;;  %v554_v25 = vld [vmem:[#allocation2 + $0x158] sm:$0x8] }
  0xd7   : > { %v1273_v54 = vpop.permute.xlu1 %1272  ;;  %v1306_v1 = vpop.permute.xlu0 %1305  ;;  %v907_v26 = vrot.slane %v905_v59, 7  ;;  %v1175_v38 = vrot.slane %v905_v59, 4 }
  0xd8   : > { %v1724_v18 = vsel %vm1714_vm14, %v1680_v19, %v1306_v1 }
  0xd9   : > { %1585 = vrot.lane.b32.xlu1 %v6031_v34, %s5191_s22  ;;  %1618 = vrot.lane.b32.xlu0 %v6031_v34, %s5194_s29  ;;  %v6154_v34 = vcombine.low %v1146_v52, %v1154_v42  ;;  %v910_v10 = vor.u32 %v908_v62, %v907_v26  ;;  %v1170_v42 = vrot.slane %v899_v61, 5  ;;  %v549_v61 = vld [vmem:[#allocation2 + $0x13c] sm:$0x1]  ;;  %v6214_v26 = vcombine.low %v6112_v17, %v6114_v9  ;;  %v6216_v62 = vld [vmem:[#allocation2 + $0x148] sm:$0xf] }
  0xda   : > { %v1167_v17 = vrot.slane %v1165_v50, 5  ;;  %v1176_v9 = vor.u32 %v1175_v38, %v6197_v3  ;;  %v1179_v22 = vshll.u32 %v549_v61, 16 }
  0xdb   : > { %v1308_v36 = vpop.permute.xlu1 %1307  ;;  %v1418_v31 = vpop.permute.xlu0 %1417  ;;  %v911_v23 = vsel %vm5287_vm10, %v903_v39, %v910_v10  ;;  %v1171_v37 = vor.u32 %v1170_v42, %v1169_v11  ;;  %v6228_v39 = vld [vmem:[#allocation2 + $0x15c] sm:$0xf]  ;;  %v6230_v10 = vld [vmem:[#allocation2 + $0x160] sm:$0xf] }
  0xdc   : > { %v6174_v51 = vcombine.low %v902_v43, %v911_v23  ;;  %v1757_v40 = vsel %vm1747_vm15, %v1724_v18, %v1418_v31  ;;  %v6218_v31 = vld [vmem:[#allocation2 + $0x14c] sm:$0xf]  ;;  %v918_v43 = vshrl.u32 %v6216_v62, 16  ;;  %v940_v44 = vshrl.u32 %v6228_v39, 16 }
  0xdd   : > { %1620 = vrot.lane.b32.xlu1 %v6135_v7, %s5194_s29  ;;  %1653 = vrot.lane.b32.xlu0 %v6135_v7, %s5195_s30  ;;  %v927_v23 = vshrl.u32 %v6218_v31, 16  ;;  %v1172_v35 = vrot.slane %v1171_v37, 4  ;;  %v949_v19 = vshrl.u32 %v6230_v10, 16  ;;  %v1168_v18 = vsel %vm5295_vm11, %v1163_v55, %v1167_v17 }
  0xde   : > { %v1177_v32 = vrot.slane %v1176_v9, 4  ;;  %v930_v11 = vshll.u32 %v6218_v31, 16  ;;  %v952_v50 = vshll.u32 %v6230_v10, 16 }
  0xdf   : > { %v1420_v8 = vpop.permute.xlu1 %1419  ;;  %v1455_v5 = vpop.permute.xlu0 %1454  ;;  %v1174_v42 = vsel %vm5295_vm11, %v1172_v35, %v6197_v3  ;;  %v951_v3 = vrot.slane %v949_v19, 7 }
  0xe0   : > { %v1790_v41 = vsel %vm1780_vm1, %v1757_v40, %v1455_v5  ;;  %v550_v5 = vld [vmem:[#allocation2 + $0x144] sm:$0x8]  ;;  %v1181_v40 = vrot.slane %v1179_v22, 5 }
  0xe1   : > { %1286 = vrot.lane.b32.xlu1 %v6051_v13, %s5193_s24  ;;  %1655 = vrot.lane.b32.xlu0 %v6154_v34, %s5195_s30  ;;  %v954_v17 = vor.u32 %v952_v50, %v951_v3 }
  0xe3   : > { %v1457_v15 = vpop.permute.xlu1 %1456  ;;  %v1492_v60 = vpop.permute.xlu0 %1491 }
  0xe4   : > { %v1823_v1 = vsel %vm1813_vm2, %v1790_v41, %v1492_v60 }
  0xe5   : > { %1288 = vrot.lane.b32.xlu1 %v6164_v2, %s5193_s24  ;;  %1321 = vrot.lane.b32.xlu0 %v6164_v2, %s5192_s23 }
  0xe7   : > { %v1494_v29 = vpop.permute.xlu1 %1493  ;;  %v1572_v20 = vpop.permute.xlu0 %1571 }
  0xe8   : > { %v1856_v45 = vsel %vm1846_vm3, %v1823_v1, %v1572_v20  ;;  %v943_v1 = vshll.u32 %v6228_v39, 16 }
  0xe9   : > { %1323 = vrot.lane.b32.xlu1 %v6174_v51, %s5192_s23  ;;  %1433 = vrot.lane.b32.xlu0 %v6070_v47, %s5188_s19  ;;  %v1683_v47 = vsel %vm1665_vm13, %v5489_v48, %v1273_v54 }
  0xea   : > { %v1726_v6 = vsel %vm1714_vm14, %v1683_v47, %v1308_v36  ;;  %v942_v47 = vrot.slane %v940_v44, 7 }
  0xeb   : > { %v1574_v57 = vpop.permute.xlu1 %1573  ;;  %v1607_v52 = vpop.permute.xlu0 %1606  ;;  %v1759_v28 = vsel %vm1747_vm15, %v1726_v6, %v1420_v8  ;;  %v1182_v6 = vsel %vm5295_vm11, %v1177_v32, %v1181_v40  ;;  %v1183_v40 = vrot.slane %v918_v43, 4 }
  0xec   : > { %v1889_v48 = vsel %vm1879_vm4, %v1856_v45, %v1607_v52  ;;  %v1792_v59 = vsel %vm1780_vm1, %v1759_v28, %v1457_v15  ;;  %v921_v52 = vshll.u32 %v6216_v62, 16 }
  0xed   : > { %1435 = vrot.lane.b32.xlu1 %v6089_v30, %s5188_s19  ;;  %1470 = vrot.lane.b32.xlu0 %v6089_v30, %s5189_s20  ;;  %v1158_v30 = vrot.slane %v1157_v12, 4  ;;  %v1825_v33 = vsel %vm1813_vm2, %v1792_v59, %v1494_v29  ;;  %v929_v12 = vrot.slane %v927_v23, 7  ;;  %v945_v59 = vor.u32 %v943_v1, %v942_v47 }
  0xee   : > { %v1858_v8 = vsel %vm1846_vm3, %v1825_v33, %v1574_v57  ;;  %v913_v57 = vshrl.u32 %v550_v5, 16 }
  0xef   : > { %v1609_v54 = vpop.permute.xlu1 %1608  ;;  %v1642_v24 = vpop.permute.xlu0 %1641  ;;  %v1160_v29 = vsel %vm5295_vm11, %v1158_v30, %v6178_v21  ;;  %v920_v21 = vrot.slane %v918_v43, 7  ;;  %v4744_v43 = vcombine.low %v6216_v62, %v6218_v31 }
  0xf0   : > { %v1922_v36 = vsel %vm1912_vm5, %v1889_v48, %v1642_v24  ;;  %v1891_v15 = vsel %vm1879_vm4, %v1858_v8, %v1609_v54  ;;  %v6267_v38 = vcombine.low %v1160_v29, %v1168_v18  ;;  %v4708_v45 = vrot.slane %v913_v57, 11 }
  0xf1   : > { %1472 = vrot.lane.b32.xlu1 %v6193_v49, %s5189_s20  ;;  %1507 = vrot.lane.b32.xlu0 %v6193_v49, %s5190_s21  ;;  %v923_v61 = vor.u32 %v921_v52, %v920_v21  ;;  %v925_v28 = vrot.slane %v920_v21, 4  ;;  %v932_v48 = vor.u32 %v930_v11, %v929_v12  ;;  %v935_v54 = vshrl.u32 %v554_v25, 16 }
  0xf2   : > { %5025 = vmatprep.mubr.msk.bf16.mxu0 %vm1965_vm6, %v1922_v36  ;;  %v947_v36 = vrot.slane %v942_v47, 4  ;;  %v1184_v57 = vrot.slane %v921_v52, 5  ;;  %v1187_v12 = vrot.slane %v930_v11, 5  ;;  %v1189_v25 = vrot.slane %v927_v23, 4 }
  0xf3   : > { %v1275_v60 = vpop.permute.xlu1 %1274  ;;  %v1644_v4 = vpop.permute.xlu0 %1643  ;;  %v924_v55 = vsel %vm5287_vm10, %v4708_v45, %v923_v61  ;;  %v933_v37 = vsel %vm5287_vm10, %v925_v28, %v932_v48  ;;  %v4709_v33 = vrot.slane %v935_v54, 11  ;;  %v1198_v52 = vrot.slane %v943_v1, 5  ;;  %v557_v28 = vld [vmem:[#allocation2 + $0x164] sm:$0x1] }
  0xf4   : > { %v1924_v20 = vsel %vm1912_vm5, %v1891_v15, %v1644_v4  ;;  %v4726_v8 = vcombine.low %v924_v55, %v933_v37  ;;  %v955_v15 = vsel %vm5287_vm10, %v947_v36, %v954_v17  ;;  %v1686_v32 = vsel %vm1665_vm13, %v5610_v14, %v1275_v60  ;;  %v553_v14 = vld [vmem:[#allocation2 + $0x150] sm:$0x1] }
  0xf5   : > { %1509 = vrot.lane.b32.xlu1 %v6214_v26, %s5190_s21  ;;  %1587 = vrot.lane.b32.xlu0 %v6135_v7, %s5191_s22  ;;  %v946_v5 = vsel %vm5287_vm10, %v4709_v33, %v945_v59  ;;  %v1197_v60 = vrot.slane %v940_v44, 4  ;;  %v1201_v45 = vrot.slane %v952_v50, 5  ;;  %v1203_v44 = vrot.slane %v949_v19, 4 }
  0xf6   : > { %5026 = vmatmul.mubr.msk.bf16.gmra.mrb[8].mxu0 %vm1965_vm6, %v1924_v20  ;;  %v4727_v20 = vcombine.low %v946_v5, %v955_v15  ;;  %v1190_v31 = vor.u32 %v1189_v25, %v1187_v12  ;;  %v1193_v1 = vshll.u32 %v553_v14, 16  ;;  %v4745_v19 = vcombine.low %v6228_v39, %v6230_v10 }
  0xf7   : > { %v1277_v41 = vpop.permute.xlu1 %1276  ;;  %v1310_v7 = vpop.permute.xlu0 %1309  ;;  %v1204_v59 = vor.u32 %v1203_v44, %v1201_v45  ;;  %v1207_v33 = vshll.u32 %v557_v28, 16 }
  0xf8   : > { %v1728_v21 = vsel %vm1714_vm14, %v1686_v32, %v1310_v7  ;;  %v1689_v11 = vsel %vm1665_vm13, %v5620_v27, %v1277_v41  ;;  %v1185_v7 = vor.u32 %v1184_v57, %v1183_v40  ;;  %v1191_v55 = vrot.slane %v1190_v31, 4 }
  0xf9   : > { %1589 = vrot.lane.b32.xlu1 %v6154_v34, %s5191_s22  ;;  %1622 = vrot.lane.b32.xlu0 %v6154_v34, %s5194_s29  ;;  %v6277_v34 = vcombine.low %v1174_v42, %v1182_v6  ;;  %v1195_v37 = vrot.slane %v1193_v1, 5  ;;  %v1205_v15 = vrot.slane %v1204_v59, 4 }
  0xfb   : > { %v1312_v24 = vpop.permute.xlu1 %1311  ;;  %v1422_v30 = vpop.permute.xlu0 %1421  ;;  %v1196_v5 = vsel %vm5295_vm11, %v1191_v55, %v1195_v37 }
  0xfc   : > { %v1761_v42 = vsel %vm1747_vm15, %v1728_v21, %v1422_v30  ;;  %v1730_v3 = vsel %vm1714_vm14, %v1689_v11, %v1312_v24  ;;  %v1186_v24 = vrot.slane %v1185_v7, 4  ;;  %v1199_v30 = vor.u32 %v1198_v52, %v1197_v60 }
  0xfd   : > { %1624 = vrot.lane.b32.xlu1 %v6267_v38, %s5194_s29  ;;  %1657 = vrot.lane.b32.xlu0 %v6267_v38, %s5195_s30 }
  0xff   : > { %v1424_v9 = vpop.permute.xlu1 %1423  ;;  %v1459_v22 = vpop.permute.xlu0 %1458 }
 0x100   : > { %v1763_v27 = vsel %vm1747_vm15, %v1730_v3, %v1424_v9 }
 0x101   : > { %1290 = vrot.lane.b32.xlu1 %v6174_v51, %s5193_s24  ;;  %1659 = vrot.lane.b32.xlu0 %v6277_v34, %s5195_s30 }
 0x103   : > { %v1461_v4 = vpop.permute.xlu1 %1460  ;;  %v1496_v29 = vpop.permute.xlu0 %1495 }
 0x104   : > { %v1796_v48 = vsel %vm1780_vm1, %v1763_v27, %v1461_v4  ;;  %v1209_v4 = vrot.slane %v1207_v33, 5 }
 0x105   : > { %1292 = vrot.lane.b32.xlu1 %v4726_v8, %s5193_s24  ;;  %1325 = vrot.lane.b32.xlu0 %v4726_v8, %s5192_s23  ;;  %v1188_v8 = vsel %vm5295_vm11, %v1186_v24, %v1187_v12 }
 0x107   : > { %v1498_v35 = vpop.permute.xlu1 %1497  ;;  %v1576_v18 = vpop.permute.xlu0 %1575 }
 0x108   : > { %v1829_v54 = vsel %vm1813_vm2, %v1796_v48, %v1498_v35 }
 0x109   : > { %1327 = vrot.lane.b32.xlu1 %v4727_v20, %s5192_s23  ;;  %1437 = vrot.lane.b32.xlu0 %v6193_v49, %s5188_s19  ;;  %v1794_v49 = vsel %vm1780_vm1, %v1761_v42, %v1459_v22  ;;  %v1200_v22 = vrot.slane %v1199_v30, 4 }
 0x10a   : > { %v1827_v23 = vsel %vm1813_vm2, %v1794_v49, %v1496_v29 }
 0x10b   : > { %v1578_v47 = vpop.permute.xlu1 %1577  ;;  %v1611_v6 = vpop.permute.xlu0 %1610  ;;  %v1860_v62 = vsel %vm1846_vm3, %v1827_v23, %v1576_v18  ;;  %v1202_v35 = vsel %vm5295_vm11, %v1200_v22, %v1201_v45  ;;  %v1210_v18 = vsel %vm5295_vm11, %v1205_v15, %v1209_v4 }
 0x10c   : > { %v1893_v41 = vsel %vm1879_vm4, %v1860_v62, %v1611_v6  ;;  %v1862_v36 = vsel %vm1846_vm3, %v1829_v54, %v1578_v47  ;;  %v4763_v57 = vcombine.low %v1202_v35, %v1210_v18 }
 0x10d   : > { %1439 = vrot.lane.b32.xlu1 %v6214_v26, %s5188_s19  ;;  %1474 = vrot.lane.b32.xlu0 %v6214_v26, %s5189_s20 }
 0x10f   : > { %v1613_v50 = vpop.permute.xlu1 %1612  ;;  %v1646_v61 = vpop.permute.xlu0 %1645 }
 0x110   : > { %v1926_v26 = vsel %vm1912_vm5, %v1893_v41, %v1646_v61  ;;  %v1895_v17 = vsel %vm1879_vm4, %v1862_v36, %v1613_v50 }
 0x111   : > { %1476 = vrot.lane.b32.xlu1 %v4744_v43, %s5189_s20  ;;  %1511 = vrot.lane.b32.xlu0 %v4744_v43, %s5190_s21 }
 0x112   : > { %5029 = vmatprep.mubr.msk.bf16.mxu0 %vm1965_vm6, %v1926_v26 }
 0x113   : > { %v1279_v9 = vpop.permute.xlu1 %1278  ;;  %v1648_v39 = vpop.permute.xlu0 %1647 }
 0x114   : > { %v1928_v10 = vsel %vm1912_vm5, %v1895_v17, %v1648_v39  ;;  %v1692_v6 = vsel %vm1665_vm13, %v5776_v46, %v1279_v9 }
 0x115   : > { %1513 = vrot.lane.b32.xlu1 %v4745_v19, %s5190_s21  ;;  %1591 = vrot.lane.b32.xlu0 %v6267_v38, %s5191_s22  ;;  %v4762_v38 = vcombine.low %v1188_v8, %v1196_v5 }
 0x116   : > { %5030 = vmatmul.mubr.msk.bf16.gmra.mrb[12].mxu0 %vm1965_vm6, %v1928_v10 }
 0x117   : > { %v1281_v29 = vpop.permute.xlu1 %1280  ;;  %v1314_v20 = vpop.permute.xlu0 %1313 }
 0x118   : > { %v1732_v14 = vsel %vm1714_vm14, %v1692_v6, %v1314_v20  ;;  %v1695_v45 = vsel %vm1665_vm13, %v5786_v0, %v1281_v29 }
 0x119   : > { %1593 = vrot.lane.b32.xlu1 %v6277_v34, %s5191_s22  ;;  %1626 = vrot.lane.b32.xlu0 %v6277_v34, %s5194_s29 }
 0x11b   : > { %v1316_v32 = vpop.permute.xlu1 %1315  ;;  %v1426_v40 = vpop.permute.xlu0 %1425 }
 0x11c   : > { %v1765_v60 = vsel %vm1747_vm15, %v1732_v14, %v1426_v40  ;;  %v1734_v23 = vsel %vm1714_vm14, %v1695_v45, %v1316_v32 }
 0x11d   : > { %1628 = vrot.lane.b32.xlu1 %v4762_v38, %s5194_s29  ;;  %1661 = vrot.lane.b32.xlu0 %v4762_v38, %s5195_s30 }
 0x11f   : > { %v1428_v21 = vpop.permute.xlu1 %1427  ;;  %v1463_v12 = vpop.permute.xlu0 %1462 }
 0x120   : > { %v1798_v52 = vsel %vm1780_vm1, %v1765_v60, %v1463_v12  ;;  %v1767_v44 = vsel %vm1747_vm15, %v1734_v23, %v1428_v21 }
 0x121   : > { %1663 = vrot.lane.b32.xlu1 %v4763_v57, %s5195_s30 }
 0x123   : > { %v1465_v25 = vpop.permute.xlu1 %1464  ;;  %v1500_v34 = vpop.permute.xlu0 %1499 }
 0x124   : > { %v1831_v11 = vsel %vm1813_vm2, %v1798_v52, %v1500_v34  ;;  %v1800_v31 = vsel %vm1780_vm1, %v1767_v44, %v1465_v25 }
 0x127   : > { %v1502_v42 = vpop.permute.xlu1 %1501  ;;  %v1580_v47 = vpop.permute.xlu0 %1579 }
 0x128   : > { %v1864_v7 = vsel %vm1846_vm3, %v1831_v11, %v1580_v47  ;;  %v1833_v27 = vsel %vm1813_vm2, %v1800_v31, %v1502_v42 }
 0x12b   : > { %v1582_v49 = vpop.permute.xlu1 %1581  ;;  %v1615_v43 = vpop.permute.xlu0 %1614 }
 0x12c   : > { %v1897_v46 = vsel %vm1879_vm4, %v1864_v7, %v1615_v43  ;;  %v1866_v0 = vsel %vm1846_vm3, %v1833_v27, %v1582_v49 }
 0x12f   : > { %v1617_v3 = vpop.permute.xlu1 %1616  ;;  %v1650_v62 = vpop.permute.xlu0 %1649 }
 0x130   : > { %v1930_v1 = vsel %vm1912_vm5, %v1897_v46, %v1650_v62  ;;  %v1899_v41 = vsel %vm1879_vm4, %v1866_v0, %v1617_v3 }
 0x131   : > { %5033 = vmatprep.mubr.msk.bf16.mxu0 %vm1965_vm6, %v1930_v1 }
 0x133   : > { %v1283_v50 = vpop.permute.xlu1 %1282  ;;  %v1652_v61 = vpop.permute.xlu0 %1651 }
 0x134   : > { %v1932_v28 = vsel %vm1912_vm5, %v1899_v41, %v1652_v61  ;;  %v1698_v33 = vsel %vm1665_vm13, %v5904_v16, %v1283_v50 }
 0x135   : > { %5034 = vmatmul.mubr.msk.bf16.gmra.mrb[16].mxu0 %vm1965_vm6, %v1932_v28 }
 0x137   : > { %v1285_v48 = vpop.permute.xlu1 %1284  ;;  %v1318_v26 = vpop.permute.xlu0 %1317 }
 0x138   : > { %v1736_v17 = vsel %vm1714_vm14, %v1698_v33, %v1318_v26  ;;  %v1701_v8 = vsel %vm1665_vm13, %v5917_v53, %v1285_v48 }
 0x13b   : > { %v1320_v19 = vpop.permute.xlu1 %1319  ;;  %v1430_v54 = vpop.permute.xlu0 %1429 }
 0x13c   : > { %v1769_v9 = vsel %vm1747_vm15, %v1736_v17, %v1430_v54  ;;  %v1738_v15 = vsel %vm1714_vm14, %v1701_v8, %v1320_v19 }
 0x13f   : > { %v1432_v24 = vpop.permute.xlu1 %1431  ;;  %v1467_v30 = vpop.permute.xlu0 %1466 }
 0x140   : > { %v1802_v22 = vsel %vm1780_vm1, %v1769_v9, %v1467_v30  ;;  %v1771_v29 = vsel %vm1747_vm15, %v1738_v15, %v1432_v24 }
 0x143   : > { %v1469_v59 = vpop.permute.xlu1 %1468  ;;  %v1504_v36 = vpop.permute.xlu0 %1503 }
 0x144   : > { %v1835_v5 = vsel %vm1813_vm2, %v1802_v22, %v1504_v36  ;;  %v1804_v35 = vsel %vm1780_vm1, %v1771_v29, %v1469_v59 }
 0x147   : > { %v1506_v55 = vpop.permute.xlu1 %1505  ;;  %v1584_v37 = vpop.permute.xlu0 %1583 }
 0x148   : > { %v1868_v4 = vsel %vm1846_vm3, %v1835_v5, %v1584_v37  ;;  %v1837_v32 = vsel %vm1813_vm2, %v1804_v35, %v1506_v55 }
 0x14b   : > { %v1586_v39 = vpop.permute.xlu1 %1585  ;;  %v1619_v10 = vpop.permute.xlu0 %1618 }
 0x14c   : > { %v1901_v16 = vsel %vm1879_vm4, %v1868_v4, %v1619_v10  ;;  %v1870_v53 = vsel %vm1846_vm3, %v1837_v32, %v1586_v39 }
 0x14f   : > { %v1621_v20 = vpop.permute.xlu1 %1620  ;;  %v1654_v38 = vpop.permute.xlu0 %1653 }
 0x150   : > { %v1934_v18 = vsel %vm1912_vm5, %v1901_v16, %v1654_v38  ;;  %v1903_v40 = vsel %vm1879_vm4, %v1870_v53, %v1621_v20 }
 0x151   : > { %5037 = vmatprep.mubr.msk.bf16.mxu0 %vm1965_vm6, %v1934_v18 }
 0x153   : > { %v1287_v57 = vpop.permute.xlu1 %1286  ;;  %v1656_v21 = vpop.permute.xlu0 %1655 }
 0x154   : > { %v1936_v12 = vsel %vm1912_vm5, %v1903_v40, %v1656_v21  ;;  %v1704_v45 = vsel %vm1665_vm13, %v6041_v58, %v1287_v57 }
 0x155   : > { %5038 = vmatmul.mubr.msk.bf16.gmra.mrb[20].mxu0 %vm1965_vm6, %v1936_v12 }
 0x157   : > { %v1289_v25 = vpop.permute.xlu1 %1288  ;;  %v1322_v34 = vpop.permute.xlu0 %1321 }
 0x158   : > { %v1740_v11 = vsel %vm1714_vm14, %v1704_v45, %v1322_v34  ;;  %v1707_v3 = vsel %vm1665_vm13, %v6051_v13, %v1289_v25 }
 0x15b   : > { %v1324_v42 = vpop.permute.xlu1 %1323  ;;  %v1434_v47 = vpop.permute.xlu0 %1433 }
 0x15c   : > { %v1773_v23 = vsel %vm1747_vm15, %v1740_v11, %v1434_v47  ;;  %v1742_v31 = vsel %vm1714_vm14, %v1707_v3, %v1324_v42 }
 0x15f   : > { %v1436_v6 = vpop.permute.xlu1 %1435  ;;  %v1471_v14 = vpop.permute.xlu0 %1470 }
 0x160   : > { %v1806_v46 = vsel %vm1780_vm1, %v1773_v23, %v1471_v14  ;;  %v1775_v27 = vsel %vm1747_vm15, %v1742_v31, %v1436_v6 }
 0x163   : > { %v1473_v60 = vpop.permute.xlu1 %1472  ;;  %v1508_v49 = vpop.permute.xlu0 %1507 }
 0x164   : > { %v1839_v62 = vsel %vm1813_vm2, %v1806_v46, %v1508_v49  ;;  %v1808_v50 = vsel %vm1780_vm1, %v1775_v27, %v1473_v60 }
 0x167   : > { %v1510_v43 = vpop.permute.xlu1 %1509  ;;  %v1588_v52 = vpop.permute.xlu0 %1587 }
 0x168   : > { %v1872_v1 = vsel %vm1846_vm3, %v1839_v62, %v1588_v52  ;;  %v1841_v28 = vsel %vm1813_vm2, %v1808_v50, %v1510_v43 }
 0x16b   : > { %v1590_v7 = vpop.permute.xlu1 %1589  ;;  %v1623_v44 = vpop.permute.xlu0 %1622 }
 0x16c   : > { %v1905_v58 = vsel %vm1879_vm4, %v1872_v1, %v1623_v44  ;;  %v1874_v13 = vsel %vm1846_vm3, %v1841_v28, %v1590_v7 }
 0x16f   : > { %v1625_v0 = vpop.permute.xlu1 %1624  ;;  %v1658_v41 = vpop.permute.xlu0 %1657 }
 0x170   : > { %v1938_v61 = vsel %vm1912_vm5, %v1905_v58, %v1658_v41  ;;  %v1907_v48 = vsel %vm1879_vm4, %v1874_v13, %v1625_v0 }
 0x171   : > { %5041 = vmatprep.mubr.msk.bf16.mxu0 %vm1965_vm6, %v1938_v61 }
 0x173   : > { %v1291_v26 = vpop.permute.xlu1 %1290  ;;  %v1660_v19 = vpop.permute.xlu0 %1659 }
 0x174   : > { %v1940_v54 = vsel %vm1912_vm5, %v1907_v48, %v1660_v19  ;;  %v1710_v10 = vsel %vm1665_vm13, %v6164_v2, %v1291_v26 }
 0x175   : > { %5042 = vmatmul.mubr.msk.bf16.gmra.mrb[24].mxu0 %vm1965_vm6, %v1940_v54 }
 0x177   : > { %v1293_v24 = vpop.permute.xlu1 %1292  ;;  %v1326_v30 = vpop.permute.xlu0 %1325 }
 0x178   : > { %v1744_v22 = vsel %vm1714_vm14, %v1710_v10, %v1326_v30  ;;  %v1713_v4 = vsel %vm1665_vm13, %v6174_v51, %v1293_v24 }
 0x17b   : > { %v1328_v59 = vpop.permute.xlu1 %1327  ;;  %v1438_v36 = vpop.permute.xlu0 %1437 }
 0x17c   : > { %v1777_v5 = vsel %vm1747_vm15, %v1744_v22, %v1438_v36  ;;  %v1746_v2 = vsel %vm1714_vm14, %v1713_v4, %v1328_v59 }
 0x17f   : > { %v1440_v55 = vpop.permute.xlu1 %1439  ;;  %v1475_v37 = vpop.permute.xlu0 %1474 }
 0x180   : > { %v1810_v29 = vsel %vm1780_vm1, %v1777_v5, %v1475_v37  ;;  %v1779_v21 = vsel %vm1747_vm15, %v1746_v2, %v1440_v55 }
 0x183   : > { %v1477_v33 = vpop.permute.xlu1 %1476  ;;  %v1512_v17 = vpop.permute.xlu0 %1511 }
 0x184   : > { %v1843_v35 = vsel %vm1813_vm2, %v1810_v29, %v1512_v17  ;;  %v1812_v60 = vsel %vm1780_vm1, %v1779_v21, %v1477_v33 }
 0x187   : > { %v1514_v9 = vpop.permute.xlu1 %1513  ;;  %v1592_v39 = vpop.permute.xlu0 %1591 }
 0x188   : > { %v1876_v12 = vsel %vm1846_vm3, %v1843_v35, %v1592_v39  ;;  %v1845_v11 = vsel %vm1813_vm2, %v1812_v60, %v1514_v9 }
 0x189   : > { %v6415_v8 = vpop.f32.mrb[0].mxu0 }
 0x18a   : > { %v6418_v15 = vpop.f32.mrb[1].mxu0  ;;  %v2235_v53 = vmul.f32 %v6415_v8, %v6415_v8  ;;  %v2166_v34 = vsel %vm1665_vm13, %v6415_v8, 0.0 }
 0x18b   : > { %v2233_v16 = vmul.f32 %v6418_v15, %v6418_v15  ;;  %v1594_v20 = vpop.permute.xlu1 %1593  ;;  %v6425_v38 = vpop.f32.mrb[2].mxu0  ;;  %v2163_v51 = vsel %vm1665_vm13, %v6418_v15, 0.0 }
 0x18c   : > { %v1627_v18 = vpop.permute.xlu0 %1626  ;;  %v6429_v32 = vpop.f32.mrb[3].mxu0  ;;  %v2236_v47 = vmul.f32 %v6425_v38, %v6425_v38  ;;  %v2268_v23 = vsel %vm1665_vm13, %v2235_v53, 0.0  ;;  %v2168_v7 = vsel %vm1665_vm13, %v6425_v38, 0.0  ;;  %v1878_v46 = vsel %vm1846_vm3, %v1845_v11, %v1594_v20 }
 0x18d   : > { %v2164_v40 = vsel %vm1665_vm13, %v6429_v32, 0.0  ;;  %v2234_v57 = vmul.f32 %v6429_v32, %v6429_v32  ;;  %v2265_v42 = vsel %vm1665_vm13, %v2233_v16, 0.0  ;;  %v1909_v49 = vsel %vm1879_vm4, %v1876_v12, %v1627_v18 }
 0x18e   : > { %v2165_v25 = vadd.f32 %v2164_v40, %v2163_v51  ;;  %v2270_v31 = vsel %vm1665_vm13, %v2236_v47, 0.0 }
 0x18f   : > { %v2266_v6 = vsel %vm1665_vm13, %v2234_v57, 0.0  ;;  %v1629_v14 = vpop.permute.xlu1 %1628 }
 0x190   : > { %v2167_v43 = vadd.f32 %v2166_v34, %v2165_v25  ;;  %v2267_v52 = vadd.f32 %v2266_v6, %v2265_v42  ;;  %v1662_v45 = vpop.permute.xlu0 %1661  ;;  %v1911_v1 = vsel %vm1879_vm4, %v1878_v46, %v1629_v14 }
 0x191   : > { %v1942_v44 = vsel %vm1912_vm5, %v1909_v49, %v1662_v45 }
 0x192   : > { %v2269_v3 = vadd.f32 %v2268_v23, %v2267_v52  ;;  %5045 = vmatprep.mubr.msk.bf16.mxu0 %vm1965_vm6, %v1942_v44  ;;  %v2169_v62 = vadd.f32 %v2168_v7, %v2167_v43 }
 0x193   : > { %v1664_v27 = vpop.permute.xlu1 %1663 }
 0x194   : > { %v1944_v58 = vsel %vm1912_vm5, %v1911_v1, %v1664_v27  ;;  %v2271_v0 = vadd.f32 %v2270_v31, %v2269_v3 }
 0x195   : > { %5046 = vmatmul.mubr.msk.bf16.gmra.mrb[28].mxu0 %vm1965_vm6, %v1944_v58 }
 0x1a9   : > { %v6460_v41 = vpop.f32.mrb[4].mxu0 }
 0x1aa   : > { %v6462_v50 = vpop.f32.mrb[5].mxu0  ;;  %v2239_v19 = vmul.f32 %v6460_v41, %v6460_v41  ;;  %v2174_v55 = vsel %vm1665_vm13, %v6460_v41, 0.0 }
 0x1ab   : > { %v2170_v61 = vsel %vm1665_vm13, %v6462_v50, 0.0  ;;  %v2237_v28 = vmul.f32 %v6462_v50, %v6462_v50  ;;  %v6468_v13 = vpop.f32.mrb[6].mxu0 }
 0x1ac   : > { %v2171_v48 = vadd.f32 %v2170_v61, %v2169_v62  ;;  %v6470_v26 = vpop.f32.mrb[7].mxu0  ;;  %v2240_v37 = vmul.f32 %v6468_v13, %v6468_v13  ;;  %v2276_v39 = vsel %vm1665_vm13, %v2239_v19, 0.0  ;;  %v2176_v10 = vsel %vm1665_vm13, %v6468_v13, 0.0 }
 0x1ad   : > { %v2272_v54 = vsel %vm1665_vm13, %v2237_v28, 0.0  ;;  %v2172_v24 = vsel %vm1665_vm13, %v6470_v26, 0.0  ;;  %v2238_v30 = vmul.f32 %v6470_v26, %v6470_v26 }
 0x1ae   : > { %v2273_v59 = vadd.f32 %v2272_v54, %v2271_v0  ;;  %v2173_v36 = vadd.f32 %v2172_v24, %v2171_v48  ;;  %v2278_v4 = vsel %vm1665_vm13, %v2240_v37, 0.0 }
 0x1af   : > { %v2274_v33 = vsel %vm1665_vm13, %v2238_v30, 0.0 }
 0x1b0   : > { %v2175_v17 = vadd.f32 %v2174_v55, %v2173_v36  ;;  %v2275_v9 = vadd.f32 %v2274_v33, %v2273_v59 }
 0x1b2   : > { %v2277_v22 = vadd.f32 %v2276_v39, %v2275_v9  ;;  %v2177_v5 = vadd.f32 %v2176_v10, %v2175_v17 }
 0x1b4   : > { %v2279_v29 = vadd.f32 %v2278_v4, %v2277_v22 }
 0x1c9   : > { %v6488_v16 = vpop.f32.mrb[8].mxu0 }
 0x1ca   : > { %v6490_v20 = vpop.f32.mrb[9].mxu0  ;;  %v2243_v40 = vmul.f32 %v6488_v16, %v6488_v16  ;;  %v2182_v42 = vsel %vm1665_vm13, %v6488_v16, 0.0 }
 0x1cb   : > { %v2178_v2 = vsel %vm1665_vm13, %v6490_v20, 0.0  ;;  %v2241_v35 = vmul.f32 %v6490_v20, %v6490_v20  ;;  %v6496_v18 = vpop.f32.mrb[10].mxu0 }
 0x1cc   : > { %v2179_v53 = vadd.f32 %v2178_v2, %v2177_v5  ;;  %v6498_v51 = vpop.f32.mrb[11].mxu0  ;;  %v2244_v47 = vmul.f32 %v6496_v18, %v6496_v18  ;;  %v2284_v49 = vsel %vm1665_vm13, %v2243_v40, 0.0  ;;  %v2184_v43 = vsel %vm1665_vm13, %v6496_v18, 0.0 }
 0x1cd   : > { %v2280_v57 = vsel %vm1665_vm13, %v2241_v35, 0.0  ;;  %v2180_v21 = vsel %vm1665_vm13, %v6498_v51, 0.0  ;;  %v2242_v12 = vmul.f32 %v6498_v51, %v6498_v51 }
 0x1ce   : > { %v2281_v25 = vadd.f32 %v2280_v57, %v2279_v29  ;;  %v2181_v34 = vadd.f32 %v2180_v21, %v2179_v53  ;;  %v2286_v11 = vsel %vm1665_vm13, %v2244_v47, 0.0 }
 0x1cf   : > { %v2282_v6 = vsel %vm1665_vm13, %v2242_v12, 0.0 }
 0x1d0   : > { %v2183_v14 = vadd.f32 %v2182_v42, %v2181_v34  ;;  %v2283_v60 = vadd.f32 %v2282_v6, %v2281_v25 }
 0x1d2   : > { %v2285_v52 = vadd.f32 %v2284_v49, %v2283_v60  ;;  %v2185_v45 = vadd.f32 %v2184_v43, %v2183_v14 }
 0x1d4   : > { %v2287_v23 = vadd.f32 %v2286_v11, %v2285_v52  ;;  %v6572_v11 = vld [vmem:[#allocation2 + $0x8] sm:$0xf] }
 0x1d5   : > { %9069 = vst [vmem:[#allocation3_spill] sm:$0xff] %v6572_v11 }
 0x1e9   : > { %v6516_v7 = vpop.f32.mrb[12].mxu0 }
 0x1ea   : > { %v6518_v44 = vpop.f32.mrb[13].mxu0  ;;  %v2247_v27 = vmul.f32 %v6516_v7, %v6516_v7  ;;  %v2190_v19 = vsel %vm1665_vm13, %v6516_v7, 0.0 }
 0x1eb   : > { %v2186_v46 = vsel %vm1665_vm13, %v6518_v44, 0.0  ;;  %v2245_v3 = vmul.f32 %v6518_v44, %v6518_v44  ;;  %v6524_v62 = vpop.f32.mrb[14].mxu0 }
 0x1ec   : > { %v2187_v31 = vadd.f32 %v2186_v46, %v2185_v45  ;;  %v6526_v1 = vpop.f32.mrb[15].mxu0  ;;  %v2248_v54 = vmul.f32 %v6524_v62, %v6524_v62  ;;  %v2292_v36 = vsel %vm1665_vm13, %v2247_v27, 0.0  ;;  %v2192_v55 = vsel %vm1665_vm13, %v6524_v62, 0.0  ;;  %v2664_v27 = vld [vmem:[#allocation2 + $0x158] sm:$0x8] }
 0x1ed   : > { %v2288_v58 = vsel %vm1665_vm13, %v2245_v3, 0.0  ;;  %v2188_v0 = vsel %vm1665_vm13, %v6526_v1, 0.0  ;;  %v2246_v61 = vmul.f32 %v6526_v1, %v6526_v1  ;;  %v9022_v46 = vshrl.u32 %v6572_v11, 16 }
 0x1ee   : > { %v2289_v28 = vadd.f32 %v2288_v58, %v2287_v23  ;;  %v2189_v48 = vadd.f32 %v2188_v0, %v2187_v31  ;;  %v2294_v17 = vsel %vm1665_vm13, %v2248_v54, 0.0  ;;  %v6574_v23 = vld [vmem:[#allocation2 + $0xc] sm:$0xf]  ;;  %v9020_v3 = vshll.u32 %v6572_v11, 16  ;;  %v6580_v58 = vld [vmem:[#allocation2 + $0x15c] sm:$0xf] }
 0x1ef   : > { %v2290_v24 = vsel %vm1665_vm13, %v2246_v61, 0.0  ;;  %9070 = vst [vmem:[#allocation4_spill] sm:$0xff] %v6574_v23  ;;  %v4851_v31 = vcombine.low %v6572_v11, %v6574_v23  ;;  %9071 = vst [vmem:[#allocation5_spill] sm:$0xff] %v6580_v58  ;;  %v6582_v0 = vld [vmem:[#allocation2 + $0x160] sm:$0xf]  ;;  %v9021_v61 = vshrl.u32 %v6574_v23, 16 }
 0x1f0   : > { %v2191_v30 = vadd.f32 %v2190_v19, %v2189_v48  ;;  %v2291_v59 = vadd.f32 %v2290_v24, %v2289_v28  ;;  %9072 = vst [vmem:[#allocation6_spill] sm:$0xff] %v6582_v0  ;;  %v3043_v28 = vshrl.u32 %v2664_v27, 16  ;;  %v9018_v48 = vshrl.u32 %v6580_v58, 16  ;;  %v6806_v11 = vld [vmem:[#allocation2 + $0x60] sm:$0x1] }
 0x1f1   : > { %3514 = vrot.lane.b32.xlu0 %v4851_v31, %s5188_s19  ;;  %v9017_v19 = vshll.u32 %v6580_v58, 16  ;;  %v9015_v54 = vshrl.u32 %v6582_v0, 16  ;;  %v9016_v24 = vshll.u32 %v6582_v0, 16 }
 0x1f2   : > { %v2293_v37 = vadd.f32 %v2292_v36, %v2291_v59  ;;  %v2193_v33 = vadd.f32 %v2192_v55, %v2191_v30  ;;  %v9019_v30 = vshll.u32 %v6574_v23, 16  ;;  %v3064_v59 = vrot.slane %v9022_v46, 4  ;;  %v2611_v46 = vld [vmem:[#allocation2 + $0x4c] sm:$0x1] }
 0x1f3   : > { %v3065_v36 = vrot.slane %v9020_v3, 5  ;;  %v4832_v55 = vrot.slane %v3043_v28, 11 }
 0x1f4   : > { %v2295_v9 = vadd.f32 %v2294_v17, %v2293_v37  ;;  %v3050_v37 = vrot.slane %v9018_v48, 7  ;;  %v3070_v17 = vrot.slane %v9021_v61, 4 }
 0x208   : > { %v6544_v39 = vpop.f32.mrb[16].mxu0 }
 0x209   : > { %v6546_v10 = vpop.f32.mrb[17].mxu0  ;;  %v2251_v35 = vmul.f32 %v6544_v39, %v6544_v39  ;;  %v2198_v25 = vsel %vm1665_vm13, %v6544_v39, 0.0 }
 0x20a   : > { %v2194_v22 = vsel %vm1665_vm13, %v6546_v10, 0.0  ;;  %v2249_v5 = vmul.f32 %v6546_v10, %v6546_v10  ;;  %v6552_v4 = vpop.f32.mrb[18].mxu0 }
 0x20b   : > { %v2195_v29 = vadd.f32 %v2194_v22, %v2193_v33  ;;  %v6554_v2 = vpop.f32.mrb[19].mxu0  ;;  %v2252_v34 = vmul.f32 %v6552_v4, %v6552_v4  ;;  %v2300_v14 = vsel %vm1665_vm13, %v2251_v35, 0.0  ;;  %v2200_v60 = vsel %vm1665_vm13, %v6552_v4, 0.0 }
 0x20c   : > { %v2296_v53 = vsel %vm1665_vm13, %v2249_v5, 0.0  ;;  %v2196_v40 = vsel %vm1665_vm13, %v6554_v2, 0.0  ;;  %v2250_v57 = vmul.f32 %v6554_v2, %v6554_v2  ;;  %v3059_v33 = vrot.slane %v9015_v54, 7 }
 0x20d   : > { %v2297_v21 = vadd.f32 %v2296_v53, %v2295_v9  ;;  %v2197_v12 = vadd.f32 %v2196_v40, %v2195_v29  ;;  %v2302_v52 = vsel %vm1665_vm13, %v2252_v34, 0.0  ;;  %v3053_v9 = vor.u32 %v9017_v19, %v3050_v37  ;;  %v2599_v53 = vld [vmem:[#allocation2 + $0x10] sm:$0x1] }
 0x20e   : > { %v2298_v42 = vsel %vm1665_vm13, %v2250_v57, 0.0  ;;  %v3055_v22 = vrot.slane %v3050_v37, 4  ;;  %v3062_v5 = vor.u32 %v9016_v24, %v3059_v33  ;;  %v3066_v40 = vor.u32 %v3065_v36, %v3064_v59 }
 0x20f   : > { %v2199_v47 = vadd.f32 %v2198_v25, %v2197_v12  ;;  %v2299_v6 = vadd.f32 %v2298_v42, %v2297_v21  ;;  %v3054_v29 = vsel %vm5287_vm10, %v4832_v55, %v3053_v9  ;;  %v3068_v57 = vrot.slane %v9019_v30, 5 }
 0x210   : > { %v3063_v35 = vsel %vm5287_vm10, %v3055_v22, %v3062_v5  ;;  %v3074_v12 = vshll.u32 %v2599_v53, 16  ;;  %v3067_v25 = vrot.slane %v3066_v40, 4 }
 0x211   : > { %v2301_v49 = vadd.f32 %v2300_v14, %v2299_v6  ;;  %v2201_v43 = vadd.f32 %v2200_v60, %v2199_v47  ;;  %v4850_v21 = vcombine.low %v3054_v29, %v3063_v35  ;;  %v3071_v34 = vor.u32 %v3070_v17, %v3068_v57 }
 0x212   : > { %v3076_v42 = vrot.slane %v3074_v12, 5  ;;  %v3069_v60 = vsel %vm5295_vm11, %v3067_v25, %v3068_v57 }
 0x213   : > { %v2303_v45 = vadd.f32 %v2302_v52, %v2301_v49  ;;  %3432 = vrot.lane.b32.xlu1 %v4850_v21, %s5192_s23  ;;  %v3072_v6 = vrot.slane %v3071_v34, 4 }
 0x215   : > { %v3077_v27 = vsel %vm5295_vm11, %v3072_v6, %v3076_v42 }
 0x216   : > { %v4869_v17 = vcombine.low %v3069_v60, %v3077_v27 }
 0x218   : > { %3668 = vrot.lane.b32.xlu0 %v4869_v17, %s5191_s22 }
 0x228   : > { %v6612_v47 = vpop.f32.mrb[20].mxu0 }
 0x229   : > { %v6614_v14 = vpop.f32.mrb[21].mxu0  ;;  %v2255_v28 = vmul.f32 %v6612_v47, %v6612_v47  ;;  %v2206_v5 = vsel %vm1665_vm13, %v6612_v47, 0.0 }
 0x22a   : > { %v2202_v49 = vsel %vm1665_vm13, %v6614_v14, 0.0  ;;  %v2253_v52 = vmul.f32 %v6614_v14, %v6614_v14  ;;  %v6622_v31 = vpop.f32.mrb[22].mxu0 }
 0x22b   : > { %v2203_v59 = vadd.f32 %v2202_v49, %v2201_v43  ;;  %v6628_v36 = vpop.f32.mrb[23].mxu0  ;;  %v2256_v29 = vmul.f32 %v6622_v31, %v6622_v31  ;;  %v2308_v40 = vsel %vm1665_vm13, %v2255_v28, 0.0  ;;  %v2208_v57 = vsel %vm1665_vm13, %v6622_v31, 0.0 }
 0x22c   : > { %v2304_v55 = vsel %vm1665_vm13, %v2253_v52, 0.0  ;;  %v2204_v37 = vsel %vm1665_vm13, %v6628_v36, 0.0  ;;  %v2254_v33 = vmul.f32 %v6628_v36, %v6628_v36 }
 0x22d   : > { %v2305_v9 = vadd.f32 %v2304_v55, %v2303_v45  ;;  %v2205_v22 = vadd.f32 %v2204_v37, %v2203_v59  ;;  %v2310_v12 = vsel %vm1665_vm13, %v2256_v29, 0.0 }
 0x22e   : > { %v2306_v43 = vsel %vm1665_vm13, %v2254_v33, 0.0 }
 0x22f   : > { %v2207_v35 = vadd.f32 %v2206_v5, %v2205_v22  ;;  %v2307_v53 = vadd.f32 %v2306_v43, %v2305_v9 }
 0x231   : > { %v2309_v21 = vadd.f32 %v2308_v40, %v2307_v53  ;;  %v2209_v45 = vadd.f32 %v2208_v57, %v2207_v35 }
 0x233   : > { %v2311_v25 = vadd.f32 %v2310_v12, %v2309_v21 }
 0x248   : > { %v6645_v34 = vpop.f32.mrb[24].mxu0 }
 0x249   : > { %v6647_v42 = vpop.f32.mrb[25].mxu0  ;;  %v2259_v28 = vmul.f32 %v6645_v34, %v6645_v34  ;;  %v2214_v9 = vsel %vm1665_vm13, %v6645_v34, 0.0 }
 0x24a   : > { %v2210_v6 = vsel %vm1665_vm13, %v6647_v42, 0.0  ;;  %v2257_v60 = vmul.f32 %v6647_v42, %v6647_v42  ;;  %v6653_v49 = vpop.f32.mrb[26].mxu0 }
 0x24b   : > { %v2211_v52 = vadd.f32 %v2210_v6, %v2209_v45  ;;  %v6655_v27 = vpop.f32.mrb[27].mxu0  ;;  %v2260_v22 = vmul.f32 %v6653_v49, %v6653_v49  ;;  %v2316_v35 = vsel %vm1665_vm13, %v2259_v28, 0.0  ;;  %v2216_v53 = vsel %vm1665_vm13, %v6653_v49, 0.0 }
 0x24c   : > { %v2312_v59 = vsel %vm1665_vm13, %v2257_v60, 0.0  ;;  %v2212_v55 = vsel %vm1665_vm13, %v6655_v27, 0.0  ;;  %v2258_v37 = vmul.f32 %v6655_v27, %v6655_v27 }
 0x24d   : > { %v2313_v33 = vadd.f32 %v2312_v59, %v2311_v25  ;;  %v2213_v17 = vadd.f32 %v2212_v55, %v2211_v52  ;;  %v2318_v21 = vsel %vm1665_vm13, %v2260_v22, 0.0 }
 0x24e   : > { %v2314_v5 = vsel %vm1665_vm13, %v2258_v37, 0.0 }
 0x24f   : > { %v2215_v29 = vadd.f32 %v2214_v9, %v2213_v17  ;;  %v2315_v43 = vadd.f32 %v2314_v5, %v2313_v33 }
 0x251   : > { %v2317_v40 = vadd.f32 %v2316_v35, %v2315_v43  ;;  %v2217_v57 = vadd.f32 %v2216_v53, %v2215_v29 }
 0x253   : > { %v2319_v45 = vadd.f32 %v2318_v21, %v2317_v40 }
 0x268   : > { %v6673_v12 = vpop.f32.mrb[28].mxu0 }
 0x269   : > { %v6675_v25 = vpop.f32.mrb[29].mxu0  ;;  %v2263_v55 = vmul.f32 %v6673_v12, %v6673_v12  ;;  %v2222_v5 = vsel %vm1665_vm13, %v6673_v12, 0.0 }
 0x26a   : > { %v2218_v6 = vsel %vm1665_vm13, %v6675_v25, 0.0  ;;  %v2261_v60 = vmul.f32 %v6675_v25, %v6675_v25  ;;  %v6681_v52 = vpop.f32.mrb[30].mxu0 }
 0x26b   : > { %v2219_v28 = vadd.f32 %v2218_v6, %v2217_v57  ;;  %v6683_v59 = vpop.f32.mrb[31].mxu0  ;;  %v2264_v29 = vmul.f32 %v6681_v52, %v6681_v52  ;;  %v2324_v40 = vsel %vm1665_vm13, %v2263_v55, 0.0  ;;  %v2224_v57 = vsel %vm1665_vm13, %v6681_v52, 0.0  ;;  %v6703_v55 = vld [vmem:[#allocation2 + $0x2c] sm:$0x8] }
 0x26c   : > { %v2320_v37 = vsel %vm1665_vm13, %v2261_v60, 0.0  ;;  %v2220_v33 = vsel %vm1665_vm13, %v6683_v59, 0.0  ;;  %v2262_v17 = vmul.f32 %v6683_v59, %v6683_v59 }
 0x26d   : > { %v2321_v9 = vadd.f32 %v2320_v37, %v2319_v45  ;;  %v2221_v22 = vadd.f32 %v2220_v33, %v2219_v28  ;;  %v2326_v45 = vsel %vm1665_vm13, %v2264_v29, 0.0 }
 0x26e   : > { %v2322_v43 = vsel %vm1665_vm13, %v2262_v17, 0.0 }
 0x26f   : > { %v2223_v35 = vadd.f32 %v2222_v5, %v2221_v22  ;;  %v2323_v53 = vadd.f32 %v2322_v43, %v2321_v9  ;;  %v6701_v9 = vld [vmem:[#allocation2 + $0x18] sm:$0x8]  ;;  %v6705_v5 = vld [vmem:[#allocation2 + $0x40] sm:$0x8]  ;;  %v6707_v43 = vld [vmem:[#allocation2 + $0x54] sm:$0x8] }
 0x271   : > { %v2225_v21 = vadd.f32 %v2224_v57, %v2223_v35  ;;  %v2325_v6 = vadd.f32 %v2324_v40, %v2323_v53  ;;  %v6709_v35 = vld [vmem:[#allocation2 + $0x7c] sm:$0x8]  ;;  %v6711_v40 = vld [vmem:[#allocation2 + $0xa4] sm:$0x8]  ;;  %v6713_v57 = vld [vmem:[#allocation2 + $0x68] sm:$0x8] }
 0x273   : > { %v2226_v60 = vrot.slane %v2225_v21, 4  ;;  %v2327_v28 = vadd.f32 %v2326_v45, %v2325_v6  ;;  %v2735_v6 = vshrl.u32 %v6705_v5, 16  ;;  %v2757_v45 = vshrl.u32 %v6707_v43, 16 }
 0x275   : > { %v2227_v37 = vadd.f32 %v2226_v60, %v2225_v21  ;;  %v2328_v33 = vrot.slane %v2327_v28, 4  ;;  %v2801_v60 = vshrl.u32 %v6709_v35, 16  ;;  %v6794_v61 = vrot.slane %v2735_v6, 11 }
 0x276   : > { %v6796_v5 = vrot.slane %v2757_v45, 11  ;;  %v3116_v6 = vshll.u32 %v2611_v46, 16  ;;  %v6808_v45 = vld [vmem:[#allocation2 + $0x74] sm:$0x1] }
 0x277   : > { %v2228_v54 = vrot.slane %v2227_v37, 2  ;;  %v2329_v24 = vadd.f32 %v2328_v33, %v2327_v28  ;;  %v2779_v28 = vshrl.u32 %v6713_v57, 16  ;;  %v2636_v57 = vld [vmem:[#allocation2 + $0xcc] sm:$0x8]  ;;  %v6800_v23 = vrot.slane %v2801_v60, 11 }
 0x279   : > { %v2229_v19 = vadd.f32 %v2228_v54, %v2227_v37  ;;  %v2330_v48 = vrot.slane %v2329_v24, 2  ;;  %v2691_v54 = vshrl.u32 %v6701_v9, 16  ;;  %9074 = vst [vmem:[#allocation8_spill] sm:$0xff] %v6800_v23 }
 0x27b   : > { %v2230_v17 = vrot.slane %v2229_v19, 1  ;;  %v2331_v22 = vadd.f32 %v2330_v48, %v2329_v24  ;;  %v2713_v24 = vshrl.u32 %v6703_v55, 16  ;;  %v6790_v3 = vrot.slane %v2691_v54, 11 }
 0x27c   : > { %v2889_v55 = vshrl.u32 %v2636_v57, 16  ;;  %v6810_v57 = vld [vmem:[#allocation2 + $0x108] sm:$0x8] }
 0x27d   : > { %v2231_v29 = vadd.f32 %v2230_v17, %v2229_v19  ;;  %v2332_v53 = vrot.slane %v2331_v22, 1  ;;  %v2845_v19 = vshrl.u32 %v6711_v40, 16  ;;  %v2624_v40 = vld [vmem:[#allocation2 + $0x90] sm:$0x8]  ;;  %v6792_v43 = vrot.slane %v2713_v24, 11 }
 0x27e   : > { %v2823_v9 = vshrl.u32 %v2624_v40, 16  ;;  %v6804_v24 = vrot.slane %v2779_v28, 11  ;;  %v6812_v40 = vrot.slane %v2889_v55, 11 }
 0x27f   : > { %v6716_v21 = vmul.f32 0.00390625, %v2231_v29  ;;  %v2333_v48 = vadd.f32 %v2332_v53, %v2331_v22  ;;  %v2607_v53 = vld [vmem:[#allocation2 + $0x38] sm:$0x1]  ;;  %v2640_v29 = vld [vmem:[#allocation2 + $0xe0] sm:$0x8]  ;;  %v6802_v54 = vrot.slane %v2845_v19, 11 }
 0x280   : > { %v6798_v22 = vld [vmem:[#allocation2 + $0x11c] sm:$0x8]  ;;  %v3102_v17 = vshll.u32 %v2607_v53, 16  ;;  %v2911_v58 = vshrl.u32 %v2640_v29, 16  ;;  %9076 = vst [vmem:[#allocation10_spill] sm:$0xff] %v6812_v40  ;;  %v6817_v29 = vrot.slane %v2823_v9, 11 }
 0x281   : > { %v2334_v37 = vmul.f32 0.00390625, %v2333_v48  ;;  %v2335_v33 = vmul.f32 %v6716_v21, %v6716_v21  ;;  %9073 = vst [vmem:[#allocation7_spill] sm:$0xff] %v6798_v22  ;;  %9075 = vst [vmem:[#allocation9_spill] sm:$0xff] %v6802_v54  ;;  %v9083_v9 = vsub.f32 %v6683_v59, %v6716_v21  ;;  %v9086_v53 = vsub.f32 %v6415_v8, %v6716_v21 }
 0x282   : > { %v6821_v19 = vrot.slane %v3102_v17, 5  ;;  %v6825_v46 = vrot.slane %v2911_v58, 11  ;;  %v9084_v17 = vsub.f32 %v6418_v15, %v6716_v21  ;;  %v9085_v58 = vsub.f32 %v6429_v32, %v6716_v21 }
 0x283   : > { %v2336_v35 = vsub.f32 %v2334_v37, %v2335_v33  ;;  %v9087_v55 = vsub.f32 %v6425_v38, %v6716_v21  ;;  %v9088_v15 = vsub.f32 %v6462_v50, %v6716_v21  ;;  %v9089_v32 = vsub.f32 %v6470_v26, %v6716_v21 }
 0x284   : > { %9079 = vst [vmem:[#allocation13_spill] sm:$0xff] %v6821_v19  ;;  %9081 = vst [vmem:[#allocation15_spill] sm:$0xff] %v6825_v46  ;;  %v9090_v8 = vsub.f32 %v6460_v41, %v6716_v21  ;;  %v9091_v38 = vsub.f32 %v6468_v13, %v6716_v21  ;;  %v9092_v50 = vsub.f32 %v6490_v20, %v6716_v21 }
 0x285   : > { %v2337_v33 = vmax.f32 %v2336_v35, 0.0  ;;  %v2644_v35 = vld [vmem:[#allocation2 + $0xf4] sm:$0x8]  ;;  %v9093_v26 = vsub.f32 %v6498_v51, %v6716_v21  ;;  %v9094_v41 = vsub.f32 %v6488_v16, %v6716_v21  ;;  %v9095_v13 = vsub.f32 %v6496_v18, %v6716_v21 }
 0x286   : > { %v2933_v48 = vshrl.u32 %v2644_v35, 16  ;;  %v9096_v20 = vsub.f32 %v6518_v44, %v6716_v21  ;;  %v9097_v51 = vsub.f32 %v6526_v1, %v6716_v21  ;;  %v9098_v16 = vsub.f32 %v6516_v7, %v6716_v21 }
 0x287   : > { %v2370_v37 = vadd.f32 1e-05, %v2337_v33  ;;  %v2632_v33 = vld [vmem:[#allocation2 + $0xb8] sm:$0x8]  ;;  %v9099_v18 = vsub.f32 %v6524_v62, %v6716_v21  ;;  %v9100_v44 = vsub.f32 %v6546_v10, %v6716_v21  ;;  %v9101_v1 = vsub.f32 %v6554_v2, %v6716_v21 }
 0x288   : > { %v2867_v0 = vshrl.u32 %v2632_v33, 16  ;;  %v6814_v35 = vrot.slane %v2933_v48, 11  ;;  %v9102_v7 = vsub.f32 %v6544_v39, %v6716_v21  ;;  %v9103_v62 = vsub.f32 %v6552_v4, %v6716_v21 }
 0x289   : > { %5141 = vrsqrt.f32 %v2370_v37  ;;  %v2603_v37 = vld [vmem:[#allocation2 + $0x24] sm:$0x1]  ;;  %v9104_v10 = vsub.f32 %v6614_v14, %v6716_v21  ;;  %v9105_v2 = vsub.f32 %v6628_v36, %v6716_v21  ;;  %v9106_v39 = vsub.f32 %v6612_v47, %v6716_v21 }
 0x28a   : > { %v3088_v30 = vshll.u32 %v2603_v37, 16  ;;  %9077 = vst [vmem:[#allocation11_spill] sm:$0xff] %v6814_v35  ;;  %v6823_v28 = vrot.slane %v2867_v0, 11  ;;  %v6827_v37 = vrot.slane %v3116_v6, 5  ;;  %v9107_v4 = vsub.f32 %v6622_v31, %v6716_v21 }
 0x28b   : > { %v9108_v14 = vsub.f32 %v6647_v42, %v6716_v21  ;;  %v9109_v36 = vsub.f32 %v6655_v27, %v6716_v21  ;;  %v9110_v47 = vsub.f32 %v6645_v34, %v6716_v21  ;;  %v9111_v31 = vsub.f32 %v6653_v49, %v6716_v21 }
 0x28c   : > { %v6819_v60 = vrot.slane %v3088_v30, 5  ;;  %9080 = vst [vmem:[#allocation14_spill] sm:$0xff] %v6823_v28  ;;  %9082 = vst [vmem:[#allocation16_spill] sm:$0xff] %v6827_v37  ;;  %v9112_v42 = vsub.f32 %v6675_v25, %v6716_v21  ;;  %v9113_v27 = vsub.f32 %v6673_v12, %v6716_v21  ;;  %v9114_v34 = vsub.f32 %v6681_v52, %v6716_v21 }
 0x28e   : > { %9078 = vst [vmem:[#allocation12_spill] sm:$0xff] %v6819_v60 }
 0x293   : > { %v5142_v33 = vpop.eup %5141 }
 0x294   : > { %v2401_v30 = vmul.f32 %v5142_v33, %v9083_v9  ;;  %v6838_v0 = vmul.f32 %v5142_v33, %v9084_v17  ;;  %v6843_v6 = vmul.f32 %v5142_v33, %v9085_v58  ;;  %v6848_v48 = vmul.f32 %v5142_v33, %v9086_v53 }
 0x295   : > { %v6853_v59 = vmul.f32 %v5142_v33, %v9087_v55  ;;  %v6858_v9 = vmul.f32 %v5142_v33, %v9088_v15  ;;  %v6863_v17 = vmul.f32 %v5142_v33, %v9089_v32  ;;  %v6868_v53 = vmul.f32 %v5142_v33, %v9090_v8 }
 0x296   : > { %v2433_v58 = vmax.f32 %v2401_v30, 0.0  ;;  %v6873_v55 = vmul.f32 %v5142_v33, %v9091_v38  ;;  %v6878_v15 = vmul.f32 %v5142_v33, %v9092_v50  ;;  %v6883_v32 = vmul.f32 %v5142_v33, %v9093_v26 }
 0x297   : > { %v6888_v8 = vmul.f32 %v5142_v33, %v9094_v41  ;;  %v6893_v30 = vmul.f32 %v5142_v33, %v9095_v13  ;;  %v6898_v38 = vmul.f32 %v5142_v33, %v9096_v20  ;;  %v6903_v50 = vmul.f32 %v5142_v33, %v9097_v51 }
 0x298   : > { %v4970_v26 = vpack.c.bf16 %v2433_v58, %v2433_v58  ;;  %v6908_v41 = vmul.f32 %v5142_v33, %v9098_v16  ;;  %v6913_v13 = vmul.f32 %v5142_v33, %v9099_v18  ;;  %v6918_v20 = vmul.f32 %v5142_v33, %v9100_v44 }
 0x299   : > { %v6923_v51 = vmul.f32 %v5142_v33, %v9101_v1  ;;  %v6928_v58 = vmul.f32 %v5142_v33, %v9102_v7  ;;  %v6933_v16 = vmul.f32 %v5142_v33, %v9103_v62  ;;  %v6938_v18 = vmul.f32 %v5142_v33, %v9104_v10 }
 0x29a   : > { %2593 = vst.msk [vmem:[#allocation2 + $0x138] sm:$0xf] %vm179_vm0, %v4970_v26  ;;  %v6944_v44 = vmul.f32 %v5142_v33, %v9105_v2  ;;  %v6949_v1 = vmul.f32 %v5142_v33, %v9106_v39  ;;  %v6954_v7 = vmul.f32 %v5142_v33, %v9107_v4  ;;  %v6959_v62 = vmul.f32 %v5142_v33, %v9108_v14 }
 0x29b   : > { %v6964_v26 = vmul.f32 %v5142_v33, %v9109_v36  ;;  %v6969_v10 = vmul.f32 %v5142_v33, %v9110_v47  ;;  %v6974_v2 = vmul.f32 %v5142_v33, %v9111_v31  ;;  %v6979_v39 = vmul.f32 %v5142_v33, %v9112_v42 }
 0x29c   : > { %v6984_v4 = vmul.f32 %v5142_v33, %v9113_v27  ;;  %v6989_v14 = vmul.f32 %v5142_v33, %v9114_v34  ;;  %v2404_v36 = vmax.f32 %v6838_v0, 0.0  ;;  %v2405_v49 = vmax.f32 %v6843_v6, 0.0 }
 0x29d   : > { %v2406_v47 = vmax.f32 %v6848_v48, 0.0  ;;  %v2407_v25 = vmax.f32 %v6853_v59, 0.0  ;;  %v2408_v31 = vmax.f32 %v6858_v9, 0.0  ;;  %v2409_v42 = vmax.f32 %v6863_v17, 0.0 }
 0x29e   : > { %v2410_v12 = vmax.f32 %v6868_v53, 0.0  ;;  %v2411_v27 = vmax.f32 %v6873_v55, 0.0  ;;  %v2412_v52 = vmax.f32 %v6878_v15, 0.0  ;;  %v2413_v21 = vmax.f32 %v6883_v32, 0.0 }
 0x29f   : > { %v2414_v33 = vmax.f32 %v6888_v8, 0.0  ;;  %v2415_v0 = vmax.f32 %v6893_v30, 0.0  ;;  %v2416_v48 = vmax.f32 %v6898_v38, 0.0  ;;  %v2417_v6 = vmax.f32 %v6903_v50, 0.0 }
 0x2a0   : > { %v2418_v59 = vmax.f32 %v6908_v41, 0.0  ;;  %v2419_v9 = vmax.f32 %v6913_v13, 0.0  ;;  %v2420_v17 = vmax.f32 %v6918_v20, 0.0  ;;  %v2421_v53 = vmax.f32 %v6923_v51, 0.0 }
 0x2a1   : > { %v2422_v55 = vmax.f32 %v6928_v58, 0.0  ;;  %v2423_v15 = vmax.f32 %v6933_v16, 0.0  ;;  %v2424_v32 = vmax.f32 %v6938_v18, 0.0  ;;  %v2425_v8 = vmax.f32 %v6944_v44, 0.0 }
 0x2a2   : > { %v2426_v30 = vmax.f32 %v6949_v1, 0.0  ;;  %v2427_v38 = vmax.f32 %v6954_v7, 0.0  ;;  %v2428_v50 = vmax.f32 %v6959_v62, 0.0  ;;  %v2429_v41 = vmax.f32 %v6964_v26, 0.0 }
 0x2a3   : > { %v2430_v13 = vmax.f32 %v6969_v10, 0.0  ;;  %v2431_v20 = vmax.f32 %v6974_v2, 0.0  ;;  %v2432_v51 = vmax.f32 %v6979_v39, 0.0  ;;  %v2434_v58 = vmax.f32 %v6984_v4, 0.0 }
 0x2a4   : > { %v2435_v16 = vmax.f32 %v6989_v14, 0.0  ;;  %v4941_v18 = vpack.c.bf16 %v2404_v36, %v2404_v36  ;;  %v4942_v44 = vpack.c.bf16 %v2405_v49, %v2405_v49  ;;  %v4943_v34 = vpack.c.bf16 %v2406_v47, %v2406_v47 }
 0x2a5   : > { %v4944_v1 = vpack.c.bf16 %v2407_v25, %v2407_v25  ;;  %v4945_v35 = vpack.c.bf16 %v2408_v31, %v2408_v31  ;;  %v4946_v7 = vpack.c.bf16 %v2409_v42, %v2409_v42  ;;  %v4947_v22 = vpack.c.bf16 %v2410_v12, %v2410_v12  ;;  %v2656_v12 = vld [vmem:[#allocation2 + $0x130] sm:$0x8] }
 0x2a6   : > { %v4948_v62 = vpack.c.bf16 %v2411_v27, %v2411_v27  ;;  %v4949_v40 = vpack.c.bf16 %v2412_v52, %v2412_v52  ;;  %v4950_v26 = vpack.c.bf16 %v2413_v21, %v2413_v21  ;;  %v4951_v54 = vpack.c.bf16 %v2414_v33, %v2414_v33  ;;  %2564 = vst.msk [vmem:[#allocation2 + $0x1c] sm:$0xf] %vm179_vm0, %v4941_v18  ;;  %v2631_v27 = vld [vmem:[#allocation2 + $0xb0] sm:$0x1]  ;;  %v2659_v18 = vld [vmem:[#allocation2 + $0x13c] sm:$0x1] }
 0x2a7   : > { %2565 = vst.msk [vmem:[#allocation2 + $0x20] sm:$0xf] %vm179_vm0, %v4942_v44  ;;  %2566 = vst.msk [vmem:[#allocation2 + $0x30] sm:$0xf] %vm179_vm0, %v4943_v34  ;;  %v4952_v10 = vpack.c.bf16 %v2415_v0, %v2415_v0  ;;  %v4953_v2 = vpack.c.bf16 %v2416_v48, %v2416_v48  ;;  %v4954_v39 = vpack.c.bf16 %v2417_v6, %v2417_v6  ;;  %v2663_v44 = vld [vmem:[#allocation2 + $0x150] sm:$0x1] }
 0x2a8   : > { %v4955_v4 = vpack.c.bf16 %v2418_v59, %v2418_v59  ;;  %2567 = vst.msk [vmem:[#allocation2 + $0x34] sm:$0xf] %vm179_vm0, %v4944_v1  ;;  %2568 = vst.msk [vmem:[#allocation2 + $0x44] sm:$0xf] %vm179_vm0, %v4945_v35  ;;  %v4956_v14 = vpack.c.bf16 %v2419_v9, %v2419_v9  ;;  %v4957_v36 = vpack.c.bf16 %v2420_v17, %v2420_v17  ;;  %v9115_v59 = vshrl.u32 %v6810_v57, 16 }
 0x2a9   : > { %2569 = vst.msk [vmem:[#allocation2 + $0x48] sm:$0xf] %vm179_vm0, %v4946_v7  ;;  %2570 = vst.msk [vmem:[#allocation2 + $0x58] sm:$0xf] %vm179_vm0, %v4947_v22  ;;  %v4958_v49 = vpack.c.bf16 %v2421_v53, %v2421_v53  ;;  %v4959_v47 = vpack.c.bf16 %v2422_v55, %v2422_v55  ;;  %v4960_v25 = vpack.c.bf16 %v2423_v15, %v2423_v15  ;;  %v2627_v22 = vld [vmem:[#allocation2 + $0x9c] sm:$0x1] }
 0x2aa   : > { %2571 = vst.msk [vmem:[#allocation2 + $0x5c] sm:$0xf] %vm179_vm0, %v4948_v62  ;;  %2572 = vst.msk [vmem:[#allocation2 + $0x6c] sm:$0xf] %vm179_vm0, %v4949_v40  ;;  %v4961_v31 = vpack.c.bf16 %v2424_v32, %v2424_v32  ;;  %v4962_v42 = vpack.c.bf16 %v2425_v8, %v2425_v8  ;;  %v4963_v35 = vpack.c.bf16 %v2426_v30, %v2426_v30  ;;  %v7051_v9 = vrot.slane %v9115_v59, 11 }
 0x2ab   : > { %2573 = vst.msk [vmem:[#allocation2 + $0x70] sm:$0xf] %vm179_vm0, %v4950_v26  ;;  %2574 = vst.msk [vmem:[#allocation2 + $0x80] sm:$0xf] %vm179_vm0, %v4951_v54  ;;  %v4964_v40 = vpack.c.bf16 %v2427_v38, %v2427_v38  ;;  %v4965_v52 = vpack.c.bf16 %v2428_v50, %v2428_v50  ;;  %v4966_v21 = vpack.c.bf16 %v2429_v41, %v2429_v41  ;;  %v3172_v17 = vshll.u32 %v2627_v22, 16 }
 0x2ac   : > { %2575 = vst.msk [vmem:[#allocation2 + $0x84] sm:$0xf] %vm179_vm0, %v4952_v10  ;;  %2576 = vst.msk [vmem:[#allocation2 + $0x94] sm:$0xf] %vm179_vm0, %v4953_v2  ;;  %v4967_v33 = vpack.c.bf16 %v2430_v13, %v2430_v13  ;;  %v4968_v54 = vpack.c.bf16 %v2431_v20, %v2431_v20  ;;  %v4969_v0 = vpack.c.bf16 %v2432_v51, %v2432_v51  ;;  %v2999_v53 = vshrl.u32 %v2656_v12, 16 }
 0x2ad   : > { %2577 = vst.msk [vmem:[#allocation2 + $0x98] sm:$0xf] %vm179_vm0, %v4954_v39  ;;  %2578 = vst.msk [vmem:[#allocation2 + $0xa8] sm:$0xf] %vm179_vm0, %v4955_v4  ;;  %v4971_v48 = vpack.c.bf16 %v2434_v58, %v2434_v58  ;;  %v4972_v6 = vpack.c.bf16 %v2435_v16, %v2435_v16  ;;  %v3186_v55 = vshll.u32 %v2631_v27, 16  ;;  %v9117_v34 = vshll.u32 %v6806_v11, 16 }
 0x2ae   : > { %2579 = vst.msk [vmem:[#allocation2 + $0xac] sm:$0xf] %vm179_vm0, %v4956_v14  ;;  %2580 = vst.msk [vmem:[#allocation2 + $0xbc] sm:$0xf] %vm179_vm0, %v4957_v36  ;;  %v2635_v15 = vld [vmem:[#allocation2 + $0xc4] sm:$0x1] }
 0x2af   : > { %2581 = vst.msk [vmem:[#allocation2 + $0xc0] sm:$0xf] %vm179_vm0, %v4958_v49  ;;  %2582 = vst.msk [vmem:[#allocation2 + $0xd0] sm:$0xf] %vm179_vm0, %v4959_v47  ;;  %v7053_v32 = vld [vmem:[#allocation2 + $0x1c] sm:$0xf] }
 0x2b0   : > { %2583 = vst.msk [vmem:[#allocation2 + $0xd4] sm:$0xf] %vm179_vm0, %v4960_v25  ;;  %2584 = vst.msk [vmem:[#allocation2 + $0xe4] sm:$0xf] %vm179_vm0, %v4961_v31  ;;  %v7055_v8 = vld [vmem:[#allocation2 + $0x20] sm:$0xf] }
 0x2b1   : > { %2585 = vst.msk [vmem:[#allocation2 + $0xe8] sm:$0xf] %vm179_vm0, %v4962_v42  ;;  %2586 = vst.msk [vmem:[#allocation2 + $0xf8] sm:$0xf] %vm179_vm0, %v4963_v35  ;;  %v2639_v30 = vld [vmem:[#allocation2 + $0xd8] sm:$0x1]  ;;  %v4852_v57 = vcombine.low %v7053_v32, %v7055_v8 }
 0x2b2   : > { %2587 = vst.msk [vmem:[#allocation2 + $0xfc] sm:$0xf] %vm179_vm0, %v4964_v40  ;;  %2588 = vst.msk [vmem:[#allocation2 + $0x10c] sm:$0xf] %vm179_vm0, %v4965_v52  ;;  %v2643_v38 = vld [vmem:[#allocation2 + $0xec] sm:$0x1] }
 0x2b3   : > { %2589 = vst.msk [vmem:[#allocation2 + $0x110] sm:$0xf] %vm179_vm0, %v4966_v21  ;;  %2590 = vst.msk [vmem:[#allocation2 + $0x120] sm:$0xf] %vm179_vm0, %v4967_v33  ;;  %v2647_v50 = vld [vmem:[#allocation2 + $0x100] sm:$0x1]  ;;  %3551 = vrot.lane.b32.xlu0 %v4852_v57, %s5189_s20  ;;  %3516 = vrot.lane.b32.xlu1 %v4852_v57, %s5188_s19 }
 0x2b4   : > { %9116 = vst [vmem:[#allocation17_spill] sm:$0xff] %v7051_v9  ;;  %2591 = vst.msk [vmem:[#allocation2 + $0x124] sm:$0xf] %vm179_vm0, %v4968_v54  ;;  %v2651_v41 = vld [vmem:[#allocation2 + $0x114] sm:$0x1]  ;;  %v3200_v58 = vshll.u32 %v2635_v15, 16 }
 0x2b5   : > { %2592 = vst.msk [vmem:[#allocation2 + $0x134] sm:$0xf] %vm179_vm0, %v4969_v0  ;;  %2594 = vst.msk [vmem:[#allocation2 + $0x148] sm:$0xf] %vm179_vm0, %v4971_v48  ;;  %v7063_v13 = vld [vmem:[#allocation2 + $0x30] sm:$0xf] }
 0x2b6   : > { %2595 = vst.msk [vmem:[#allocation2 + $0x14c] sm:$0xf] %vm179_vm0, %v4972_v6  ;;  %v7065_v20 = vld [vmem:[#allocation2 + $0x34] sm:$0xf]  ;;  %v2655_v51 = vld [vmem:[#allocation2 + $0x128] sm:$0x1] }
 0x2b7   : > { %v3214_v16 = vshll.u32 %v2639_v30, 16  ;;  %v7071_v1 = vrot.slane %v9117_v34, 5  ;;  %v9119_v7 = vshll.u32 %v6808_v45, 16  ;;  %v3228_v26 = vshll.u32 %v2643_v38, 16  ;;  %v7081_v36 = vld [vmem:[#allocation2 + $0x44] sm:$0xf] }
 0x2b8   : > { %v3242_v10 = vshll.u32 %v2647_v50, 16  ;;  %v4853_v2 = vcombine.low %v7063_v13, %v7065_v20  ;;  %v7079_v39 = vrot.slane %v2999_v53, 11  ;;  %v3256_v4 = vshll.u32 %v2651_v41, 16  ;;  %v7083_v49 = vld [vmem:[#allocation2 + $0x48] sm:$0xf] }
 0x2b9   : > { %9118 = vst [vmem:[#allocation18_spill] sm:$0xff] %v7071_v1  ;;  %v7075_v62 = vrot.slane %v9119_v7, 5  ;;  %v3270_v14 = vshll.u32 %v2655_v51, 16  ;;  %v3284_v11 = vshll.u32 %v2659_v18, 16  ;;  %v3298_v47 = vshll.u32 %v2663_v44, 16 }
 0x2ba   : > { %9121 = vst [vmem:[#allocation20_spill] sm:$0xff] %v7079_v39  ;;  %3588 = vrot.lane.b32.xlu0 %v4853_v2, %s5190_s21  ;;  %3553 = vrot.lane.b32.xlu1 %v4853_v2, %s5189_s20  ;;  %v7087_v45 = vrot.slane %v3172_v17, 5  ;;  %v7089_v25 = vrot.slane %v3186_v55, 5  ;;  %v7091_v31 = vrot.slane %v3200_v58, 5  ;;  %v7093_v42 = vrot.slane %v3214_v16, 5 }
 0x2bb   : > { %9120 = vst [vmem:[#allocation19_spill] sm:$0xff] %v7075_v62  ;;  %v2705_v35 = vshrl.u32 %v7055_v8, 16  ;;  %v2696_v22 = vshrl.u32 %v7053_v32, 16  ;;  %v7097_v12 = vld [vmem:[#allocation2 + $0x138] sm:$0xf]  ;;  %v7099_v27 = vrot.slane %v3228_v26, 5  ;;  %v4854_v21 = vcombine.low %v7081_v36, %v7083_v49 }
 0x2bc   : > { %9122 = vst [vmem:[#allocation21_spill] sm:$0xff] %v7087_v45  ;;  %9123 = vst [vmem:[#allocation22_spill] sm:$0xff] %v7089_v25  ;;  %v7101_v40 = vrot.slane %v3242_v10, 5  ;;  %v9033_v52 = vshll.u32 %v7053_v32, 16  ;;  %v7106_v33 = vrot.slane %v3256_v4, 5  ;;  %v7108_v54 = vrot.slane %v3270_v14, 5 }
 0x2bd   : > { %9124 = vst [vmem:[#allocation23_spill] sm:$0xff] %v7091_v31  ;;  %9125 = vst [vmem:[#allocation24_spill] sm:$0xff] %v7093_v42  ;;  %v2718_v0 = vshrl.u32 %v7063_v13, 16  ;;  %v2727_v48 = vshrl.u32 %v7065_v20, 16  ;;  %v7112_v6 = vrot.slane %v3284_v11, 5  ;;  %v7114_v59 = vrot.slane %v3298_v47, 5 }
 0x2be   : > { %9126 = vst [vmem:[#allocation25_spill] sm:$0xff] %v7099_v27  ;;  %9127 = vst [vmem:[#allocation26_spill] sm:$0xff] %v7101_v40  ;;  %v9032_v53 = vshll.u32 %v7063_v13, 16  ;;  %3518 = vrot.lane.b32.xlu0 %v4853_v2, %s5188_s19  ;;  %3590 = vrot.lane.b32.xlu1 %v4854_v21, %s5190_s21  ;;  %v7122_v30 = vrot.slane %v2705_v35, 7  ;;  %v7124_v57 = vrot.slane %v2705_v35, 4  ;;  %v7126_v38 = vrot.slane %v2696_v22, 7 }
 0x2bf   : > { %9128 = vst [vmem:[#allocation27_spill] sm:$0xff] %v7106_v33  ;;  %9129 = vst [vmem:[#allocation28_spill] sm:$0xff] %v7108_v54  ;;  %v7128_v50 = vrot.slane %v2696_v22, 4  ;;  %v7132_v41 = vrot.slane %v9033_v52, 5  ;;  %v2740_v51 = vshrl.u32 %v7081_v36, 16  ;;  %v7139_v18 = vrot.slane %v2718_v0, 7 }
 0x2c0   : > { %9130 = vst [vmem:[#allocation29_spill] sm:$0xff] %v7112_v6  ;;  %9131 = vst [vmem:[#allocation30_spill] sm:$0xff] %v7114_v59  ;;  %v7135_v58 = vld [vmem:[#allocation2 + $0x58] sm:$0xf]  ;;  %v7137_v16 = vld [vmem:[#allocation2 + $0x5c] sm:$0xf] }
 0x2c1   : > { %v7141_v44 = vrot.slane %v2727_v48, 7  ;;  %v2749_v7 = vshrl.u32 %v7083_v49, 16  ;;  %v7145_v26 = vrot.slane %v2718_v0, 4  ;;  %v7149_v10 = vrot.slane %v9032_v53, 5  ;;  %v7158_v47 = vld [vmem:[#allocation2 + $0x6c] sm:$0xf] }
 0x2c2   : > { %v7151_v2 = vrot.slane %v2727_v48, 4  ;;  %v9034_v4 = vshll.u32 %v7081_v36, 16  ;;  %3555 = vrot.lane.b32.xlu0 %v4854_v21, %s5189_s20  ;;  %3520 = vrot.lane.b32.xlu1 %v4854_v21, %s5188_s19  ;;  %v2762_v14 = vshrl.u32 %v7135_v58, 16  ;;  %v2771_v11 = vshrl.u32 %v7137_v16, 16  ;;  %v7160_v35 = vld [vmem:[#allocation2 + $0x70] sm:$0xf] }
 0x2c3   : > { %v7162_v22 = vrot.slane %v2740_v51, 7  ;;  %v4855_v15 = vcombine.low %v7135_v58, %v7137_v16  ;;  %v7168_v55 = vrot.slane %v2749_v7, 7  ;;  %v7170_v21 = vrot.slane %v2740_v51, 4  ;;  %v7172_v34 = vld [vmem:[#allocation2 + $0x80] sm:$0xf] }
 0x2c4   : > { %9133 = vst [vmem:[#allocation32_spill] sm:$0xff] %v7172_v34  ;;  %v7174_v53 = vld [vmem:[#allocation2 + $0x84] sm:$0xf]  ;;  %v7178_v17 = vrot.slane %v9034_v4, 5  ;;  %v7180_v52 = vrot.slane %v2749_v7, 4  ;;  %v2784_v0 = vshrl.u32 %v7158_v47, 16  ;;  %v4856_v7 = vcombine.low %v7158_v47, %v7160_v35 }
 0x2c5   : > { %9132 = vst [vmem:[#allocation31_spill] sm:$0xff] %v7170_v21  ;;  %9134 = vst [vmem:[#allocation33_spill] sm:$0xff] %v7174_v53  ;;  %v2793_v48 = vshrl.u32 %v7160_v35, 16  ;;  %v7186_v51 = vrot.slane %v2762_v14, 7  ;;  %v7188_v59 = vrot.slane %v2771_v11, 7  ;;  %v7200_v42 = vrot.slane %v2762_v14, 4 }
 0x2c6   : > { %9135 = vst [vmem:[#allocation34_spill] sm:$0xff] %v7178_v17  ;;  %9136 = vst [vmem:[#allocation35_spill] sm:$0xff] %v7180_v52  ;;  %3592 = vrot.lane.b32.xlu0 %v4855_v15, %s5190_s21  ;;  %3557 = vrot.lane.b32.xlu1 %v4855_v15, %s5189_s20  ;;  %v7196_v40 = vld [vmem:[#allocation2 + $0x94] sm:$0xf]  ;;  %v7198_v27 = vld [vmem:[#allocation2 + $0x98] sm:$0xf] }
 0x2c7   : > { %9137 = vst [vmem:[#allocation36_spill] sm:$0xff] %v7200_v42  ;;  %v9138_v31 = vshll.u32 %v7135_v58, 16  ;;  %v7206_v6 = vrot.slane %v2771_v11, 4  ;;  %v7209_v45 = vld [vmem:[#allocation2 + $0xa8] sm:$0xf]  ;;  %v7212_v4 = vrot.slane %v2784_v0, 7 }
 0x2c8   : > { %9141 = vst [vmem:[#allocation39_spill] sm:$0xff] %v7209_v45  ;;  %v7214_v33 = vrot.slane %v2793_v48, 7  ;;  %v7216_v39 = vrot.slane %v2784_v0, 4  ;;  %v9144_v11 = vshll.u32 %v7158_v47, 16  ;;  %v2828_v54 = vshrl.u32 %v7196_v40, 16 }
 0x2c9   : > { %v7204_v25 = vrot.slane %v9138_v31, 5  ;;  %9140 = vst [vmem:[#allocation38_spill] sm:$0xff] %v7206_v6  ;;  %v7220_v31 = vld [vmem:[#allocation2 + $0xac] sm:$0xf]  ;;  %v2837_v1 = vshrl.u32 %v7198_v27, 16  ;;  %v7229_v9 = vrot.slane %v2793_v48, 4  ;;  %v4857_v48 = vcombine.low %v7172_v34, %v7174_v53 }
 0x2ca   : > { %3522 = vrot.lane.b32.xlu0 %v4855_v15, %s5188_s19  ;;  %9142 = vst [vmem:[#allocation40_spill] sm:$0xff] %v7216_v39  ;;  %3594 = vrot.lane.b32.xlu1 %v4856_v7, %s5190_s21  ;;  %9143 = vst [vmem:[#allocation41_spill] sm:$0xff] %v7220_v31  ;;  %v7224_v62 = vrot.slane %v9144_v11, 5  ;;  %v9147_v0 = vshrl.u32 %v7172_v34, 16  ;;  %v9148_v14 = vshrl.u32 %v7174_v53, 16  ;;  %v2850_v11 = vshrl.u32 %v7209_v45, 16 }
 0x2cb   : > { %9139 = vst [vmem:[#allocation37_spill] sm:$0xff] %v7204_v25  ;;  %9146 = vst [vmem:[#allocation43_spill] sm:$0xff] %v7229_v9  ;;  %v7242_v25 = vld [vmem:[#allocation2 + $0xbc] sm:$0xf]  ;;  %v7244_v15 = vld [vmem:[#allocation2 + $0xc0] sm:$0xf] }
 0x2cc   : > { %9145 = vst [vmem:[#allocation42_spill] sm:$0xff] %v7224_v62  ;;  %v7233_v37 = vrot.slane %v9147_v0, 7  ;;  %v7237_v6 = vrot.slane %v9148_v14, 7  ;;  %v2859_v62 = vshrl.u32 %v7220_v31, 16  ;;  %9150 = vst [vmem:[#allocation45_spill] sm:$0xff] %v7244_v15  ;;  %v4858_v0 = vcombine.low %v7196_v40, %v7198_v27 }
 0x2cd   : > { %v7254_v9 = vld [vmem:[#allocation2 + $0xd0] sm:$0xf]  ;;  %v7256_v42 = vld [vmem:[#allocation2 + $0xd4] sm:$0xf]  ;;  %v7258_v46 = vrot.slane %v2828_v54, 7  ;;  %v7260_v52 = vrot.slane %v2837_v1, 7  ;;  %v7298_v23 = vcombine.low %v7242_v25, %v7244_v15 }
 0x2ce   : > { %9149 = vst [vmem:[#allocation44_spill] sm:$0xff] %v7237_v6  ;;  %3559 = vrot.lane.b32.xlu0 %v4856_v7, %s5189_s20  ;;  %3524 = vrot.lane.b32.xlu1 %v4856_v7, %s5188_s19  ;;  %9151 = vst [vmem:[#allocation46_spill] sm:$0xff] %v7254_v9  ;;  %v7262_v19 = vrot.slane %v2828_v54, 4  ;;  %v9154_v7 = vshll.u32 %v7196_v40, 16  ;;  %v7268_v14 = vrot.slane %v2837_v1, 4  ;;  %v2872_v21 = vshrl.u32 %v7242_v25, 16 }
 0x2cf   : > { %9152 = vst [vmem:[#allocation47_spill] sm:$0xff] %v7256_v42  ;;  %v2881_v28 = vshrl.u32 %v7244_v15, 16  ;;  %v7273_v60 = vrot.slane %v2850_v11, 7  ;;  %v7275_v53 = vrot.slane %v2859_v62, 7  ;;  %v2894_v6 = vshrl.u32 %v7254_v9, 16 }
 0x2d0   : > { %9153 = vst [vmem:[#allocation48_spill] sm:$0xff] %v7262_v19  ;;  %v7266_v17 = vrot.slane %v9154_v7, 5  ;;  %9156 = vst [vmem:[#allocation50_spill] sm:$0xff] %v7268_v14  ;;  %v2903_v54 = vshrl.u32 %v7256_v42, 16  ;;  %v7282_v7 = vrot.slane %v2850_v11, 4  ;;  %v9160_v39 = vshll.u32 %v7209_v45, 16 }
 0x2d1   : > { %9157 = vst [vmem:[#allocation51_spill] sm:$0xff] %v7273_v60  ;;  %9158 = vst [vmem:[#allocation52_spill] sm:$0xff] %v7275_v53  ;;  %v7289_v19 = vrot.slane %v2859_v62, 4  ;;  %v7293_v53 = vcombine.low %v7209_v45, %v7220_v31  ;;  %v7300_v11 = vld [vmem:[#allocation2 + $0xe4] sm:$0xf]  ;;  %v7302_v1 = vrot.slane %v2872_v21, 7 }
 0x2d2   : > { %9155 = vst [vmem:[#allocation49_spill] sm:$0xff] %v7266_v17  ;;  %3596 = vrot.lane.b32.xlu0 %v4857_v48, %s5190_s21  ;;  %3561 = vrot.lane.b32.xlu1 %v4857_v48, %s5189_s20  ;;  %9159 = vst [vmem:[#allocation53_spill] sm:$0xff] %v7282_v7  ;;  %v7286_v14 = vrot.slane %v9160_v39, 5  ;;  %v7304_v39 = vrot.slane %v2881_v28, 7  ;;  %v9164_v62 = vshll.u32 %v7242_v25, 16  ;;  %v7314_v7 = vrot.slane %v2881_v28, 4 }
 0x2d3   : > { %9162 = vst [vmem:[#allocation55_spill] sm:$0xff] %v7289_v19  ;;  %v7312_v19 = vld [vmem:[#allocation2 + $0xe8] sm:$0xf]  ;;  %v7316_v60 = vrot.slane %v2894_v6, 7  ;;  %v7318_v31 = vrot.slane %v2903_v54, 7  ;;  %v7331_v28 = vrot.slane %v2903_v54, 4 }
 0x2d4   : > { %9161 = vst [vmem:[#allocation54_spill] sm:$0xff] %v7286_v14  ;;  %v7306_v14 = vrot.slane %v2872_v21, 4  ;;  %v7310_v17 = vrot.slane %v9164_v62, 5  ;;  %9166 = vst [vmem:[#allocation58_spill] sm:$0xff] %v7312_v19  ;;  %v7321_v15 = vld [vmem:[#allocation2 + $0xf8] sm:$0xf] }
 0x2d5   : > { %9167 = vst [vmem:[#allocation59_spill] sm:$0xff] %v7314_v7  ;;  %9168 = vst [vmem:[#allocation60_spill] sm:$0xff] %v7316_v60  ;;  %v7325_v21 = vrot.slane %v2894_v6, 4  ;;  %v9171_v62 = vshll.u32 %v7254_v9, 16  ;;  %v7335_v60 = vcombine.low %v7254_v9, %v7256_v42  ;;  %v2916_v45 = vshrl.u32 %v7300_v11, 16 }
 0x2d6   : > { %9163 = vst [vmem:[#allocation56_spill] sm:$0xff] %v7306_v14  ;;  %9165 = vst [vmem:[#allocation57_spill] sm:$0xff] %v7310_v17  ;;  %3526 = vrot.lane.b32.xlu0 %v4857_v48, %s5188_s19  ;;  %3598 = vrot.lane.b32.xlu1 %v4858_v0, %s5190_s21  ;;  %v2925_v7 = vshrl.u32 %v7312_v19, 16  ;;  %v9174_v54 = vshll.u32 %v7053_v32, 16  ;;  %v2703_v9 = vrot.slane %v7126_v38, 4  ;;  %v9175_v42 = vshll.u32 %v7055_v8, 16 }
 0x2d7   : > { %9169 = vst [vmem:[#allocation61_spill] sm:$0xff] %v7318_v31  ;;  %9170 = vst [vmem:[#allocation62_spill] sm:$0xff] %v7325_v21  ;;  %v7329_v17 = vrot.slane %v9171_v62, 5  ;;  %v7337_v31 = vld [vmem:[#allocation2 + $0xfc] sm:$0xf]  ;;  %v7345_v62 = vcombine.low %v7300_v11, %v7312_v19  ;;  %v2938_v48 = vshrl.u32 %v7321_v15, 16 }
 0x2d8   : > { %9173 = vst [vmem:[#allocation64_spill] sm:$0xff] %v7331_v28  ;;  %v2701_v28 = vor.u32 %v9174_v54, %v7126_v38  ;;  %v2947_v6 = vshrl.u32 %v7337_v31, 16  ;;  %v9176_v14 = vshll.u32 %v7063_v13, 16  ;;  %v9177_v38 = vshll.u32 %v7065_v20, 16 }
 0x2d9   : > { %9172 = vst [vmem:[#allocation63_spill] sm:$0xff] %v7329_v17  ;;  %v2710_v17 = vor.u32 %v9175_v42, %v7122_v30  ;;  %v2725_v30 = vrot.slane %v7139_v18, 4 }
 0x2da   : > { %v2723_v19 = vor.u32 %v9176_v14, %v7139_v18  ;;  %3563 = vrot.lane.b32.xlu0 %v4858_v0, %s5189_s20  ;;  %3528 = vrot.lane.b32.xlu1 %v4858_v0, %s5188_s19  ;;  %v2702_v32 = vsel %vm5287_vm10, %v6790_v3, %v2701_v28  ;;  %v2732_v54 = vor.u32 %v9177_v38, %v7141_v44  ;;  %v9178_v14 = vshll.u32 %v7081_v36, 16 }
 0x2db   : > { %v2711_v42 = vsel %vm5287_vm10, %v2703_v9, %v2710_v17  ;;  %v2747_v3 = vrot.slane %v7162_v22, 4  ;;  %v9179_v17 = vshll.u32 %v7083_v49, 16  ;;  %v9180_v44 = vshll.u32 %v7135_v58, 16 }
 0x2dc   : > { %v7371_v21 = vcombine.low %v2702_v32, %v2711_v42  ;;  %v2724_v13 = vsel %vm5287_vm10, %v6792_v43, %v2723_v19  ;;  %v2745_v0 = vor.u32 %v9178_v14, %v7162_v22  ;;  %v2733_v9 = vsel %vm5287_vm10, %v2725_v30, %v2732_v54  ;;  %v7409_v30 = vld [vmem:[#allocation2 + $0x110] sm:$0xf]  ;;  %v7422_v14 = vld [vmem:[#allocation2 + $0x120] sm:$0xf] }
 0x2dd   : > { %v2754_v18 = vor.u32 %v9179_v17, %v7168_v55  ;;  %v2767_v28 = vor.u32 %v9180_v44, %v7186_v51  ;;  %v2769_v32 = vrot.slane %v7186_v51, 4  ;;  %v7389_v43 = vrot.slane %v2916_v45, 7  ;;  %v7407_v51 = vld [vmem:[#allocation2 + $0x10c] sm:$0xf]  ;;  %9183 = vst [vmem:[#allocation65_spill] sm:$0xff] %v7422_v14 }
 0x2de   : > { %v7391_v19 = vcombine.low %v2724_v13, %v2733_v9  ;;  %v2746_v36 = vsel %vm5287_vm10, %v6794_v61, %v2745_v0  ;;  %v9181_v22 = vshll.u32 %v7137_v16, 16  ;;  %3600 = vrot.lane.b32.xlu0 %v7293_v53, %s5190_s21  ;;  %3565 = vrot.lane.b32.xlu1 %v7293_v53, %s5189_s20  ;;  %v7403_v55 = vrot.slane %v2925_v7, 7 }
 0x2df   : > { %v7405_v58 = vrot.slane %v2916_v45, 4  ;;  %v2755_v61 = vsel %vm5287_vm10, %v2747_v3, %v2754_v18  ;;  %v9182_v38 = vshll.u32 %v7300_v11, 16  ;;  %v7420_v13 = vrot.slane %v2925_v7, 4 }
 0x2e0   : > { %v2776_v42 = vor.u32 %v9181_v22, %v7188_v59  ;;  %v2768_v59 = vsel %vm5287_vm10, %v6796_v5, %v2767_v28  ;;  %v7424_v45 = vcombine.low %v2746_v36, %v2755_v61  ;;  %v7428_v9 = vrot.slane %v2938_v48, 7  ;;  %v7433_v5 = vld [vmem:[#allocation2 + $0x124] sm:$0xf] }
 0x2e1   : > { %v7418_v54 = vrot.slane %v9182_v38, 5  ;;  %v7430_v3 = vrot.slane %v2947_v6, 7  ;;  %v2960_v7 = vshrl.u32 %v7407_v51, 16  ;;  %v2969_v44 = vshrl.u32 %v7409_v30, 16 }
 0x2e2   : > { %v2777_v0 = vsel %vm5287_vm10, %v2769_v32, %v2776_v42  ;;  %v9186_v28 = vshll.u32 %v7158_v47, 16  ;;  %v2791_v32 = vrot.slane %v7212_v4, 4  ;;  %3530 = vrot.lane.b32.xlu0 %v7293_v53, %s5188_s19  ;;  %3602 = vrot.lane.b32.xlu1 %v7298_v23, %s5190_s21  ;;  %v7447_v22 = vrot.slane %v2938_v48, 4 }
 0x2e3   : > { %9184 = vst [vmem:[#allocation66_spill] sm:$0xff] %v7430_v3  ;;  %v7435_v18 = vcombine.low %v2768_v59, %v2777_v0  ;;  %v2982_v61 = vshrl.u32 %v7422_v14, 16  ;;  %v9187_v59 = vshll.u32 %v7160_v35, 16  ;;  %v9188_v47 = vshll.u32 %v7321_v15, 16  ;;  %v7496_v3 = vld [vmem:[#allocation2 + $0x134] sm:$0xf] }
 0x2e4   : > { %v2789_v36 = vor.u32 %v9186_v28, %v7212_v4  ;;  %v7458_v4 = vrot.slane %v2947_v6, 4  ;;  %v2991_v53 = vshrl.u32 %v7433_v5, 16  ;;  %v7466_v28 = vcombine.low %v7321_v15, %v7337_v31 }
 0x2e5   : > { %9185 = vst [vmem:[#allocation67_spill] sm:$0xff] %v7435_v18  ;;  %v2798_v38 = vor.u32 %v9187_v59, %v7214_v33  ;;  %v7456_v0 = vrot.slane %v9188_v47, 5  ;;  %v7472_v47 = vrot.slane %v2960_v7, 7  ;;  %v7474_v6 = vrot.slane %v2969_v44, 7 }
 0x2e6   : > { %v2790_v48 = vsel %vm5287_vm10, %v6804_v24, %v2789_v36  ;;  %v7478_v42 = vcombine.low %v7407_v51, %v7409_v30  ;;  %3567 = vrot.lane.b32.xlu0 %v7298_v23, %s5189_s20  ;;  %3532 = vrot.lane.b32.xlu1 %v7298_v23, %s5188_s19  ;;  %v7486_v36 = vrot.slane %v2960_v7, 4  ;;  %v7492_v17 = vrot.slane %v2969_v44, 4 }
 0x2e7   : > { %v2799_v59 = vsel %vm5287_vm10, %v2791_v32, %v2798_v38  ;;  %v9190_v32 = vshll.u32 %v7407_v51, 16  ;;  %v7494_v33 = vrot.slane %v2982_v61, 7  ;;  %v2835_v7 = vrot.slane %v7258_v46, 4 }
 0x2e8   : > { %v7480_v24 = vcombine.low %v2790_v48, %v2799_v59  ;;  %9191 = vst [vmem:[#allocation69_spill] sm:$0xff] %v7492_v17  ;;  %v7498_v48 = vrot.slane %v2991_v53, 7  ;;  %v7505_v18 = vrot.slane %v2982_v61, 4  ;;  %v7511_v17 = vrot.slane %v2991_v53, 4 }
 0x2e9   : > { %v7490_v38 = vrot.slane %v9190_v32, 5  ;;  %9192 = vst [vmem:[#allocation70_spill] sm:$0xff] %v7494_v33  ;;  %v9195_v32 = vshll.u32 %v7422_v14, 16  ;;  %v9197_v33 = vshll.u32 %v7198_v27, 16  ;;  %v7518_v59 = vcombine.low %v7422_v14, %v7433_v5 }
 0x2ea   : > { %9189 = vst [vmem:[#allocation68_spill] sm:$0xff] %v7480_v24  ;;  %9193 = vst [vmem:[#allocation71_spill] sm:$0xff] %v7498_v48  ;;  %v9194_v24 = vshll.u32 %v7196_v40, 16  ;;  %3604 = vrot.lane.b32.xlu0 %v7335_v60, %s5190_s21  ;;  %3569 = vrot.lane.b32.xlu1 %v7335_v60, %s5189_s20  ;;  %v9202_v14 = vshll.u32 %v7065_v20, 16  ;;  %v9206_v20 = vshll.u32 %v7242_v25, 16 }
 0x2eb   : > { %v7509_v44 = vrot.slane %v9195_v32, 5  ;;  %9196 = vst [vmem:[#allocation72_spill] sm:$0xff] %v7511_v17  ;;  %v2842_v48 = vor.u32 %v9197_v33, %v7260_v52  ;;  %v9198_v52 = vshrl.u32 %v7097_v12, 16  ;;  %v9199_v32 = vshll.u32 %v7055_v8, 16 }
 0x2ec   : > { %v2833_v23 = vor.u32 %v9194_v24, %v7258_v46  ;;  %v3080_v24 = vor.u32 %v7132_v41, %v7128_v50  ;;  %v3096_v17 = vrot.slane %v9202_v14, 5  ;;  %v7556_v8 = vcombine.low %v7496_v3, %v7097_v12 }
 0x2ed   : > { %v7531_v53 = vrot.slane %v9198_v52, 7  ;;  %v2843_v33 = vsel %vm5287_vm10, %v2835_v7, %v2842_v48  ;;  %v3082_v46 = vrot.slane %v9199_v32, 5  ;;  %v3094_v52 = vor.u32 %v7149_v10, %v7145_v26 }
 0x2ee   : > { %v2834_v61 = vsel %vm5287_vm10, %v6817_v29, %v2833_v23  ;;  %v9200_v29 = vshll.u32 %v7172_v34, 16  ;;  %v9203_v48 = vshrl.u32 %v7097_v12, 16  ;;  %v3081_v50 = vrot.slane %v3080_v24, 4  ;;  %3534 = vrot.lane.b32.xlu0 %v7335_v60, %s5188_s19  ;;  %3606 = vrot.lane.b32.xlu1 %v7345_v62, %s5190_s21 }
 0x2ef   : > { %v7544_v40 = vcombine.low %v2834_v61, %v2843_v33  ;;  %v3085_v41 = vor.u32 %v7124_v57, %v3082_v46  ;;  %v9205_v61 = vshrl.u32 %v7496_v3, 16  ;;  %v3095_v32 = vrot.slane %v3094_v52, 4  ;;  %v9208_v52 = vld [vmem:[#allocation44_spill] sm:$0xff] }
 0x2f0   : > { %v7542_v23 = vor.u32 %v9200_v29, %v7233_v37  ;;  %v7552_v7 = vrot.slane %v9203_v48, 4  ;;  %v3099_v26 = vor.u32 %v7151_v2, %v3096_v17  ;;  %v2877_v10 = vor.u32 %v9206_v20, %v7302_v1  ;;  %v9207_v2 = vld [vmem:[#allocation8_spill] sm:$0xff]  ;;  %v9209_v48 = vld [vmem:[#allocation33_spill] sm:$0xff] }
 0x2f1   : > { %9201 = vst [vmem:[#allocation73_spill] sm:$0xff] %v7544_v40  ;;  %v7561_v33 = vrot.slane %v9205_v61, 7  ;;  %v2813_v14 = vrot.slane %v7233_v37, 4  ;;  %v3083_v57 = vsel %vm5295_vm11, %v3081_v50, %v3082_v46  ;;  %v3086_v24 = vrot.slane %v3085_v41, 4  ;;  %v9211_v37 = vld [vmem:[#allocation12_spill] sm:$0xff]  ;;  %v9212_v50 = vld [vmem:[#allocation14_spill] sm:$0xff] }
 0x2f2   : > { %9204 = vst [vmem:[#allocation74_spill] sm:$0xff] %v7552_v7  ;;  %v2879_v29 = vrot.slane %v7302_v1, 4  ;;  %v2812_v25 = vsel %vm5287_vm10, %v9207_v2, %v7542_v23  ;;  %v9210_v61 = vshll.u32 %v9209_v48, 16  ;;  %v3097_v20 = vsel %vm5295_vm11, %v3095_v32, %v3096_v17  ;;  %v9213_v41 = vld [vmem:[#allocation45_spill] sm:$0xff]  ;;  %v9215_v2 = vld [vmem:[#allocation31_spill] sm:$0xff]  ;;  %v9216_v7 = vld [vmem:[#allocation34_spill] sm:$0xff]  ;;  %3571 = vrot.lane.b32.xlu0 %v7345_v62, %s5189_s20  ;;  %3536 = vrot.lane.b32.xlu1 %v7345_v62, %s5188_s19 }
 0x2f3   : > { %v3100_v34 = vrot.slane %v3099_v26, 4  ;;  %v3091_v46 = vsel %vm5295_vm11, %v3086_v24, %v9211_v37  ;;  %v2878_v1 = vsel %vm5287_vm10, %v9212_v50, %v2877_v10  ;;  %v9214_v40 = vshll.u32 %v9213_v41, 16  ;;  %v9222_v50 = vld [vmem:[#allocation58_spill] sm:$0xff] }
 0x2f4   : > { %v2820_v60 = vor.u32 %v9210_v61, %v9208_v52  ;;  %v3108_v48 = vor.u32 %v9216_v7, %v9215_v2  ;;  %v7595_v52 = vcombine.low %v3083_v57, %v3091_v46  ;;  %v9217_v61 = vld [vmem:[#allocation13_spill] sm:$0xff]  ;;  %v9218_v32 = vshll.u32 %v7083_v49, 16  ;;  %v9220_v57 = vld [vmem:[#allocation35_spill] sm:$0xff] }
 0x2f5   : > { %v2886_v23 = vor.u32 %v9214_v40, %v7304_v39  ;;  %v3105_v17 = vsel %vm5295_vm11, %v3100_v34, %v9217_v61  ;;  %v9219_v24 = vshll.u32 %v7300_v11, 16  ;;  %v2923_v34 = vrot.slane %v7389_v43, 4  ;;  %v9221_v11 = vld [vmem:[#allocation15_spill] sm:$0xff]  ;;  %v9224_v61 = vld [vmem:[#allocation36_spill] sm:$0xff] }
 0x2f6   : > { %v3110_v26 = vrot.slane %v9218_v32, 5  ;;  %v7609_v39 = vcombine.low %v3097_v20, %v3105_v17  ;;  %v3109_v7 = vrot.slane %v3108_v48, 4  ;;  %v9223_v2 = vshll.u32 %v9222_v50, 16  ;;  %v9228_v17 = vld [vmem:[#allocation42_spill] sm:$0xff]  ;;  %3608 = vrot.lane.b32.xlu0 %v7466_v28, %s5190_s21  ;;  %3573 = vrot.lane.b32.xlu1 %v7466_v28, %s5189_s20 }
 0x2f7   : > { %v2921_v10 = vor.u32 %v9219_v24, %v7389_v43  ;;  %v2887_v40 = vsel %vm5287_vm10, %v2879_v29, %v2886_v23  ;;  %v9225_v29 = vld [vmem:[#allocation37_spill] sm:$0xff]  ;;  %v9226_v43 = vshll.u32 %v7137_v16, 16  ;;  %v9227_v23 = vld [vmem:[#allocation40_spill] sm:$0xff] }
 0x2f8   : > { %v7614_v49 = vcombine.low %v2878_v1, %v2887_v40  ;;  %v3113_v37 = vor.u32 %v9220_v57, %v3110_v26  ;;  %v2930_v62 = vor.u32 %v9223_v2, %v7403_v55  ;;  %v3111_v20 = vsel %vm5295_vm11, %v3109_v7, %v3110_v26 }
 0x2f9   : > { %v2922_v46 = vsel %vm5287_vm10, %v9221_v11, %v2921_v10  ;;  %v3122_v48 = vor.u32 %v9225_v29, %v9224_v61  ;;  %v3124_v1 = vrot.slane %v9226_v43, 5  ;;  %v3136_v32 = vor.u32 %v9228_v17, %v9227_v23  ;;  %v9236_v29 = vld [vmem:[#allocation16_spill] sm:$0xff]  ;;  %v9237_v43 = vld [vmem:[#allocation43_spill] sm:$0xff] }
 0x2fa   : > { %v3114_v24 = vrot.slane %v3113_v37, 4  ;;  %v2931_v10 = vsel %vm5287_vm10, %v2923_v34, %v2930_v62  ;;  %v9229_v40 = vshll.u32 %v7160_v35, 16  ;;  %v9230_v55 = vshll.u32 %v7407_v51, 16  ;;  %v9232_v37 = vld [vmem:[#allocation38_spill] sm:$0xff]  ;;  %v9233_v34 = vld [vmem:[#allocation51_spill] sm:$0xff]  ;;  %3538 = vrot.lane.b32.xlu0 %v7466_v28, %s5188_s19  ;;  %3610 = vrot.lane.b32.xlu1 %v7478_v42, %s5190_s21 }
 0x2fb   : > { %v7642_v16 = vcombine.low %v2922_v46, %v2931_v10  ;;  %v3123_v7 = vrot.slane %v3122_v48, 4  ;;  %v3127_v11 = vor.u32 %v9232_v37, %v3124_v1  ;;  %v3137_v2 = vrot.slane %v3136_v32, 4  ;;  %v9234_v62 = vld [vmem:[#allocation39_spill] sm:$0xff]  ;;  %v9238_v37 = vld [vmem:[#allocation17_spill] sm:$0xff] }
 0x2fc   : > { %v3138_v57 = vrot.slane %v9229_v40, 5  ;;  %v2965_v26 = vor.u32 %v9230_v55, %v7472_v47  ;;  %v9235_v35 = vshll.u32 %v9234_v62, 16  ;;  %v3119_v51 = vsel %vm5295_vm11, %v3114_v24, %v9236_v29 }
 0x2fd   : > { %9231 = vst [vmem:[#allocation8_spill] sm:$0xff] %v7642_v16  ;;  %v2967_v17 = vrot.slane %v7472_v47, 4  ;;  %v7655_v40 = vcombine.low %v3111_v20, %v3119_v51  ;;  %v3125_v46 = vsel %vm5295_vm11, %v3123_v7, %v3124_v1  ;;  %v3128_v48 = vrot.slane %v3127_v11, 4  ;;  %v9240_v1 = vld [vmem:[#allocation18_spill] sm:$0xff] }
 0x2fe   : > { %v7648_v61 = vor.u32 %v9235_v35, %v9233_v34  ;;  %v3141_v23 = vor.u32 %v9237_v43, %v3138_v57  ;;  %v3139_v32 = vsel %vm5295_vm11, %v3137_v2, %v3138_v57  ;;  %v2821_v10 = vsel %vm5287_vm10, %v2813_v14, %v2820_v60  ;;  %v9241_v14 = vld [vmem:[#allocation48_spill] sm:$0xff]  ;;  %v9242_v60 = vld [vmem:[#allocation49_spill] sm:$0xff]  ;;  %v9245_v35 = vld [vmem:[#allocation19_spill] sm:$0xff]  ;;  %3575 = vrot.lane.b32.xlu0 %v7478_v42, %s5189_s20 }
 0x2ff   : > { %v2966_v24 = vsel %vm5287_vm10, %v9238_v37, %v2965_v26  ;;  %v9239_v47 = vshll.u32 %v7409_v30, 16  ;;  %v3133_v57 = vsel %vm5295_vm11, %v3128_v48, %v9240_v1  ;;  %v3164_v7 = vor.u32 %v9242_v60, %v9241_v14  ;;  %v9246_v43 = vld [vmem:[#allocation52_spill] sm:$0xff]  ;;  %3540 = vrot.lane.b32.xlu1 %v7478_v42, %s5188_s19  ;;  %v9258_v42 = vld [vmem:[#allocation57_spill] sm:$0xff] }
 0x300   : > { %v3142_v55 = vrot.slane %v3141_v23, 4  ;;  %v9243_v11 = vshll.u32 %v7198_v27, 16  ;;  %v9244_v2 = vshll.u32 %v7496_v3, 16  ;;  %v2857_v62 = vrot.slane %v9233_v34, 4  ;;  %v9247_v23 = vld [vmem:[#allocation41_spill] sm:$0xff]  ;;  %v9250_v34 = vld [vmem:[#allocation50_spill] sm:$0xff] }
 0x301   : > { %v2974_v20 = vor.u32 %v9239_v47, %v7474_v6  ;;  %v7684_v28 = vcombine.low %v3125_v46, %v3133_v57  ;;  %v9248_v48 = vshll.u32 %v9247_v23, 16  ;;  %v3165_v1 = vrot.slane %v3164_v7, 4  ;;  %v9251_v57 = vld [vmem:[#allocation20_spill] sm:$0xff]  ;;  %v9255_v7 = vld [vmem:[#allocation54_spill] sm:$0xff] }
 0x302   : > { %v3166_v26 = vrot.slane %v9243_v11, 5  ;;  %v3009_v6 = vor.u32 %v9244_v2, %v7561_v33  ;;  %v3147_v29 = vsel %vm5295_vm11, %v3142_v55, %v9245_v35  ;;  %v7698_v14 = vcombine.low %v2812_v25, %v2821_v10  ;;  %v9257_v35 = vld [vmem:[#allocation56_spill] sm:$0xff]  ;;  %3612 = vrot.lane.b32.xlu0 %v7518_v59, %s5190_s21 }
 0x303   : > { %v2975_v51 = vsel %vm5287_vm10, %v2967_v17, %v2974_v20  ;;  %v2864_v27 = vor.u32 %v9248_v48, %v9246_v43  ;;  %v7694_v37 = vcombine.low %v3139_v32, %v3147_v29  ;;  %v3011_v60 = vrot.slane %v7561_v33, 4  ;;  %v9254_v20 = vld [vmem:[#allocation53_spill] sm:$0xff]  ;;  %3577 = vrot.lane.b32.xlu1 %v7518_v59, %s5189_s20 }
 0x304   : > { %v7696_v47 = vcombine.low %v2966_v24, %v2975_v51  ;;  %v3169_v46 = vor.u32 %v9250_v34, %v3166_v26  ;;  %v3010_v55 = vsel %vm5287_vm10, %v9251_v57, %v3009_v6  ;;  %v9252_v17 = vshrl.u32 %v7496_v3, 16  ;;  %v9261_v34 = vld [vmem:[#allocation62_spill] sm:$0xff] }
 0x305   : > { %v3167_v25 = vsel %vm5295_vm11, %v3165_v1, %v3166_v26  ;;  %v9253_v10 = vshll.u32 %v7097_v12, 16  ;;  %v3178_v33 = vor.u32 %v9255_v7, %v9254_v20  ;;  %v9256_v2 = vmov %v9248_v48  ;;  %v9260_v48 = vld [vmem:[#allocation9_spill] sm:$0xff]  ;;  %v9265_v20 = vld [vmem:[#allocation55_spill] sm:$0xff] }
 0x306   : > { %9249 = vst [vmem:[#allocation44_spill] sm:$0xff] %v7696_v47  ;;  %v7711_v32 = vrot.slane %v9252_v17, 4  ;;  %v3170_v11 = vrot.slane %v3169_v46, 4  ;;  %v3180_v6 = vrot.slane %v9256_v2, 5  ;;  %v3192_v29 = vor.u32 %v9258_v42, %v9257_v35  ;;  %v9262_v46 = vld [vmem:[#allocation63_spill] sm:$0xff]  ;;  %v9263_v17 = vld [vmem:[#allocation21_spill] sm:$0xff]  ;;  %3367 = vrot.lane.b32.xlu0 %v7371_v21, %s5193_s24 }
 0x307   : > { %v3018_v24 = vor.u32 %v9253_v10, %v7531_v53  ;;  %v9259_v51 = vshll.u32 %v9213_v41, 16  ;;  %v2856_v26 = vsel %vm5287_vm10, %v9260_v48, %v7648_v61  ;;  %v3179_v1 = vrot.slane %v3178_v33, 4  ;;  %v9270_v48 = vld [vmem:[#allocation46_spill] sm:$0xff]  ;;  %3614 = vrot.lane.b32.xlu1 %v7556_v8, %s5190_s21 }
 0x308   : > { %v3206_v57 = vor.u32 %v9262_v46, %v9261_v34  ;;  %v2865_v23 = vsel %vm5287_vm10, %v2857_v62, %v2864_v27  ;;  %v3175_v41 = vsel %vm5295_vm11, %v3170_v11, %v9263_v17  ;;  %v3183_v7 = vor.u32 %v9265_v20, %v3180_v6  ;;  %v9266_v27 = vld [vmem:[#allocation59_spill] sm:$0xff]  ;;  %v9273_v46 = vld [vmem:[#allocation22_spill] sm:$0xff] }
 0x309   : > { %v3194_v43 = vrot.slane %v9259_v51, 5  ;;  %v3019_v53 = vsel %vm5287_vm10, %v3011_v60, %v3018_v24  ;;  %v7746_v61 = vcombine.low %v3167_v25, %v3175_v41  ;;  %v3181_v60 = vsel %vm5295_vm11, %v3179_v1, %v3180_v6  ;;  %v9269_v51 = vld [vmem:[#allocation60_spill] sm:$0xff] }
 0x30a   : > { %v7739_v10 = vcombine.low %v3010_v55, %v3019_v53  ;;  %v3193_v62 = vrot.slane %v3192_v29, 4  ;;  %v3184_v33 = vrot.slane %v3183_v7, 4  ;;  %v3207_v11 = vrot.slane %v3206_v57, 4  ;;  %v9267_v55 = vld [vmem:[#allocation47_spill] sm:$0xff]  ;;  %3402 = vrot.lane.b32.xlu0 %v7391_v19, %s5192_s23 }
 0x30b   : > { %v3197_v24 = vor.u32 %v9266_v27, %v3194_v43  ;;  %v9268_v2 = vshll.u32 %v9267_v55, 16  ;;  %v3220_v42 = vor.u32 %v7418_v54, %v7405_v58  ;;  %v9271_v53 = vshll.u32 %v9270_v48, 16  ;;  %v9274_v58 = vld [vmem:[#allocation64_spill] sm:$0xff]  ;;  %3369 = vrot.lane.b32.xlu1 %v7391_v19, %s5193_s24 }
 0x30c   : > { %9264 = vst [vmem:[#allocation12_spill] sm:$0xff] %v7739_v10  ;;  %v3195_v25 = vsel %vm5295_vm11, %v3193_v62, %v3194_v43  ;;  %v9272_v29 = vshll.u32 %v9222_v50, 16  ;;  %v3189_v57 = vsel %vm5295_vm11, %v3184_v33, %v9273_v46  ;;  %v9275_v20 = vshll.u32 %v7496_v3, 16  ;;  %v9276_v43 = vld [vmem:[#allocation23_spill] sm:$0xff] }
 0x30d   : > { %v3208_v35 = vrot.slane %v9268_v2, 5  ;;  %v7758_v34 = vor.u32 %v9271_v53, %v9269_v51  ;;  %v3198_v6 = vrot.slane %v3197_v24, 4  ;;  %v3221_v41 = vrot.slane %v3220_v42, 4  ;;  %v7783_v33 = vld [vmem:[#allocation2 + $0x148] sm:$0xf] }
 0x30e   : > { %v3222_v1 = vrot.slane %v9272_v29, 5  ;;  %v3275_v7 = vrot.slane %v9275_v20, 5  ;;  %v7776_v50 = vcombine.low %v3181_v60, %v3189_v57  ;;  %v2901_v24 = vrot.slane %v9269_v51, 4  ;;  %v7803_v57 = vld [vmem:[#allocation2 + $0x14c] sm:$0xf] }
 0x30f   : > { %v3209_v17 = vsel %vm5295_vm11, %v3207_v11, %v3208_v35  ;;  %v3211_v54 = vor.u32 %v9274_v58, %v3208_v35  ;;  %v3203_v62 = vsel %vm5295_vm11, %v3198_v6, %v9276_v43  ;;  %v7789_v35 = vcombine.low %v2856_v26, %v2865_v23  ;;  %v9281_v26 = vld [vmem:[#allocation24_spill] sm:$0xff]  ;;  %3404 = vrot.lane.b32.xlu1 %v7424_v45, %s5192_s23 }
 0x310   : > { %v3225_v27 = vor.u32 %v7420_v13, %v3222_v1  ;;  %v7785_v3 = vcombine.low %v3195_v25, %v3203_v62  ;;  %v3223_v2 = vsel %vm5295_vm11, %v3221_v41, %v3222_v1  ;;  %v3234_v42 = vor.u32 %v7456_v0, %v7447_v22  ;;  %v9278_v13 = vld [vmem:[#allocation61_spill] sm:$0xff] }
 0x311   : > { %v3212_v11 = vrot.slane %v3211_v54, 4  ;;  %v9277_v48 = vshll.u32 %v7337_v31, 16  ;;  %v9279_v6 = vshll.u32 %v9267_v55, 16  ;;  %v9280_v25 = vshll.u32 %v7321_v15, 16  ;;  %v9282_v55 = vld [vmem:[#allocation25_spill] sm:$0xff] }
 0x312   : > { %v3226_v60 = vrot.slane %v3225_v27, 4  ;;  %v3248_v22 = vor.u32 %v7490_v38, %v7486_v36  ;;  %v3026_v0 = vshrl.u32 %v7783_v33, 16  ;;  %v3235_v58 = vrot.slane %v3234_v42, 4 }
 0x313   : > { %v3236_v53 = vrot.slane %v9277_v48, 5  ;;  %v2908_v29 = vor.u32 %v9279_v6, %v9278_v13  ;;  %v7801_v46 = vor.u32 %v9280_v25, %v7428_v9  ;;  %v3217_v23 = vsel %vm5295_vm11, %v3212_v11, %v9281_v26  ;;  %v9285_v48 = vld [vmem:[#allocation67_spill] sm:$0xff]  ;;  %v9288_v25 = vld [vmem:[#allocation26_spill] sm:$0xff]  ;;  %3371 = vrot.lane.b32.xlu1 %v7424_v45, %s5193_s24 }
 0x314   : > { %v7815_v15 = vcombine.low %v3209_v17, %v3217_v23  ;;  %v3231_v1 = vsel %vm5295_vm11, %v3226_v60, %v9282_v55  ;;  %v3029_v54 = vshll.u32 %v7783_v33, 16  ;;  %v3249_v38 = vrot.slane %v3248_v22, 4  ;;  %3406 = vrot.lane.b32.xlu0 %v9285_v48, %s5192_s23 }
 0x315   : > { %v7821_v41 = vcombine.low %v3223_v2, %v3231_v1  ;;  %v3239_v36 = vor.u32 %v7458_v4, %v3236_v53  ;;  %v3035_v20 = vshrl.u32 %v7803_v57, 16  ;;  %v3237_v43 = vsel %vm5295_vm11, %v3235_v58, %v3236_v53  ;;  %v9286_v53 = vld [vmem:[#allocation69_spill] sm:$0xff] }
 0x316   : > { %v9283_v17 = vshll.u32 %v7409_v30, 16  ;;  %v3262_v27 = vor.u32 %v7509_v44, %v7505_v18  ;;  %v3038_v11 = vshll.u32 %v7803_v57, 16  ;;  %v9284_v2 = vshll.u32 %v7433_v5, 16 }
 0x317   : > { %v3240_v60 = vrot.slane %v3239_v36, 4  ;;  %v3276_v4 = vor.u32 %v3275_v7, %v7711_v32  ;;  %v9287_v44 = vshll.u32 %v7097_v12, 16  ;;  %v9289_v32 = vld [vmem:[#allocation72_spill] sm:$0xff]  ;;  %v7850_v22 = vcombine.low %v7783_v33, %v7803_v57  ;;  %v9290_v36 = vld [vmem:[#allocation74_spill] sm:$0xff]  ;;  %3373 = vrot.lane.b32.xlu1 %v9285_v48, %s5193_s24  ;;  %v7956_v33 = vpop.permute.xlu1 %3432 }
 0x318   : > { %v3250_v62 = vrot.slane %v9283_v17, 5  ;;  %v3264_v42 = vrot.slane %v9284_v2, 5  ;;  %v3263_v18 = vrot.slane %v3262_v27, 4  ;;  %v3289_v27 = vrot.slane %v3029_v54, 5  ;;  %3410 = vrot.lane.b32.xlu0 %v7698_v14, %s5192_s23  ;;  %9309 = vst [vmem:[#allocation31_spill] sm:$0xff] %v7956_v33 }
 0x319   : > { %v3278_v6 = vrot.slane %v9287_v44, 5  ;;  %v3245_v26 = vsel %vm5295_vm11, %v3240_v60, %v9288_v25  ;;  %v3277_v23 = vrot.slane %v3276_v4, 4  ;;  %v3294_v4 = vrot.slane %v3035_v20, 4  ;;  %v9293_v25 = vld [vmem:[#allocation66_spill] sm:$0xff] }
 0x31a   : > { %v3251_v30 = vsel %vm5295_vm11, %v3249_v38, %v3250_v62  ;;  %v3253_v13 = vor.u32 %v9286_v53, %v3250_v62  ;;  %v3267_v7 = vor.u32 %v9289_v32, %v3264_v42  ;;  %v7852_v55 = vcombine.low %v3237_v43, %v3245_v26  ;;  %v9291_v43 = vld [vmem:[#allocation27_spill] sm:$0xff] }
 0x31b   : > { %v3265_v58 = vsel %vm5295_vm11, %v3263_v18, %v3264_v42  ;;  %v3281_v12 = vor.u32 %v9290_v36, %v3278_v6  ;;  %v3279_v17 = vsel %vm5295_vm11, %v3277_v23, %v3278_v6  ;;  %v3288_v62 = vrot.slane %v3026_v0, 4  ;;  %v9292_v18 = vld [vmem:[#allocation28_spill] sm:$0xff] }
 0x31c   : > { %v3254_v1 = vrot.slane %v3253_v13, 4  ;;  %v3268_v38 = vrot.slane %v3267_v7, 4  ;;  %v3292_v42 = vrot.slane %v3038_v11, 5  ;;  %v2945_v53 = vrot.slane %v7428_v9, 4  ;;  %v2660_v7 = vld [vmem:[#allocation2 + $0x144] sm:$0x8]  ;;  %3414 = vrot.lane.b32.xlu0 %v7789_v35, %s5192_s23 }
 0x31d   : > { %v3282_v2 = vrot.slane %v3281_v12, 4  ;;  %v3290_v6 = vor.u32 %v3289_v27, %v3288_v62  ;;  %v9294_v26 = vshll.u32 %v7337_v31, 16  ;;  %v9296_v9 = vld [vmem:[#allocation10_spill] sm:$0xff] }
 0x31e   : > { %v3259_v60 = vsel %vm5295_vm11, %v3254_v1, %v9291_v43  ;;  %v3273_v44 = vsel %vm5295_vm11, %v3268_v38, %v9292_v18  ;;  %v9295_v1 = vld [vmem:[#allocation29_spill] sm:$0xff]  ;;  %v3295_v12 = vor.u32 %v3294_v4, %v3292_v42  ;;  %v2909_v38 = vsel %vm5287_vm10, %v2901_v24, %v2908_v29 }
 0x31f   : > { %v7873_v13 = vcombine.low %v3251_v30, %v3259_v60  ;;  %v2952_v32 = vor.u32 %v9294_v26, %v9293_v25  ;;  %v7881_v23 = vcombine.low %v3265_v58, %v3273_v44  ;;  %v3287_v36 = vsel %vm5295_vm11, %v3282_v2, %v9295_v1  ;;  %v9297_v58 = vld [vmem:[#allocation7_spill] sm:$0xff]  ;;  %v9300_v2 = vld [vmem:[#allocation70_spill] sm:$0xff]  ;;  %v9301_v24 = vld [vmem:[#allocation65_spill] sm:$0xff] }
 0x320   : > { %v2900_v30 = vsel %vm5287_vm10, %v9296_v9, %v7758_v34  ;;  %v7894_v31 = vcombine.low %v3279_v17, %v3287_v36  ;;  %v3291_v62 = vrot.slane %v3290_v6, 4  ;;  %v9298_v27 = vshrl.u32 %v9297_v58, 16  ;;  %v9299_v34 = vld [vmem:[#allocation11_spill] sm:$0xff]  ;;  %v9304_v26 = vld [vmem:[#allocation30_spill] sm:$0xff] }
 0x321   : > { %v3296_v60 = vrot.slane %v3295_v12, 4  ;;  %v2944_v51 = vsel %vm5287_vm10, %v9299_v34, %v7801_v46  ;;  %v9302_v29 = vshll.u32 %v9301_v24, 16  ;;  %v3021_v4 = vshrl.u32 %v2660_v7, 16  ;;  %v9305_v46 = vld [vmem:[#allocation71_spill] sm:$0xff] }
 0x322   : > { %v4829_v43 = vrot.slane %v9298_v27, 11  ;;  %v3293_v18 = vsel %vm5295_vm11, %v3291_v62, %v3292_v42  ;;  %v7911_v44 = vcombine.low %v2900_v30, %v2909_v38  ;;  %v2953_v6 = vsel %vm5287_vm10, %v2945_v53, %v2952_v32  ;;  %v9307_v30 = vld [vmem:[#allocation68_spill] sm:$0xff]  ;;  %v7932_v32 = vpop.permute.xlu0 %3514 }
 0x323   : > { %v2987_v17 = vor.u32 %v9302_v29, %v9300_v2  ;;  %v2989_v25 = vrot.slane %v9300_v2, 4  ;;  %v3301_v1 = vsel %vm5295_vm11, %v3296_v60, %v9304_v26  ;;  %v9306_v36 = vshll.u32 %v7433_v5, 16  ;;  %3408 = vrot.lane.b32.xlu1 %v9307_v30, %s5192_s23 }
 0x324   : > { %9303 = vst [vmem:[#allocation14_spill] sm:$0xff] %v7911_v44  ;;  %v3028_v7 = vrot.slane %v3026_v0, 7  ;;  %v3037_v9 = vrot.slane %v3035_v20, 7  ;;  %v7924_v42 = vcombine.low %v3293_v18, %v3301_v1  ;;  %3418 = vrot.lane.b32.xlu0 %v7911_v44, %s5192_s23  ;;  %v7930_v53 = vcombine.low %v2944_v51, %v2953_v6 }
 0x325   : > { %v2996_v12 = vor.u32 %v9306_v36, %v9305_v46  ;;  %v2988_v5 = vsel %vm5287_vm10, %v4829_v43, %v2987_v17  ;;  %v4831_v38 = vrot.slane %v3021_v4, 11  ;;  %v7966_v34 = vpop.permute.xlu1 %3516  ;;  %v9311_v46 = vld [vmem:[#allocation32_spill] sm:$0xff] }
 0x326   : > { %9308 = vst [vmem:[#allocation45_spill] sm:$0xff] %v7930_v53  ;;  %v3031_v20 = vor.u32 %v3029_v54, %v3028_v7  ;;  %v3033_v62 = vrot.slane %v3028_v7, 4  ;;  %v3040_v58 = vor.u32 %v3038_v11, %v3037_v9  ;;  %v7958_v57 = vpop.permute.xlu0 %3668  ;;  %v9310_v11 = vld [vmem:[#allocation73_spill] sm:$0xff]  ;;  %v9312_v36 = vshrl.u32 %v9311_v46, 16 }
 0x327   : > { %v2997_v0 = vsel %vm5287_vm10, %v2989_v25, %v2996_v12  ;;  %3375 = vrot.lane.b32.xlu1 %v9307_v30, %s5193_s24  ;;  %v9313_v7 = vshll.u32 %v9311_v46, 16 }
 0x328   : > { %3422 = vrot.lane.b32.xlu0 %v7930_v53, %s5192_s23  ;;  %v7946_v27 = vcombine.low %v2988_v5, %v2997_v0  ;;  %v3032_v43 = vsel %vm5287_vm10, %v4831_v38, %v3031_v20  ;;  %v3041_v60 = vsel %vm5287_vm10, %v3033_v62, %v3040_v58  ;;  %v3148_v12 = vrot.slane %v9312_v36, 4  ;;  %v9314_v5 = vld [vmem:[#allocation33_spill] sm:$0xff]  ;;  %v2623_v58 = vld [vmem:[#allocation2 + $0x88] sm:$0x1] }
 0x329   : > { %v7960_v54 = vcombine.low %v3032_v43, %v3041_v60  ;;  %v3149_v9 = vrot.slane %v9313_v7, 5  ;;  %v9315_v38 = vshrl.u32 %v9314_v5, 16  ;;  %v9316_v20 = vshll.u32 %v9314_v5, 16 }
 0x32a   : > { %v7968_v51 = vpop.permute.xlu0 %3551  ;;  %v3158_v7 = vshll.u32 %v2623_v58, 16 }
 0x32b   : > { %3377 = vrot.lane.b32.xlu1 %v7698_v14, %s5193_s24  ;;  %v3154_v0 = vrot.slane %v9315_v38, 4  ;;  %v3152_v62 = vrot.slane %v9316_v20, 5  ;;  %v3150_v36 = vor.u32 %v3149_v9, %v3148_v12 }
 0x32c   : > { %3426 = vrot.lane.b32.xlu0 %v7946_v27, %s5192_s23  ;;  %v7974_v2 = vpop.permute.xlu1 %3553 }
 0x32d   : > { %v3155_v46 = vor.u32 %v3154_v0, %v3152_v62  ;;  %v3151_v20 = vrot.slane %v3150_v36, 4 }
 0x32e   : > { %v7976_v24 = vpop.permute.xlu0 %3588 }
 0x32f   : > { %3412 = vrot.lane.b32.xlu1 %v9310_v11, %s5192_s23  ;;  %v3156_v33 = vrot.slane %v3155_v46, 4  ;;  %v3153_v0 = vsel %vm5295_vm11, %v3151_v20, %v3152_v62  ;;  %v5139_v62 = vld [vmem:[%s9013_s2 + $0x8] sm:$0xff]  }
 0x330   : > { %3430 = vrot.lane.b32.xlu0 %v7960_v54, %s5192_s23  ;;  %v7982_v29 = vpop.permute.xlu1 %3590 }
 0x332   : > { %v7984_v17 = vpop.permute.xlu0 %3518 }
 0x333   : > { %3379 = vrot.lane.b32.xlu1 %v9310_v11, %s5193_s24 }
 0x334   : > { %3703 = vrot.lane.b32.xlu0 %v7595_v52, %s5194_s29  ;;  %v7990_v4 = vpop.permute.xlu1 %3520 }
 0x336   : > { %v7992_v18 = vpop.permute.xlu0 %3555 }
 0x337   : > { %3381 = vrot.lane.b32.xlu1 %v7789_v35, %s5193_s24 }
 0x338   : > { %3738 = vrot.lane.b32.xlu0 %v7609_v39, %s5195_s30  ;;  %v7998_v6 = vpop.permute.xlu1 %3557 }
 0x33a   : > { %v8000_v25 = vpop.permute.xlu0 %3592 }
 0x33b   : > { %3416 = vrot.lane.b32.xlu1 %v7614_v49, %s5192_s23 }
 0x33c   : > { %3740 = vrot.lane.b32.xlu0 %v7655_v40, %s5195_s30  ;;  %v8006_v26 = vpop.permute.xlu1 %3594 }
 0x33e   : > { %v8008_v1 = vpop.permute.xlu0 %3522 }
 0x33f   : > { %3383 = vrot.lane.b32.xlu1 %v7614_v49, %s5193_s24 }
 0x340   : > { %3672 = vrot.lane.b32.xlu0 %v7609_v39, %s5191_s22  ;;  %v8022_v43 = vpop.permute.xlu1 %3524 }
 0x342   : > { %v8024_v60 = vpop.permute.xlu0 %3559 }
 0x343   : > { %3385 = vrot.lane.b32.xlu1 %v7911_v44, %s5193_s24  ;;  %v3160_v44 = vrot.slane %v3158_v7, 5 }
 0x344   : > { %3707 = vrot.lane.b32.xlu0 %v7655_v40, %s5194_s29  ;;  %v8030_v5 = vpop.permute.xlu1 %3561 }
 0x345   : > { %v3161_v58 = vsel %vm5295_vm11, %v3156_v33, %v3160_v44 }
 0x346   : > { %v8032_v38 = vpop.permute.xlu0 %3596  ;;  %v4875_v7 = vcombine.low %v3153_v0, %v3161_v58 }
 0x347   : > { %3420 = vrot.lane.b32.xlu1 %v7642_v16, %s5192_s23 }
 0x348   : > { %3742 = vrot.lane.b32.xlu0 %v7684_v28, %s5195_s30  ;;  %v8038_v12 = vpop.permute.xlu1 %3598 }
 0x34a   : > { %v8040_v9 = vpop.permute.xlu0 %3526 }
 0x34b   : > { %3387 = vrot.lane.b32.xlu1 %v7642_v16, %s5193_s24  ;;  %v5138_v16 = vld [vmem:[%s9013_s2] sm:$0xff]  }
 0x34c   : > { %3744 = vrot.lane.b32.xlu0 %v7694_v37, %s5195_s30  ;;  %v8050_v36 = vpop.permute.xlu1 %3528  ;;  %5049 = vmatprep.subr.bf16.mxu1 %v5138_v16 }
 0x34d   : > { %9317 = vst [vmem:[#allocation34_spill] sm:$0xff] %v8050_v36  ;;  %5050 = vmatpush3.bf16.msra.mxu1 %v5138_v16  ;;  %v5140_v16 = vld [vmem:[%s9013_s2 + $0x10] ss:$0 sps:$4 sm:$0x33]  }
 0x34e   : > { %v8052_v46 = vpop.permute.xlu0 %3563  ;;  %5051 = vmatprep.subr.bf16.mxu1 %v5139_v62  ;;  %v4095_v58 = vsel %vm1998_vm12, %v5140_v16, 0 }
 0x34f   : > { %3389 = vrot.lane.b32.xlu1 %v7930_v53, %s5193_s24 }
 0x350   : > { %3676 = vrot.lane.b32.xlu0 %v7684_v28, %s5191_s22  ;;  %v8060_v44 = vpop.permute.xlu1 %3565 }
 0x351   : > { %9318 = vst [vmem:[#allocation13_spill] sm:$0xff] %v8060_v44  ;;  %5052 = vmatpush3.bf16.msra.mxu1 %v5139_v62 }
 0x352   : > { %v8062_v33 = vpop.permute.xlu0 %3600  ;;  %5088 = vmatprep.subr.msk.bf16.mxu1 %vm1998_vm12, %v5140_v16 }
 0x353   : > { %3424 = vrot.lane.b32.xlu1 %v7696_v47, %s5192_s23 }
 0x354   : > { %3711 = vrot.lane.b32.xlu0 %v7694_v37, %s5194_s29  ;;  %v8071_v20 = vpop.permute.xlu1 %3602 }
 0x355   : > { %9319 = vst [vmem:[#allocation35_spill] sm:$0xff] %v8071_v20  ;;  %5054 = vmatpush3.bf16.msra.mxu1 %v4095_v58 }
 0x356   : > { %v8073_v0 = vpop.permute.xlu0 %3530 }
 0x357   : > { %3391 = vrot.lane.b32.xlu1 %v7696_v47, %s5193_s24  ;;  %9320 = vst [vmem:[#allocation15_spill] sm:$0xff] %v8073_v0 }
 0x358   : > { %3746 = vrot.lane.b32.xlu0 %v4875_v7, %s5195_s30  ;;  %v8083_v47 = vpop.permute.xlu1 %3532 }
 0x359   : > { %9321 = vst [vmem:[#allocation58_spill] sm:$0xff] %v8083_v47 }
 0x35a   : > { %v8085_v53 = vpop.permute.xlu0 %3567 }
 0x35b   : > { %3393 = vrot.lane.b32.xlu1 %v7946_v27, %s5193_s24  ;;  %9322 = vst [vmem:[#allocation36_spill] sm:$0xff] %v8085_v53 }
 0x35c   : > { %3748 = vrot.lane.b32.xlu0 %v7746_v61, %s5195_s30  ;;  %v8091_v62 = vpop.permute.xlu1 %3569 }
 0x35d   : > { %9323 = vst [vmem:[#allocation37_spill] sm:$0xff] %v8091_v62  ;;  %v9340_v62 = vld [vmem:[#allocation4_spill] sm:$0xff] }
 0x35e   : > { %v8093_v20 = vpop.permute.xlu0 %3604 }
 0x35f   : > { %3428 = vrot.lane.b32.xlu1 %v7739_v10, %s5192_s23  ;;  %9324 = vst [vmem:[#allocation40_spill] sm:$0xff] %v8093_v20 }
 0x360   : > { %3680 = vrot.lane.b32.xlu0 %v4875_v7, %s5191_s22  ;;  %v8099_v16 = vpop.permute.xlu1 %3606 }
 0x361   : > { %9325 = vst [vmem:[#allocation42_spill] sm:$0xff] %v8099_v16 }
 0x362   : > { %v8101_v47 = vpop.permute.xlu0 %3534 }
 0x363   : > { %3395 = vrot.lane.b32.xlu1 %v7739_v10, %s5193_s24  ;;  %9326 = vst [vmem:[#allocation38_spill] sm:$0xff] %v8101_v47  ;;  %v9341_v47 = vshrl.u32 %v9340_v62, 16 }
 0x364   : > { %3715 = vrot.lane.b32.xlu0 %v7746_v61, %s5194_s29  ;;  %v8107_v58 = vpop.permute.xlu1 %3536 }
 0x365   : > { %9327 = vst [vmem:[#allocation51_spill] sm:$0xff] %v8107_v58  ;;  %v2685_v20 = vrot.slane %v9341_v47, 7  ;;  %v9343_v47 = vshll.u32 %v9340_v62, 16 }
 0x366   : > { %v8109_v10 = vpop.permute.xlu0 %3571 }
 0x367   : > { %3397 = vrot.lane.b32.xlu1 %v7960_v54, %s5193_s24  ;;  %9328 = vst [vmem:[#allocation39_spill] sm:$0xff] %v8109_v10  ;;  %v2688_v44 = vor.u32 %v9343_v47, %v2685_v20 }
 0x368   : > { %3750 = vrot.lane.b32.xlu0 %v7776_v50, %s5195_s30  ;;  %v8115_v54 = vpop.permute.xlu1 %3573 }
 0x369   : > { %9329 = vst [vmem:[#allocation16_spill] sm:$0xff] %v8115_v54 }
 0x36a   : > { %v8117_v16 = vpop.permute.xlu0 %3608 }
 0x36b   : > { %3670 = vrot.lane.b32.xlu1 %v7595_v52, %s5191_s22  ;;  %9330 = vst [vmem:[#allocation43_spill] sm:$0xff] %v8117_v16 }
 0x36c   : > { %3752 = vrot.lane.b32.xlu0 %v7785_v3, %s5195_s30  ;;  %v8123_v52 = vpop.permute.xlu1 %3610 }
 0x36d   : > { %9331 = vst [vmem:[#allocation17_spill] sm:$0xff] %v8123_v52 }
 0x36e   : > { %v8125_v58 = vpop.permute.xlu0 %3538 }
 0x36f   : > { %3705 = vrot.lane.b32.xlu1 %v7609_v39, %s5194_s29  ;;  %9332 = vst [vmem:[#allocation18_spill] sm:$0xff] %v8125_v58 }
 0x370   : > { %3684 = vrot.lane.b32.xlu0 %v7776_v50, %s5191_s22 }
 0x371   : > { %v8131_v39 = vpop.permute.xlu1 %3540 }
 0x372   : > { %9333 = vst [vmem:[#allocation48_spill] sm:$0xff] %v8131_v39  ;;  %v8133_v54 = vpop.permute.xlu0 %3575 }
 0x373   : > { %3674 = vrot.lane.b32.xlu1 %v7655_v40, %s5191_s22  ;;  %9334 = vst [vmem:[#allocation49_spill] sm:$0xff] %v8133_v54 }
 0x374   : > { %3719 = vrot.lane.b32.xlu0 %v7785_v3, %s5194_s29 }
 0x375   : > { %v8139_v40 = vpop.permute.xlu1 %3577 }
 0x376   : > { %9335 = vst [vmem:[#allocation19_spill] sm:$0xff] %v8139_v40  ;;  %v8141_v52 = vpop.permute.xlu0 %3612 }
 0x377   : > { %3709 = vrot.lane.b32.xlu1 %v7684_v28, %s5194_s29  ;;  %9336 = vst [vmem:[#allocation52_spill] sm:$0xff] %v8141_v52 }
 0x378   : > { %3754 = vrot.lane.b32.xlu0 %v7815_v15, %s5195_s30 }
 0x379   : > { %v8146_v28 = vpop.permute.xlu1 %3614 }
 0x37a   : > { %9337 = vst [vmem:[#allocation41_spill] sm:$0xff] %v8146_v28  ;;  %v3368_v39 = vpop.permute.xlu0 %3367 }
 0x37b   : > { %3678 = vrot.lane.b32.xlu1 %v7694_v37, %s5191_s22 }
 0x37c   : > { %3756 = vrot.lane.b32.xlu0 %v7821_v41, %s5195_s30 }
 0x37d   : > { %v3370_v37 = vpop.permute.xlu1 %3369 }
 0x37e   : > { %v3403_v54 = vpop.permute.xlu0 %3402  ;;  %v3775_v40 = vsel %vm1665_vm13, %v7371_v21, %v3370_v37 }
 0x37f   : > { %3713 = vrot.lane.b32.xlu1 %v4875_v7, %s5194_s29  ;;  %v2596_v7 = vld [vmem:[#allocation2 + $0x4] sm:$0x8] }
 0x380   : > { %3688 = vrot.lane.b32.xlu0 %v7815_v15, %s5191_s22 }
 0x381   : > { %v3405_v28 = vpop.permute.xlu1 %3404 }
 0x382   : > { %v8159_v58 = vsel %vm1714_vm14, %v3775_v40, %v3405_v28 }
 0x383   : > { %3682 = vrot.lane.b32.xlu1 %v7746_v61, %s5191_s22  ;;  %v2669_v61 = vshrl.u32 %v2596_v7, 16 }
 0x384   : > { %3723 = vrot.lane.b32.xlu0 %v7821_v41, %s5194_s29 }
 0x385   : > { %v3372_v53 = vpop.permute.xlu1 %3371 }
 0x386   : > { %v3407_v52 = vpop.permute.xlu0 %3406  ;;  %v3778_v37 = vsel %vm1665_vm13, %v7391_v19, %v3372_v53 }
 0x387   : > { %3717 = vrot.lane.b32.xlu1 %v7776_v50, %s5194_s29  ;;  %v9338_v50 = vld [vmem:[#allocation3_spill] sm:$0xff]  ;;  %v8172_v40 = vsel %vm1714_vm14, %v3778_v37, %v3407_v52 }
 0x388   : > { %3758 = vrot.lane.b32.xlu0 %v7852_v55, %s5195_s30  ;;  %v9339_v16 = vshrl.u32 %v9338_v50, 16 }
 0x389   : > { %v3374_v0 = vpop.permute.xlu1 %3373 }
 0x38a   : > { %v2676_v10 = vrot.slane %v9339_v16, 7  ;;  %v3411_v21 = vpop.permute.xlu0 %3410  ;;  %v9342_v16 = vshll.u32 %v9338_v50, 16 }
 0x38b   : > { %3686 = vrot.lane.b32.xlu1 %v7785_v3, %s5191_s22  ;;  %v4815_v3 = vrot.slane %v2669_v61, 11 }
 0x38c   : > { %3760 = vrot.lane.b32.xlu0 %v7873_v13, %s5195_s30  ;;  %v2679_v28 = vor.u32 %v9342_v16, %v2676_v10  ;;  %v2681_v7 = vrot.slane %v2676_v10, 4  ;;  %v3781_v10 = vsel %vm1665_vm13, %v7424_v45, %v3374_v0 }
 0x38e   : > { %v3415_v36 = vpop.permute.xlu0 %3414  ;;  %v2680_v19 = vsel %vm5287_vm10, %v4815_v3, %v2679_v28  ;;  %v9347_v28 = vld [vmem:[#allocation6_spill] sm:$0xff] }
 0x38f   : > { %3721 = vrot.lane.b32.xlu1 %v7815_v15, %s5194_s29  ;;  %v2689_v15 = vsel %vm5287_vm10, %v2681_v7, %v2688_v44  ;;  %v9348_v7 = vshll.u32 %v9347_v28, 16 }
 0x390   : > { %3692 = vrot.lane.b32.xlu0 %v7852_v55, %s5191_s22  ;;  %v4833_v52 = vcombine.low %v2680_v19, %v2689_v15 }
 0x391   : > { %v3306_v47 = vrot.slane %v9348_v7, 5 }
 0x392   : > { %v3772_v45 = vsel %vm1665_vm13, %v4833_v52, %v3368_v39  ;;  %v2667_v52 = vld [vmem:[#allocation2 + $0x164] sm:$0x1] }
 0x393   : > { %3690 = vrot.lane.b32.xlu1 %v7821_v41, %s5191_s22 }
 0x394   : > { %3727 = vrot.lane.b32.xlu0 %v7873_v13, %s5194_s29 }
 0x395   : > { %v3409_v53 = vpop.permute.xlu1 %3408 }
 0x396   : > { %v8192_v62 = vpop.permute.xlu0 %3418  ;;  %v8195_v20 = vsel %vm1714_vm14, %v3781_v10, %v3409_v53 }
 0x397   : > { %3725 = vrot.lane.b32.xlu1 %v7852_v55, %s5194_s29  ;;  %v3819_v55 = vsel %vm1714_vm14, %v3772_v45, %v3403_v54  ;;  %v5146_v45 = vld [vmem:[#allocation2 + $0x160] sm:$0xf] }
 0x398   : > { %3762 = vrot.lane.b32.xlu0 %v7881_v23, %s5195_s30  ;;  %v3851_v37 = vsel %vm1747_vm15, %v3819_v55, %v7932_v32  ;;  %v9344_v32 = vld [vmem:[#allocation5_spill] sm:$0xff] }
 0x399   : > { %v3376_v41 = vpop.permute.xlu1 %3375  ;;  %v3883_v54 = vsel %vm1780_vm1, %v3851_v37, %v7968_v51  ;;  %v9349_v51 = vshrl.u32 %v9347_v28, 16 }
 0x39a   : > { %v8201_v61 = vpop.permute.xlu0 %3422  ;;  %v3784_v56 = vsel %vm1665_vm13, %v9285_v48, %v3376_v41  ;;  %v3915_v10 = vsel %vm1813_vm2, %v3883_v54, %v7976_v24 }
 0x39b   : > { %v8207_v44 = vsel %vm1714_vm14, %v3784_v56, %v3411_v21  ;;  %3694 = vrot.lane.b32.xlu1 %v7873_v13, %s5191_s22  ;;  %v3308_v19 = vrot.slane %v9349_v51, 4  ;;  %v5145_v56 = vld [vmem:[#allocation2 + $0x15c] sm:$0xf]  ;;  %v3947_v24 = vsel %vm1846_vm3, %v3915_v10, %v7958_v57 }
 0x39c   : > { %3764 = vrot.lane.b32.xlu0 %v7894_v31, %s5195_s30  ;;  %v4868_v55 = vcombine.low %v5145_v56, %v5146_v45 }
 0x39d   : > { %v3378_v0 = vpop.permute.xlu1 %3377  ;;  %v3309_v37 = vor.u32 %v3308_v19, %v3306_v47 }
 0x39e   : > { %v8214_v50 = vpop.permute.xlu0 %3426  ;;  %v3787_v48 = vsel %vm1665_vm13, %v9307_v30, %v3378_v0  ;;  %v9346_v30 = vshll.u32 %v9344_v32, 16 }
 0x39f   : > { %3729 = vrot.lane.b32.xlu1 %v7881_v23, %s5194_s29 }
 0x3a0   : > { %3542 = vrot.lane.b32.xlu0 %v7518_v59, %s5188_s19  ;;  %v9345_v59 = vshrl.u32 %v9344_v32, 16  ;;  %v3303_v16 = vrot.slane %v9346_v30, 5  ;;  %v3310_v32 = vrot.slane %v3309_v37, 4 }
 0x3a1   : > { %v3413_v13 = vpop.permute.xlu1 %3412 }
 0x3a2   : > { %v8224_v39 = vpop.permute.xlu0 %3430  ;;  %v8229_v21 = vsel %vm1714_vm14, %v3787_v48, %v3413_v13  ;;  %v3302_v3 = vrot.slane %v9345_v59, 4  ;;  %v3312_v48 = vshll.u32 %v2667_v52, 16 }
 0x3a3   : > { %3544 = vrot.lane.b32.xlu1 %v7556_v8, %s5188_s19  ;;  %s8894_s19 = scalar_lea.vmem %s9014_s3, %s4659_s13 }
 0x3a4   : > { %3579 = vrot.lane.b32.xlu0 %v7556_v8, %s5189_s20  ;;  %v3304_v0 = vor.u32 %v3303_v16, %v3302_v3  ;;  %v3314_v59 = vrot.slane %v3312_v48, 5 }
 0x3a5   : > { %v3380_v15 = vpop.permute.xlu1 %3379 }
 0x3a6   : > { %v3704_v53 = vpop.permute.xlu0 %3703  ;;  %v3790_v8 = vsel %vm1665_vm13, %v7698_v14, %v3380_v15  ;;  %v3315_v28 = vsel %vm5295_vm11, %v3310_v32, %v3314_v59  ;;  %v3853_v59 = vsel %vm1747_vm15, %v8159_v58, %v7966_v34 }
 0x3a7   : > { %v8248_v41 = vsel %vm1714_vm14, %v3790_v8, %v3415_v36  ;;  %3581 = vrot.lane.b32.xlu1 %v7850_v22, %s5189_s20  ;;  %v3979_v14 = vsel %vm1879_vm4, %v3947_v24, %v3704_v53 }
 0x3a8   : > { %3616 = vrot.lane.b32.xlu0 %v7850_v22, %s5190_s21  ;;  %v3305_v22 = vrot.slane %v3304_v0, 4 }
 0x3a9   : > { %v3382_v13 = vpop.permute.xlu1 %3381 }
 0x3aa   : > { %v3739_v36 = vpop.permute.xlu0 %3738  ;;  %v3793_v57 = vsel %vm1665_vm13, %v9310_v11, %v3382_v13 }
 0x3ab   : > { %v4011_v54 = vsel %vm1912_vm5, %v3979_v14, %v3739_v36  ;;  %3618 = vrot.lane.b32.xlu1 %v4868_v55, %s5190_s21 }
 0x3ac   : > { %3696 = vrot.lane.b32.xlu0 %v7881_v23, %s5191_s22  ;;  %5055 = vmatprep.mubr.msk.bf16.mxu1 %vm1965_vm6, %v4011_v54  ;;  %v3307_v23 = vsel %vm5295_vm11, %v3305_v22, %v3306_v47 }
 0x3ad   : > { %v3417_v3 = vpop.permute.xlu1 %3416 }
 0x3ae   : > { %v3741_v30 = vpop.permute.xlu0 %3740  ;;  %v8265_v16 = vsel %vm1714_vm14, %v3793_v57, %v3417_v3  ;;  %v3855_v57 = vsel %vm1747_vm15, %v8172_v40, %v7984_v17  ;;  %v3857_v17 = vsel %vm1747_vm15, %v8195_v20, %v7990_v4 }
 0x3af   : > { %3698 = vrot.lane.b32.xlu1 %v7894_v31, %s5191_s22 }
 0x3b0   : > { %3731 = vrot.lane.b32.xlu0 %v7894_v31, %s5194_s29  ;;  %v4886_v31 = vcombine.low %v3307_v23, %v3315_v28  ;;  %v3885_v23 = vsel %vm1780_vm1, %v3853_v59, %v7974_v2  ;;  %v9350_v59 = vld [vmem:[#allocation34_spill] sm:$0xff] }
 0x3b1   : > { %v3384_v7 = vpop.permute.xlu1 %3383  ;;  %v3917_v28 = vsel %vm1813_vm2, %v3885_v23, %v7982_v29  ;;  %v9351_v23 = vld [vmem:[#allocation15_spill] sm:$0xff] }
 0x3b2   : > { %v3673_v51 = vpop.permute.xlu0 %3672  ;;  %v3796_v11 = vsel %vm1665_vm13, %v7789_v35, %v3384_v7 }
 0x3b3   : > { %v8279_v19 = vsel %vm1714_vm14, %v3796_v11, %v8192_v62  ;;  %3733 = vrot.lane.b32.xlu1 %v7924_v42, %s5194_s29 }
 0x3b4   : > { %3766 = vrot.lane.b32.xlu0 %v7924_v42, %s5195_s30 }
 0x3b5   : > { %v3386_v47 = vpop.permute.xlu1 %3385 }
 0x3b6   : > { %v3708_v15 = vpop.permute.xlu0 %3707  ;;  %v3799_v63 = vsel %vm1665_vm13, %v7614_v49, %v3386_v47  ;;  %v3889_v47 = vsel %vm1780_vm1, %v3857_v17, %v7998_v6  ;;  %v3861_v6 = vsel %vm1747_vm15, %v8229_v21, %v8022_v43 }
 0x3b7   : > { %3768 = vrot.lane.b32.xlu1 %v4886_v31, %s5195_s30 }
 0x3b9   : > { %v3421_v10 = vpop.permute.xlu1 %3420 }
 0x3ba   : > { %v3743_v35 = vpop.permute.xlu0 %3742  ;;  %v8289_v53 = vsel %vm1714_vm14, %v3799_v63, %v3421_v10 }
 0x3bd   : > { %v8291_v62 = vpop.permute.xlu1 %3387 }
 0x3be   : > { %v3745_v52 = vpop.permute.xlu0 %3744 }
 0x3c1   : > { %v8293_v8 = vpop.permute.xlu1 %3389 }
 0x3c2   : > { %v3677_v56 = vpop.permute.xlu0 %3676 }
 0x3c5   : > { %v8295_v42 = vpop.permute.xlu1 %3424 }
 0x3c6   : > { %v3712_v45 = vpop.permute.xlu0 %3711 }
 0x3c9   : > { %v8297_v55 = vpop.permute.xlu1 %3391 }
 0x3ca   : > { %v3747_v24 = vpop.permute.xlu0 %3746 }
 0x3cd   : > { %v8299_v0 = vpop.permute.xlu1 %3393 }
 0x3ce   : > { %v3749_v49 = vpop.permute.xlu0 %3748 }
 0x3d1   : > { %v8301_v37 = vpop.permute.xlu1 %3428 }
 0x3d2   : > { %v3681_v48 = vpop.permute.xlu0 %3680 }
 0x3d5   : > { %v3396_v14 = vpop.permute.xlu1 %3395 }
 0x3d6   : > { %v3716_v13 = vpop.permute.xlu0 %3715  ;;  %v3814_v36 = vsel %vm1665_vm13, %v7946_v27, %v3396_v14 }
 0x3d7   : > { %v8307_v54 = vsel %vm1714_vm14, %v3814_v36, %v8224_v39  ;;  %v3887_v39 = vsel %vm1780_vm1, %v3855_v57, %v7992_v18  ;;  %v3859_v18 = vsel %vm1747_vm15, %v8207_v44, %v8008_v1  ;;  %v3921_v1 = vsel %vm1813_vm2, %v3889_v47, %v8006_v26 }
 0x3d8   : > { %v3919_v7 = vsel %vm1813_vm2, %v3887_v39, %v8000_v25  ;;  %v3893_v36 = vsel %vm1780_vm1, %v3861_v6, %v8030_v5  ;;  %v3865_v5 = vsel %vm1747_vm15, %v8265_v16, %v9350_v59  ;;  %v9360_v6 = vld [vmem:[#allocation37_spill] sm:$0xff]  ;;  %v9366_v59 = vld [vmem:[#allocation18_spill] sm:$0xff] }
 0x3d9   : > { %v8309_v22 = vpop.permute.xlu1 %3397  ;;  %v3951_v2 = vsel %vm1846_vm3, %v3919_v7, %v3673_v51  ;;  %v3891_v51 = vsel %vm1780_vm1, %v3859_v18, %v8024_v60  ;;  %v3863_v60 = vsel %vm1747_vm15, %v8248_v41, %v8040_v9  ;;  %v3925_v9 = vsel %vm1813_vm2, %v3893_v36, %v8038_v12  ;;  %v9353_v7 = vld [vmem:[#allocation13_spill] sm:$0xff]  ;;  %v9364_v36 = vld [vmem:[#allocation43_spill] sm:$0xff] }
 0x3da   : > { %v3751_v32 = vpop.permute.xlu0 %3750  ;;  %v3983_v29 = vsel %vm1879_vm4, %v3951_v2, %v3708_v15  ;;  %v3923_v44 = vsel %vm1813_vm2, %v3891_v51, %v8032_v38  ;;  %v9356_v2 = vld [vmem:[#allocation40_spill] sm:$0xff]  ;;  %v9358_v51 = vld [vmem:[#allocation38_spill] sm:$0xff] }
 0x3db   : > { %v4015_v31 = vsel %vm1912_vm5, %v3983_v29, %v3743_v35  ;;  %v3955_v10 = vsel %vm1846_vm3, %v3923_v44, %v3677_v56  ;;  %v3895_v56 = vsel %vm1780_vm1, %v3863_v60, %v8052_v46  ;;  %v3867_v46 = vsel %vm1747_vm15, %v8279_v19, %v9351_v23  ;;  %v9354_v19 = vld [vmem:[#allocation36_spill] sm:$0xff] }
 0x3dc   : > { %v3987_v26 = vsel %vm1879_vm4, %v3955_v10, %v3712_v45  ;;  %v3927_v41 = vsel %vm1813_vm2, %v3895_v56, %v8062_v33  ;;  %v9367_v23 = vld [vmem:[#allocation16_spill] sm:$0xff] }
 0x3dd   : > { %v3671_v3 = vpop.permute.xlu1 %3670  ;;  %v4019_v14 = vsel %vm1912_vm5, %v3987_v26, %v3747_v24  ;;  %v3959_v57 = vsel %vm1846_vm3, %v3927_v41, %v3681_v48  ;;  %v3897_v48 = vsel %vm1780_vm1, %v3865_v5, %v9353_v7  ;;  %v9370_v7 = vld [vmem:[#allocation17_spill] sm:$0xff] }
 0x3de   : > { %v8319_v27 = vpop.permute.xlu0 %3752  ;;  %v3949_v34 = vsel %vm1846_vm3, %v3917_v28, %v3671_v3  ;;  %v3991_v12 = vsel %vm1879_vm4, %v3959_v57, %v3716_v13  ;;  %v9352_v28 = vld [vmem:[#allocation14_spill] sm:$0xff]  ;;  %v3899_v13 = vsel %vm1780_vm1, %v3867_v46, %v9354_v19 }
 0x3df   : > { %v4023_v39 = vsel %vm1912_vm5, %v3991_v12, %v3751_v32  ;;  %v3802_v16 = vsel %vm1665_vm13, %v9352_v28, %v8291_v62  ;;  %v9355_v32 = vld [vmem:[#allocation35_spill] sm:$0xff]  ;;  %v9369_v28 = vld [vmem:[#allocation49_spill] sm:$0xff] }
 0x3e0   : > { %v3929_v17 = vsel %vm1813_vm2, %v3897_v48, %v9355_v32  ;;  %v9372_v32 = vld [vmem:[#allocation48_spill] sm:$0xff] }
 0x3e1   : > { %v3706_v58 = vpop.permute.xlu1 %3705 }
 0x3e2   : > { %v3685_v11 = vpop.permute.xlu0 %3684  ;;  %v3981_v40 = vsel %vm1879_vm4, %v3949_v34, %v3706_v58 }
 0x3e3   : > { %v4013_v25 = vsel %vm1912_vm5, %v3981_v40, %v3741_v30  ;;  %v3931_v40 = vsel %vm1813_vm2, %v3899_v13, %v9356_v2 }
 0x3e4   : > { %5056 = vmatmul.mubr.msk.bf16.vlgmr.msra.gmra.mrb[0].mxu1 %vm1965_vm6, %v4013_v25  ;;  %v9357_v25 = vld [vmem:[#allocation58_spill] sm:$0xff]  ;;  %v3963_v47 = vsel %vm1846_vm3, %v3931_v40, %v3685_v11 }
 0x3e5   : > { %v3675_v4 = vpop.permute.xlu1 %3674  ;;  %5059 = vmatprep.mubr.msk.bf16.mxu1 %vm1965_vm6, %v4015_v31  ;;  %v3869_v31 = vsel %vm1747_vm15, %v8289_v53, %v9357_v25 }
 0x3e6   : > { %v3720_v20 = vpop.permute.xlu0 %3719  ;;  %v3953_v30 = vsel %vm1846_vm3, %v3921_v1, %v3675_v4  ;;  %v3901_v11 = vsel %vm1780_vm1, %v3869_v31, %v9360_v6 }
 0x3e7   : > { %v3995_v1 = vsel %vm1879_vm4, %v3963_v47, %v3720_v20  ;;  %v9361_v20 = vld [vmem:[#allocation8_spill] sm:$0xff]  ;;  %v9374_v47 = vld [vmem:[#allocation41_spill] sm:$0xff] }
 0x3e8   : > { %v3805_v60 = vsel %vm1665_vm13, %v9361_v20, %v8293_v8  ;;  %v9365_v8 = vld [vmem:[#allocation51_spill] sm:$0xff]  ;;  %v9375_v20 = vld [vmem:[#allocation12_spill] sm:$0xff] }
 0x3e9   : > { %v3710_v15 = vpop.permute.xlu1 %3709  ;;  %v3841_v26 = vsel %vm1714_vm14, %v3805_v60, %v8295_v42  ;;  %v3817_v60 = vsel %vm1665_vm13, %v9375_v20, %v8309_v22 }
 0x3ea   : > { %v3755_v63 = vpop.permute.xlu0 %3754  ;;  %v3985_v35 = vsel %vm1879_vm4, %v3953_v30, %v3710_v15  ;;  %v9359_v15 = vld [vmem:[#allocation45_spill] sm:$0xff] }
 0x3eb   : > { %v4017_v38 = vsel %vm1912_vm5, %v3985_v35, %v3745_v52  ;;  %v4027_v30 = vsel %vm1912_vm5, %v3995_v1, %v3755_v63  ;;  %v3808_v53 = vsel %vm1665_vm13, %v9359_v15, %v8297_v55 }
 0x3ec   : > { %5060 = vmatmul.mubr.msk.bf16.gmra.mrb[4].mxu1 %vm1965_vm6, %v4017_v38  ;;  %v3843_v55 = vsel %vm1714_vm14, %v3808_v53, %v8214_v50  ;;  %v9363_v38 = vld [vmem:[#allocation42_spill] sm:$0xff] }
 0x3ed   : > { %v3679_v43 = vpop.permute.xlu1 %3678  ;;  %5063 = vmatprep.mubr.msk.bf16.mxu1 %vm1965_vm6, %v4019_v14  ;;  %v3933_v14 = vsel %vm1813_vm2, %v3901_v11, %v9363_v38  ;;  %v3875_v50 = vsel %vm1747_vm15, %v3843_v55, %v9366_v59 }
 0x3ee   : > { %v3757_v21 = vpop.permute.xlu0 %3756  ;;  %v3957_v52 = vsel %vm1846_vm3, %v3925_v9, %v3679_v43 }
 0x3f1   : > { %v3714_v45 = vpop.permute.xlu1 %3713 }
 0x3f2   : > { %v3689_v24 = vpop.permute.xlu0 %3688  ;;  %v3989_v3 = vsel %vm1879_vm4, %v3957_v52, %v3714_v45  ;;  %v3873_v52 = vsel %vm1747_vm15, %v3841_v26, %v9365_v8 }
 0x3f3   : > { %v4021_v33 = vsel %vm1912_vm5, %v3989_v3, %v3749_v49  ;;  %v3839_v49 = vsel %vm1714_vm14, %v3802_v16, %v8201_v61  ;;  %v3905_v46 = vsel %vm1780_vm1, %v3873_v52, %v9367_v23  ;;  %v3907_v16 = vsel %vm1780_vm1, %v3875_v50, %v9369_v28 }
 0x3f4   : > { %5064 = vmatmul.mubr.msk.bf16.gmra.mrb[8].mxu1 %vm1965_vm6, %v4021_v33  ;;  %v3871_v61 = vsel %vm1747_vm15, %v3839_v49, %v9358_v51  ;;  %v9368_v33 = vld [vmem:[#allocation44_spill] sm:$0xff]  ;;  %v3937_v48 = vsel %vm1813_vm2, %v3905_v46, %v9370_v7 }
 0x3f5   : > { %v3683_v34 = vpop.permute.xlu1 %3682  ;;  %5067 = vmatprep.mubr.msk.bf16.mxu1 %vm1965_vm6, %v4023_v39  ;;  %v3811_v39 = vsel %vm1665_vm13, %v9368_v33, %v8299_v0 }
 0x3f6   : > { %v3724_v58 = vpop.permute.xlu0 %3723  ;;  %v3961_v62 = vsel %vm1846_vm3, %v3929_v17, %v3683_v34  ;;  %v9371_v34 = vld [vmem:[#allocation52_spill] sm:$0xff] }
 0x3f9   : > { %v3718_v18 = vpop.permute.xlu1 %3717 }
 0x3fa   : > { %v3759_v29 = vpop.permute.xlu0 %3758  ;;  %v3993_v4 = vsel %vm1879_vm4, %v3961_v62, %v3718_v18  ;;  %v9373_v18 = vld [vmem:[#allocation19_spill] sm:$0xff] }
 0x3fb   : > { %v4025_v44 = vsel %vm1912_vm5, %v3993_v4, %v8319_v27  ;;  %v9362_v27 = vld [vmem:[#allocation39_spill] sm:$0xff] }
 0x3fc   : > { %5068 = vmatmul.mubr.msk.bf16.gmra.mrb[12].mxu1 %vm1965_vm6, %v4025_v44  ;;  %v3903_v63 = vsel %vm1780_vm1, %v3871_v61, %v9362_v27 }
 0x3fd   : > { %v3687_v10 = vpop.permute.xlu1 %3686  ;;  %5071 = vmatprep.mubr.msk.bf16.mxu1 %vm1965_vm6, %v4027_v30  ;;  %v3935_v43 = vsel %vm1813_vm2, %v3903_v63, %v9364_v36 }
 0x3fe   : > { %v3761_v35 = vpop.permute.xlu0 %3760  ;;  %v3965_v56 = vsel %vm1846_vm3, %v3933_v14, %v3687_v10  ;;  %v3967_v45 = vsel %vm1846_vm3, %v3935_v43, %v3689_v24  ;;  %v9376_v14 = vld [vmem:[#allocation31_spill] sm:$0xff] }
 0x3ff   : > { %v3999_v5 = vsel %vm1879_vm4, %v3967_v45, %v3724_v58  ;;  %v3939_v58 = vsel %vm1813_vm2, %v3907_v16, %v9371_v34  ;;  %v3849_v36 = vsel %vm1714_vm14, %v3817_v60, %v9376_v14 }
 0x400   : > { %v4031_v3 = vsel %vm1912_vm5, %v3999_v5, %v3759_v29 }
 0x401   : > { %v3722_v9 = vpop.permute.xlu1 %3721 }
 0x402   : > { %v3693_v41 = vpop.permute.xlu0 %3692  ;;  %v3997_v42 = vsel %vm1879_vm4, %v3965_v56, %v3722_v9 }
 0x403   : > { %v4029_v57 = vsel %vm1912_vm5, %v3997_v42, %v3757_v21  ;;  %v3845_v21 = vsel %vm1714_vm14, %v3811_v39, %v8301_v37  ;;  %v3971_v0 = vsel %vm1846_vm3, %v3939_v58, %v3693_v41 }
 0x404   : > { %5072 = vmatmul.mubr.msk.bf16.gmra.mrb[16].mxu1 %vm1965_vm6, %v4029_v57  ;;  %v3877_v17 = vsel %vm1747_vm15, %v3845_v21, %v9372_v32 }
 0x405   : > { %v3691_v12 = vpop.permute.xlu1 %3690  ;;  %5075 = vmatprep.mubr.msk.bf16.mxu1 %vm1965_vm6, %v4031_v3  ;;  %v3909_v29 = vsel %vm1780_vm1, %v3877_v17, %v9373_v18 }
 0x406   : > { %v3728_v24 = vpop.permute.xlu0 %3727  ;;  %v3969_v19 = vsel %vm1846_vm3, %v3937_v48, %v3691_v12  ;;  %v3941_v4 = vsel %vm1813_vm2, %v3909_v29, %v9374_v47 }
 0x407   : > { %v4003_v40 = vsel %vm1879_vm4, %v3971_v0, %v3728_v24 }
 0x409   : > { %v3726_v13 = vpop.permute.xlu1 %3725 }
 0x40a   : > { %v3763_v49 = vpop.permute.xlu0 %3762  ;;  %v4001_v2 = vsel %vm1879_vm4, %v3969_v19, %v3726_v13 }
 0x40b   : > { %v4033_v37 = vsel %vm1912_vm5, %v4001_v2, %v3761_v35  ;;  %v4035_v62 = vsel %vm1912_vm5, %v4003_v40, %v3763_v49 }
 0x40c   : > { %5076 = vmatmul.mubr.msk.bf16.gmra.mrb[20].mxu1 %vm1965_vm6, %v4033_v37 }
 0x40d   : > { %v3695_v25 = vpop.permute.xlu1 %3694  ;;  %5079 = vmatprep.mubr.msk.bf16.mxu1 %vm1965_vm6, %v4035_v62 }
 0x40e   : > { %v3765_v31 = vpop.permute.xlu0 %3764  ;;  %v3973_v51 = vsel %vm1846_vm3, %v3941_v4, %v3695_v25 }
 0x411   : > { %v3730_v61 = vpop.permute.xlu1 %3729 }
 0x412   : > { %v3543_v1 = vpop.permute.xlu0 %3542  ;;  %v4005_v44 = vsel %vm1879_vm4, %v3973_v51, %v3730_v61 }
 0x413   : > { %v4037_v30 = vsel %vm1912_vm5, %v4005_v44, %v3765_v31  ;;  %v3879_v27 = vsel %vm1747_vm15, %v8307_v54, %v3543_v1 }
 0x414   : > { %5080 = vmatmul.mubr.msk.bf16.gmra.mrb[24].mxu1 %vm1965_vm6, %v4037_v30 }
 0x415   : > { %v3545_v15 = vpop.permute.xlu1 %3544 }
 0x416   : > { %v3580_v53 = vpop.permute.xlu0 %3579  ;;  %v3881_v56 = vsel %vm1747_vm15, %v3849_v36, %v3545_v15 }
 0x417   : > { %v3911_v55 = vsel %vm1780_vm1, %v3879_v27, %v3580_v53 }
 0x419   : > { %v3582_v6 = vpop.permute.xlu1 %3581 }
 0x41a   : > { %v3617_v11 = vpop.permute.xlu0 %3616  ;;  %v3913_v8 = vsel %vm1780_vm1, %v3881_v56, %v3582_v6 }
 0x41b   : > { %v3943_v38 = vsel %vm1813_vm2, %v3911_v55, %v3617_v11 }
 0x41d   : > { %v3619_v10 = vpop.permute.xlu1 %3618 }
 0x41e   : > { %v3697_v35 = vpop.permute.xlu0 %3696  ;;  %v3945_v52 = vsel %vm1813_vm2, %v3913_v8, %v3619_v10 }
 0x41f   : > { %v3975_v43 = vsel %vm1846_vm3, %v3943_v38, %v3697_v35 }
 0x421   : > { %v3699_v63 = vpop.permute.xlu1 %3698 }
 0x422   : > { %v3732_v26 = vpop.permute.xlu0 %3731  ;;  %v3977_v45 = vsel %vm1846_vm3, %v3945_v52, %v3699_v63 }
 0x423   : > { %v4007_v9 = vsel %vm1879_vm4, %v3975_v43, %v3732_v26 }
 0x425   : > { %v3734_v41 = vpop.permute.xlu1 %3733 }
 0x426   : > { %v3767_v22 = vpop.permute.xlu0 %3766  ;;  %v4009_v42 = vsel %vm1879_vm4, %v3977_v45, %v3734_v41 }
 0x427   : > { %v4039_v54 = vsel %vm1912_vm5, %v4007_v9, %v3767_v22 }
 0x428   : > { %5083 = vmatprep.mubr.msk.bf16.mxu1 %vm1965_vm6, %v4039_v54 }
 0x429   : > { %v3769_v59 = vpop.permute.xlu1 %3768 }
 0x42a   : > { %v4041_v50 = vsel %vm1912_vm5, %v4009_v42, %v3769_v59 }
 0x42b   : > { %5084 = vmatmul.mubr.msk.bf16.gmra.mrb[28].mxu1 %vm1965_vm6, %v4041_v50 }
 0x4b7   : > { %v8493_v5 = vpop.f32.mrb[0].mxu1 }
 0x4b8   : > { %v8495_v57 = vpop.f32.mrb[1].mxu1  ;;  %v4330_v12 = vmul.f32 %v8493_v5, %v8493_v5  ;;  %v4261_v16 = vsel %vm1665_vm13, %v8493_v5, 0.0 }
 0x4b9   : > { %v4328_v3 = vmul.f32 %v8495_v57, %v8495_v57  ;;  %v8499_v23 = vpop.f32.mrb[2].mxu1  ;;  %v4258_v24 = vsel %vm1665_vm13, %v8495_v57, 0.0 }
 0x4ba   : > { %v8501_v46 = vpop.f32.mrb[3].mxu1  ;;  %v4331_v7 = vmul.f32 %v8499_v23, %v8499_v23  ;;  %v4363_v19 = vsel %vm1665_vm13, %v4330_v12, 0.0  ;;  %v4263_v13 = vsel %vm1665_vm13, %v8499_v23, 0.0 }
 0x4bb   : > { %v4259_v33 = vsel %vm1665_vm13, %v8501_v46, 0.0  ;;  %v4329_v39 = vmul.f32 %v8501_v46, %v8501_v46  ;;  %v4360_v21 = vsel %vm1665_vm13, %v4328_v3, 0.0 }
 0x4bc   : > { %v4260_v28 = vadd.f32 %v4259_v33, %v4258_v24  ;;  %v4365_v2 = vsel %vm1665_vm13, %v4331_v7, 0.0 }
 0x4bd   : > { %v4361_v48 = vsel %vm1665_vm13, %v4329_v39, 0.0 }
 0x4be   : > { %v4262_v34 = vadd.f32 %v4261_v16, %v4260_v28  ;;  %v4362_v58 = vadd.f32 %v4361_v48, %v4360_v21 }
 0x4bf   : > { %v8520_v49 = vpop.f32.mrb[4].mxu1 }
 0x4c0   : > { %v4364_v32 = vadd.f32 %v4363_v19, %v4362_v58  ;;  %v8522_v17 = vpop.f32.mrb[5].mxu1  ;;  %v4264_v0 = vadd.f32 %v4263_v13, %v4262_v34  ;;  %v4334_v31 = vmul.f32 %v8520_v49, %v8520_v49  ;;  %v4269_v44 = vsel %vm1665_vm13, %v8520_v49, 0.0 }
 0x4c1   : > { %v4265_v40 = vsel %vm1665_vm13, %v8522_v17, 0.0  ;;  %v4332_v37 = vmul.f32 %v8522_v17, %v8522_v17  ;;  %v8529_v62 = vpop.f32.mrb[6].mxu1 }
 0x4c2   : > { %v4266_v18 = vadd.f32 %v4265_v40, %v4264_v0  ;;  %v4366_v29 = vadd.f32 %v4365_v2, %v4364_v32  ;;  %v8531_v25 = vpop.f32.mrb[7].mxu1  ;;  %v4335_v30 = vmul.f32 %v8529_v62, %v8529_v62  ;;  %v4371_v11 = vsel %vm1665_vm13, %v4334_v31, 0.0 }
 0x4c3   : > { %v4367_v47 = vsel %vm1665_vm13, %v4332_v37, 0.0  ;;  %v4267_v4 = vsel %vm1665_vm13, %v8531_v25, 0.0  ;;  %v4333_v51 = vmul.f32 %v8531_v25, %v8531_v25  ;;  %v4271_v10 = vsel %vm1665_vm13, %v8529_v62, 0.0 }
 0x4c4   : > { %v4368_v61 = vadd.f32 %v4367_v47, %v4366_v29  ;;  %v4268_v1 = vadd.f32 %v4267_v4, %v4266_v18  ;;  %v4373_v63 = vsel %vm1665_vm13, %v4335_v30, 0.0 }
 0x4c5   : > { %v4369_v15 = vsel %vm1665_vm13, %v4333_v51, 0.0 }
 0x4c6   : > { %v4270_v53 = vadd.f32 %v4269_v44, %v4268_v1  ;;  %v4370_v6 = vadd.f32 %v4369_v15, %v4368_v61 }
 0x4c7   : > { %v8548_v35 = vpop.f32.mrb[8].mxu1 }
 0x4c8   : > { %v4372_v20 = vadd.f32 %v4371_v11, %v4370_v6  ;;  %v8550_v60 = vpop.f32.mrb[9].mxu1  ;;  %v4272_v27 = vadd.f32 %v4271_v10, %v4270_v53  ;;  %v4338_v56 = vmul.f32 %v8548_v35, %v8548_v35  ;;  %v4277_v52 = vsel %vm1665_vm13, %v8548_v35, 0.0 }
 0x4c9   : > { %v4273_v26 = vsel %vm1665_vm13, %v8550_v60, 0.0  ;;  %v4336_v55 = vmul.f32 %v8550_v60, %v8550_v60  ;;  %v8557_v38 = vpop.f32.mrb[10].mxu1 }
 0x4ca   : > { %v4274_v14 = vadd.f32 %v4273_v26, %v4272_v27  ;;  %v4374_v36 = vadd.f32 %v4373_v63, %v4372_v20  ;;  %v8559_v43 = vpop.f32.mrb[11].mxu1  ;;  %v4339_v45 = vmul.f32 %v8557_v38, %v8557_v38  ;;  %v4379_v3 = vsel %vm1665_vm13, %v4338_v56, 0.0 }
 0x4cb   : > { %v4375_v9 = vsel %vm1665_vm13, %v4336_v55, 0.0  ;;  %v4275_v41 = vsel %vm1665_vm13, %v8559_v43, 0.0  ;;  %v4337_v22 = vmul.f32 %v8559_v43, %v8559_v43  ;;  %v4279_v12 = vsel %vm1665_vm13, %v8557_v38, 0.0 }
 0x4cc   : > { %v4376_v8 = vadd.f32 %v4375_v9, %v4374_v36  ;;  %v4276_v54 = vadd.f32 %v4275_v41, %v4274_v14  ;;  %v4381_v16 = vsel %vm1665_vm13, %v4339_v45, 0.0 }
 0x4cd   : > { %v4377_v42 = vsel %vm1665_vm13, %v4337_v22, 0.0 }
 0x4ce   : > { %v4278_v59 = vadd.f32 %v4277_v52, %v4276_v54  ;;  %v4378_v50 = vadd.f32 %v4377_v42, %v4376_v8 }
 0x4cf   : > { %v8576_v24 = vpop.f32.mrb[12].mxu1 }
 0x4d0   : > { %v4380_v33 = vadd.f32 %v4379_v3, %v4378_v50  ;;  %v8578_v39 = vpop.f32.mrb[13].mxu1  ;;  %v4280_v28 = vadd.f32 %v4279_v12, %v4278_v59  ;;  %v4342_v13 = vmul.f32 %v8576_v24, %v8576_v24  ;;  %v4285_v18 = vsel %vm1665_vm13, %v8576_v24, 0.0 }
 0x4d1   : > { %v4281_v21 = vsel %vm1665_vm13, %v8578_v39, 0.0  ;;  %v4340_v7 = vmul.f32 %v8578_v39, %v8578_v39  ;;  %v8585_v48 = vpop.f32.mrb[14].mxu1 }
 0x4d2   : > { %v4282_v34 = vadd.f32 %v4281_v21, %v4280_v28  ;;  %v4382_v58 = vadd.f32 %v4381_v16, %v4380_v33  ;;  %v8587_v19 = vpop.f32.mrb[15].mxu1  ;;  %v4343_v29 = vmul.f32 %v8585_v48, %v8585_v48  ;;  %v4387_v51 = vsel %vm1665_vm13, %v4342_v13, 0.0 }
 0x4d3   : > { %v4383_v32 = vsel %vm1665_vm13, %v4340_v7, 0.0  ;;  %v4283_v0 = vsel %vm1665_vm13, %v8587_v19, 0.0  ;;  %v4341_v2 = vmul.f32 %v8587_v19, %v8587_v19  ;;  %v4287_v61 = vsel %vm1665_vm13, %v8585_v48, 0.0 }
 0x4d4   : > { %v4384_v40 = vadd.f32 %v4383_v32, %v4382_v58  ;;  %v4284_v37 = vadd.f32 %v4283_v0, %v4282_v34  ;;  %v4389_v53 = vsel %vm1665_vm13, %v4343_v29, 0.0 }
 0x4d5   : > { %v4385_v31 = vsel %vm1665_vm13, %v4341_v2, 0.0 }
 0x4d6   : > { %v4286_v47 = vadd.f32 %v4285_v18, %v4284_v37  ;;  %v4386_v4 = vadd.f32 %v4385_v31, %v4384_v40 }
 0x4d7   : > { %v8604_v1 = vpop.f32.mrb[16].mxu1 }
 0x4d8   : > { %v4388_v44 = vadd.f32 %v4387_v51, %v4386_v4  ;;  %v8606_v30 = vpop.f32.mrb[17].mxu1  ;;  %v4288_v15 = vadd.f32 %v4287_v61, %v4286_v47  ;;  %v4346_v26 = vmul.f32 %v8604_v1, %v8604_v1  ;;  %v4293_v41 = vsel %vm1665_vm13, %v8604_v1, 0.0 }
 0x4d9   : > { %v4289_v6 = vsel %vm1665_vm13, %v8606_v30, 0.0  ;;  %v4344_v11 = vmul.f32 %v8606_v30, %v8606_v30  ;;  %v8613_v10 = vpop.f32.mrb[18].mxu1 }
 0x4da   : > { %v4290_v20 = vadd.f32 %v4289_v6, %v4288_v15  ;;  %v4390_v27 = vadd.f32 %v4389_v53, %v4388_v44  ;;  %v8615_v63 = vpop.f32.mrb[19].mxu1  ;;  %v4347_v22 = vmul.f32 %v8613_v10, %v8613_v10  ;;  %v4395_v45 = vsel %vm1665_vm13, %v4346_v26, 0.0 }
 0x4db   : > { %v4391_v55 = vsel %vm1665_vm13, %v4344_v11, 0.0  ;;  %v4291_v14 = vsel %vm1665_vm13, %v8615_v63, 0.0  ;;  %v4345_v36 = vmul.f32 %v8615_v63, %v8615_v63  ;;  %v4295_v42 = vsel %vm1665_vm13, %v8613_v10, 0.0 }
 0x4dc   : > { %v4392_v56 = vadd.f32 %v4391_v55, %v4390_v27  ;;  %v4292_v9 = vadd.f32 %v4291_v14, %v4290_v20  ;;  %v4397_v33 = vsel %vm1665_vm13, %v4347_v22, 0.0 }
 0x4dd   : > { %v4393_v8 = vsel %vm1665_vm13, %v4345_v36, 0.0 }
 0x4de   : > { %v4294_v54 = vadd.f32 %v4293_v41, %v4292_v9  ;;  %v4394_v52 = vadd.f32 %v4393_v8, %v4392_v56 }
 0x4df   : > { %v8632_v59 = vpop.f32.mrb[20].mxu1 }
 0x4e0   : > { %v4396_v50 = vadd.f32 %v4395_v45, %v4394_v52  ;;  %v8634_v3 = vpop.f32.mrb[21].mxu1  ;;  %v4296_v12 = vadd.f32 %v4295_v42, %v4294_v54  ;;  %v4350_v13 = vmul.f32 %v8632_v59, %v8632_v59  ;;  %v4301_v18 = vsel %vm1665_vm13, %v8632_v59, 0.0 }
 0x4e1   : > { %v4297_v28 = vsel %vm1665_vm13, %v8634_v3, 0.0  ;;  %v4348_v16 = vmul.f32 %v8634_v3, %v8634_v3  ;;  %v8641_v21 = vpop.f32.mrb[22].mxu1 }
 0x4e2   : > { %v4298_v7 = vadd.f32 %v4297_v28, %v4296_v12  ;;  %v4398_v34 = vadd.f32 %v4397_v33, %v4396_v50  ;;  %v8643_v58 = vpop.f32.mrb[23].mxu1  ;;  %v4351_v29 = vmul.f32 %v8641_v21, %v8641_v21  ;;  %v4403_v51 = vsel %vm1665_vm13, %v4350_v13, 0.0 }
 0x4e3   : > { %v4399_v32 = vsel %vm1665_vm13, %v4348_v16, 0.0  ;;  %v4299_v0 = vsel %vm1665_vm13, %v8643_v58, 0.0  ;;  %v4349_v2 = vmul.f32 %v8643_v58, %v8643_v58  ;;  %v4303_v61 = vsel %vm1665_vm13, %v8641_v21, 0.0 }
 0x4e4   : > { %v4400_v40 = vadd.f32 %v4399_v32, %v4398_v34  ;;  %v4300_v37 = vadd.f32 %v4299_v0, %v4298_v7  ;;  %v4405_v11 = vsel %vm1665_vm13, %v4351_v29, 0.0 }
 0x4e5   : > { %v4401_v31 = vsel %vm1665_vm13, %v4349_v2, 0.0 }
 0x4e6   : > { %v4302_v47 = vadd.f32 %v4301_v18, %v4300_v37  ;;  %v4402_v4 = vadd.f32 %v4401_v31, %v4400_v40 }
 0x4e7   : > { %v8660_v44 = vpop.f32.mrb[24].mxu1 }
 0x4e8   : > { %v4404_v15 = vadd.f32 %v4403_v51, %v4402_v4  ;;  %v8662_v53 = vpop.f32.mrb[25].mxu1  ;;  %v4304_v6 = vadd.f32 %v4303_v61, %v4302_v47  ;;  %v4354_v56 = vmul.f32 %v8660_v44, %v8660_v44  ;;  %v4309_v52 = vsel %vm1665_vm13, %v8660_v44, 0.0 }
 0x4e9   : > { %v4305_v20 = vsel %vm1665_vm13, %v8662_v53, 0.0  ;;  %v4352_v27 = vmul.f32 %v8662_v53, %v8662_v53  ;;  %v8669_v26 = vpop.f32.mrb[26].mxu1 }
 0x4ea   : > { %v4306_v55 = vadd.f32 %v4305_v20, %v4304_v6  ;;  %v4406_v14 = vadd.f32 %v4405_v11, %v4404_v15  ;;  %v8671_v36 = vpop.f32.mrb[27].mxu1  ;;  %v4355_v45 = vmul.f32 %v8669_v26, %v8669_v26  ;;  %v4411_v33 = vsel %vm1665_vm13, %v4354_v56, 0.0 }
 0x4eb   : > { %v4407_v9 = vsel %vm1665_vm13, %v4352_v27, 0.0  ;;  %v4307_v41 = vsel %vm1665_vm13, %v8671_v36, 0.0  ;;  %v4353_v22 = vmul.f32 %v8671_v36, %v8671_v36  ;;  %v4311_v28 = vsel %vm1665_vm13, %v8669_v26, 0.0 }
 0x4ec   : > { %v4408_v8 = vadd.f32 %v4407_v9, %v4406_v14  ;;  %v4308_v54 = vadd.f32 %v4307_v41, %v4306_v55  ;;  %v4413_v34 = vsel %vm1665_vm13, %v4355_v45, 0.0 }
 0x4ed   : > { %v4409_v42 = vsel %vm1665_vm13, %v4353_v22, 0.0 }
 0x4ee   : > { %v4310_v50 = vadd.f32 %v4309_v52, %v4308_v54  ;;  %v4410_v12 = vadd.f32 %v4409_v42, %v4408_v8 }
 0x4f0   : > { %v4412_v16 = vadd.f32 %v4411_v33, %v4410_v12  ;;  %v4312_v7 = vadd.f32 %v4311_v28, %v4310_v50 }
 0x4f2   : > { %v4414_v13 = vadd.f32 %v4413_v34, %v4412_v16 }
 0x4fe   : > { %v8689_v32 = vpop.f32.mrb[28].mxu1 }
 0x4ff   : > { %v8691_v0 = vpop.f32.mrb[29].mxu1  ;;  %v4358_v31 = vmul.f32 %v8689_v32, %v8689_v32  ;;  %v4317_v6 = vsel %vm1665_vm13, %v8689_v32, 0.0 }
 0x500   : > { %v4313_v2 = vsel %vm1665_vm13, %v8691_v0, 0.0  ;;  %v4356_v40 = vmul.f32 %v8691_v0, %v8691_v0  ;;  %v8697_v37 = vpop.f32.mrb[30].mxu1 }
 0x501   : > { %v4314_v18 = vadd.f32 %v4313_v2, %v4312_v7  ;;  %v8699_v29 = vpop.f32.mrb[31].mxu1  ;;  %v4359_v11 = vmul.f32 %v8697_v37, %v8697_v37  ;;  %v4419_v14 = vsel %vm1665_vm13, %v4358_v31, 0.0  ;;  %v4319_v56 = vsel %vm1665_vm13, %v8697_v37, 0.0 }
 0x502   : > { %v4415_v47 = vsel %vm1665_vm13, %v4356_v40, 0.0  ;;  %v4315_v4 = vsel %vm1665_vm13, %v8699_v29, 0.0  ;;  %v4357_v51 = vmul.f32 %v8699_v29, %v8699_v29 }
 0x503   : > { %v4416_v61 = vadd.f32 %v4415_v47, %v4414_v13  ;;  %v4316_v15 = vadd.f32 %v4315_v4, %v4314_v18  ;;  %v4421_v22 = vsel %vm1665_vm13, %v4359_v11, 0.0 }
 0x504   : > { %v4417_v20 = vsel %vm1665_vm13, %v4357_v51, 0.0 }
 0x505   : > { %v4318_v27 = vadd.f32 %v4317_v6, %v4316_v15  ;;  %v4418_v55 = vadd.f32 %v4417_v20, %v4416_v61 }
 0x507   : > { %v4320_v9 = vadd.f32 %v4319_v56, %v4318_v27  ;;  %v4420_v41 = vadd.f32 %v4419_v14, %v4418_v55 }
 0x509   : > { %v4321_v8 = vrot.slane %v4320_v9, 4  ;;  %v4422_v54 = vadd.f32 %v4421_v22, %v4420_v41 }
 0x50b   : > { %v4322_v52 = vadd.f32 %v4321_v8, %v4320_v9  ;;  %v4423_v45 = vrot.slane %v4422_v54, 4 }
 0x50d   : > { %v4323_v42 = vrot.slane %v4322_v52, 2  ;;  %v4424_v50 = vadd.f32 %v4423_v45, %v4422_v54 }
 0x50f   : > { %v4324_v12 = vadd.f32 %v4323_v42, %v4322_v52  ;;  %v4425_v33 = vrot.slane %v4424_v50, 2 }
 0x511   : > { %v4325_v28 = vrot.slane %v4324_v12, 1  ;;  %v4426_v16 = vadd.f32 %v4425_v33, %v4424_v50 }
 0x513   : > { %v4326_v7 = vadd.f32 %v4325_v28, %v4324_v12  ;;  %v4427_v34 = vrot.slane %v4426_v16, 1 }
 0x515   : > { %v8717_v13 = vmul.f32 0.00390625, %v4326_v7  ;;  %v4428_v2 = vadd.f32 %v4427_v34, %v4426_v16 }
 0x517   : > { %v4429_v40 = vmul.f32 0.00390625, %v4428_v2  ;;  %v4430_v18 = vmul.f32 %v8717_v13, %v8717_v13  ;;  %v4433_v31 = vsub.f32 %v8495_v57, %v8717_v13  ;;  %v4434_v47 = vsub.f32 %v8501_v46, %v8717_v13 }
 0x518   : > { %v4435_v4 = vsub.f32 %v8493_v5, %v8717_v13  ;;  %v4436_v51 = vsub.f32 %v8499_v23, %v8717_v13  ;;  %v4437_v61 = vsub.f32 %v8522_v17, %v8717_v13  ;;  %v4438_v15 = vsub.f32 %v8531_v25, %v8717_v13 }
 0x519   : > { %v4431_v6 = vsub.f32 %v4429_v40, %v4430_v18  ;;  %v4439_v11 = vsub.f32 %v8520_v49, %v8717_v13  ;;  %v4440_v57 = vsub.f32 %v8529_v62, %v8717_v13  ;;  %v4441_v46 = vsub.f32 %v8550_v60, %v8717_v13 }
 0x51a   : > { %v4442_v5 = vsub.f32 %v8559_v43, %v8717_v13  ;;  %v4443_v23 = vsub.f32 %v8548_v35, %v8717_v13  ;;  %v4444_v17 = vsub.f32 %v8557_v38, %v8717_v13  ;;  %v4445_v25 = vsub.f32 %v8578_v39, %v8717_v13 }
 0x51b   : > { %v4432_v20 = vmax.f32 %v4431_v6, 0.0  ;;  %v4446_v49 = vsub.f32 %v8587_v19, %v8717_v13  ;;  %v4447_v62 = vsub.f32 %v8576_v24, %v8717_v13  ;;  %v4448_v60 = vsub.f32 %v8585_v48, %v8717_v13  ;;  %v5148_v6 = vld [vmem:[%s5242_s18 + $0x8] sm:$0xff] }
 0x51c   : > { %v4449_v43 = vsub.f32 %v8606_v30, %v8717_v13  ;;  %v4450_v35 = vsub.f32 %v8615_v63, %v8717_v13  ;;  %v4451_v38 = vsub.f32 %v8604_v1, %v8717_v13  ;;  %v4452_v39 = vsub.f32 %v8613_v10, %v8717_v13 }
 0x51d   : > { %v4453_v19 = vsub.f32 %v8634_v3, %v8717_v13  ;;  %v4454_v24 = vsub.f32 %v8643_v58, %v8717_v13  ;;  %v4455_v48 = vsub.f32 %v8632_v59, %v8717_v13  ;;  %v4456_v30 = vsub.f32 %v8641_v21, %v8717_v13 }
 0x51e   : > { %v4457_v63 = vsub.f32 %v8662_v53, %v8717_v13  ;;  %v4458_v1 = vsub.f32 %v8671_v36, %v8717_v13  ;;  %v4459_v10 = vsub.f32 %v8660_v44, %v8717_v13  ;;  %v4460_v3 = vsub.f32 %v8669_v26, %v8717_v13 }
 0x51f   : > { %v4461_v58 = vsub.f32 %v8691_v0, %v8717_v13  ;;  %v4462_v59 = vsub.f32 %v8699_v29, %v8717_v13  ;;  %v4463_v21 = vsub.f32 %v8689_v32, %v8717_v13  ;;  %v4464_v53 = vsub.f32 %v8697_v37, %v8717_v13 }
 0x520   : > { %v4465_v27 = vadd.f32 1e-05, %v4432_v20  ;;  %v5152_v20 = vld [vmem:[%s5242_s18 + $0x28] sm:$0xff] }
 0x522   : > { %5143 = vrsqrt.f32 %v4465_v27  ;;  %v5162_v27 = vld [vmem:[%s5242_s18 + $0x78] sm:$0xff] }
 0x52c   : > { %v5144_v36 = vpop.eup %5143 }
 0x52d   : > { %v4467_v55 = vmul.f32 %v5144_v36, %v4433_v31  ;;  %v4468_v44 = vmul.f32 %v5144_v36, %v4434_v47  ;;  %v4469_v14 = vmul.f32 %v5144_v36, %v4435_v4  ;;  %v4470_v26 = vmul.f32 %v5144_v36, %v4436_v51 }
 0x52e   : > { %v4471_v56 = vmul.f32 %v5144_v36, %v4437_v61  ;;  %v4472_v0 = vmul.f32 %v5144_v36, %v4438_v15  ;;  %v4473_v9 = vmul.f32 %v5144_v36, %v4439_v11  ;;  %v4474_v41 = vmul.f32 %v5144_v36, %v4440_v57  ;;  %v5147_v61 = vld [vmem:[%s5242_s18] sm:$0xff]  ;;  %v5149_v57 = vld [vmem:[%s5242_s18 + $0x10] sm:$0xff] }
 0x52f   : > { %v4475_v29 = vmul.f32 %v5144_v36, %v4441_v46  ;;  %v4476_v22 = vmul.f32 %v5144_v36, %v4442_v5  ;;  %v4477_v8 = vmul.f32 %v5144_v36, %v4443_v23  ;;  %v4478_v32 = vmul.f32 %v5144_v36, %v4444_v17  ;;  %v5150_v5 = vld [vmem:[%s5242_s18 + $0x18] sm:$0xff]  ;;  %v5151_v17 = vld [vmem:[%s5242_s18 + $0x20] sm:$0xff] }
 0x530   : > { %v4479_v54 = vmul.f32 %v5144_v36, %v4445_v25  ;;  %v4480_v52 = vmul.f32 %v5144_v36, %v4446_v49  ;;  %v4481_v37 = vmul.f32 %v5144_v36, %v4447_v62  ;;  %v4482_v45 = vmul.f32 %v5144_v36, %v4448_v60  ;;  %v5153_v62 = vld [vmem:[%s5242_s18 + $0x30] sm:$0xff] }
 0x531   : > { %v4483_v42 = vmul.f32 %v5144_v36, %v4449_v43  ;;  %v4484_v50 = vmul.f32 %v5144_v36, %v4450_v35  ;;  %v4485_v12 = vmul.f32 %v5144_v36, %v4451_v38  ;;  %v4486_v33 = vmul.f32 %v5144_v36, %v4452_v39  ;;  %v5154_v43 = vld [vmem:[%s5242_s18 + $0x38] sm:$0xff]  ;;  %v5155_v38 = vld [vmem:[%s5242_s18 + $0x40] sm:$0xff] }
 0x532   : > { %v4487_v28 = vmul.f32 %v5144_v36, %v4453_v19  ;;  %v4488_v16 = vmul.f32 %v5144_v36, %v4454_v24  ;;  %v4489_v7 = vmul.f32 %v5144_v36, %v4455_v48  ;;  %v4490_v34 = vmul.f32 %v5144_v36, %v4456_v30  ;;  %v5156_v19 = vld [vmem:[%s5242_s18 + $0x48] sm:$0xff]  ;;  %v5157_v48 = vld [vmem:[%s5242_s18 + $0x50] sm:$0xff] }
 0x533   : > { %v4491_v13 = vmul.f32 %v5144_v36, %v4457_v63  ;;  %v4492_v2 = vmul.f32 %v5144_v36, %v4458_v1  ;;  %v4493_v40 = vmul.f32 %v5144_v36, %v4459_v10  ;;  %v4494_v18 = vmul.f32 %v5144_v36, %v4460_v3  ;;  %v5158_v63 = vld [vmem:[%s5242_s18 + $0x58] sm:$0xff]  ;;  %v5159_v10 = vld [vmem:[%s5242_s18 + $0x60] sm:$0xff] }
 0x534   : > { %v8792_v31 = vmul.f32 %v5144_v36, %v4461_v58  ;;  %v8794_v47 = vmul.f32 %v5144_v36, %v4462_v59  ;;  %v8796_v4 = vmul.f32 %v5144_v36, %v4463_v21  ;;  %v8798_v51 = vmul.f32 %v5144_v36, %v4464_v53  ;;  %v5160_v58 = vld [vmem:[%s5242_s18 + $0x68] sm:$0xff]  ;;  %v5161_v21 = vld [vmem:[%s5242_s18 + $0x70] sm:$0xff] }
 0x535   : > { %v8807_v15 = vadd.f32 %v5147_v61, %v4467_v55  ;;  %v8810_v11 = vadd.f32 %v5148_v6, %v4468_v44  ;;  %v8813_v46 = vadd.f32 %v5149_v57, %v4469_v14  ;;  %v8816_v23 = vadd.f32 %v5150_v5, %v4470_v26  ;;  %v5163_v55 = vld [vmem:[%s5242_s18 + $0x80] sm:$0xff]  ;;  %v5164_v14 = vld [vmem:[%s5242_s18 + $0x88] sm:$0xff] }
 0x536   : > { %v8819_v25 = vadd.f32 %v5151_v17, %v4471_v56  ;;  %v8822_v49 = vadd.f32 %v5152_v20, %v4472_v0  ;;  %v8825_v60 = vadd.f32 %v5153_v62, %v4473_v9  ;;  %v8828_v35 = vadd.f32 %v5154_v43, %v4474_v41  ;;  %v5165_v56 = vld [vmem:[%s5242_s18 + $0x90] sm:$0xff]  ;;  %v5166_v9 = vld [vmem:[%s5242_s18 + $0x98] sm:$0xff] }
 0x537   : > { %v8831_v39 = vadd.f32 %v5155_v38, %v4475_v29  ;;  %v8834_v24 = vadd.f32 %v5156_v19, %v4476_v22  ;;  %v8837_v30 = vadd.f32 %v5157_v48, %v4477_v8  ;;  %v8840_v1 = vadd.f32 %v5158_v63, %v4478_v32  ;;  %v5167_v29 = vld [vmem:[%s5242_s18 + $0xa0] sm:$0xff]  ;;  %v5168_v8 = vld [vmem:[%s5242_s18 + $0xa8] sm:$0xff] }
 0x538   : > { %v8843_v3 = vadd.f32 %v5159_v10, %v4479_v54  ;;  %v8846_v59 = vadd.f32 %v5160_v58, %v4480_v52  ;;  %v8849_v53 = vadd.f32 %v5161_v21, %v4481_v37  ;;  %v8852_v36 = vadd.f32 %v5162_v27, %v4482_v45  ;;  %v5169_v54 = vld [vmem:[%s5242_s18 + $0xb0] sm:$0xff]  ;;  %v5170_v37 = vld [vmem:[%s5242_s18 + $0xb8] sm:$0xff] }
 0x539   : > { %v8856_v44 = vadd.f32 %v5163_v55, %v4483_v42  ;;  %v8859_v26 = vadd.f32 %v5164_v14, %v4484_v50  ;;  %v8862_v0 = vadd.f32 %v5165_v56, %v4485_v12  ;;  %v8865_v41 = vadd.f32 %v5166_v9, %v4486_v33  ;;  %v5171_v42 = vld [vmem:[%s5242_s18 + $0xc0] sm:$0xff]  ;;  %v5172_v12 = vld [vmem:[%s5242_s18 + $0xc8] sm:$0xff] }
 0x53a   : > { %v8868_v22 = vadd.f32 %v5167_v29, %v4487_v28  ;;  %v8871_v32 = vadd.f32 %v5168_v8, %v4488_v16  ;;  %v8874_v52 = vadd.f32 %v5169_v54, %v4489_v7  ;;  %v8877_v45 = vadd.f32 %v5170_v37, %v4490_v34  ;;  %v5173_v28 = vld [vmem:[%s5242_s18 + $0xd0] sm:$0xff]  ;;  %v5174_v16 = vld [vmem:[%s5242_s18 + $0xd8] sm:$0xff]  ;;  %v5175_v7 = vld [vmem:[%s5242_s18 + $0xe0] sm:$0xff] }
 0x53b   : > { %v8880_v50 = vadd.f32 %v5171_v42, %v4491_v13  ;;  %v8883_v33 = vadd.f32 %v5172_v12, %v4492_v2  ;;  %v8886_v61 = vadd.f32 %v5173_v28, %v4493_v40  ;;  %v8889_v6 = vadd.f32 %v5174_v16, %v4494_v18  ;;  %v5176_v13 = vld [vmem:[%s5242_s18 + $0xe8] sm:$0xff]  ;;  %v5177_v2 = vld [vmem:[%s5242_s18 + $0xf0] sm:$0xff]  ;;  %v5178_v18 = vld [vmem:[%s5242_s18 + $0xf8] sm:$0xff] }
 0x53c   : > { %v8898_v34 = vadd.f32 %v5175_v7, %v8792_v31  ;;  %v8902_v57 = vadd.f32 %v5176_v13, %v8794_v47  ;;  %v8906_v40 = vadd.f32 %v5177_v2, %v8796_v4  ;;  %v8910_v5 = vadd.f32 %v5178_v18, %v8798_v51 }
 0x53d   : > { %v4531_v17 = vmax.f32 %v8807_v15, 0.0  ;;  %v4532_v31 = vmax.f32 %v8810_v11, 0.0  ;;  %v4533_v20 = vmax.f32 %v8813_v46, 0.0  ;;  %v4534_v47 = vmax.f32 %v8816_v23, 0.0 }
 0x53e   : > { %v4535_v62 = vmax.f32 %v8819_v25, 0.0  ;;  %v4536_v4 = vmax.f32 %v8822_v49, 0.0  ;;  %v4537_v43 = vmax.f32 %v8825_v60, 0.0  ;;  %v4538_v51 = vmax.f32 %v8828_v35, 0.0 }
 0x53f   : > { %v4539_v15 = vmax.f32 %v8831_v39, 0.0  ;;  %v4540_v11 = vmax.f32 %v8834_v24, 0.0  ;;  %v4541_v46 = vmax.f32 %v8837_v30, 0.0  ;;  %v4542_v23 = vmax.f32 %v8840_v1, 0.0  ;;  %4563 = vst.msk [vmem:[%s8894_s19] sm:$0xff] %vm1665_vm13, %v4531_v17  ;;  %4564 = vst.msk [vmem:[%s8894_s19 + $0x8] sm:$0xff] %vm1665_vm13, %v4532_v31 }
 0x540   : > { %4565 = vst.msk [vmem:[%s8894_s19 + $0x10] sm:$0xff] %vm1665_vm13, %v4533_v20  ;;  %4566 = vst.msk [vmem:[%s8894_s19 + $0x18] sm:$0xff] %vm1665_vm13, %v4534_v47  ;;  %v4543_v25 = vmax.f32 %v8843_v3, 0.0  ;;  %v4544_v49 = vmax.f32 %v8846_v59, 0.0  ;;  %v4545_v60 = vmax.f32 %v8849_v53, 0.0  ;;  %v4546_v35 = vmax.f32 %v8852_v36, 0.0 }
 0x541   : > { %4567 = vst.msk [vmem:[%s8894_s19 + $0x20] sm:$0xff] %vm1665_vm13, %v4535_v62  ;;  %4568 = vst.msk [vmem:[%s8894_s19 + $0x28] sm:$0xff] %vm1665_vm13, %v4536_v4  ;;  %v4547_v38 = vmax.f32 %v8856_v44, 0.0  ;;  %v4548_v39 = vmax.f32 %v8859_v26, 0.0  ;;  %v4549_v19 = vmax.f32 %v8862_v0, 0.0  ;;  %v4550_v24 = vmax.f32 %v8865_v41, 0.0 }
 0x542   : > { %4569 = vst.msk [vmem:[%s8894_s19 + $0x30] sm:$0xff] %vm1665_vm13, %v4537_v43  ;;  %4570 = vst.msk [vmem:[%s8894_s19 + $0x38] sm:$0xff] %vm1665_vm13, %v4538_v51  ;;  %v4551_v48 = vmax.f32 %v8868_v22, 0.0  ;;  %v4552_v30 = vmax.f32 %v8871_v32, 0.0  ;;  %v4553_v63 = vmax.f32 %v8874_v52, 0.0  ;;  %v4554_v1 = vmax.f32 %v8877_v45, 0.0 }
 0x543   : > { %4571 = vst.msk [vmem:[%s8894_s19 + $0x40] sm:$0xff] %vm1665_vm13, %v4539_v15  ;;  %4572 = vst.msk [vmem:[%s8894_s19 + $0x48] sm:$0xff] %vm1665_vm13, %v4540_v11  ;;  %v4555_v10 = vmax.f32 %v8880_v50, 0.0  ;;  %v4556_v3 = vmax.f32 %v8883_v33, 0.0  ;;  %v4557_v58 = vmax.f32 %v8886_v61, 0.0  ;;  %v4558_v59 = vmax.f32 %v8889_v6, 0.0 }
 0x544   : > { %4573 = vst.msk [vmem:[%s8894_s19 + $0x50] sm:$0xff] %vm1665_vm13, %v4541_v46  ;;  %4574 = vst.msk [vmem:[%s8894_s19 + $0x58] sm:$0xff] %vm1665_vm13, %v4542_v23  ;;  %v4559_v21 = vmax.f32 %v8898_v34, 0.0  ;;  %v4560_v53 = vmax.f32 %v8902_v57, 0.0  ;;  %v4561_v27 = vmax.f32 %v8906_v40, 0.0  ;;  %v4562_v36 = vmax.f32 %v8910_v5, 0.0 }
 0x545   : > { %4575 = vst.msk [vmem:[%s8894_s19 + $0x60] sm:$0xff] %vm1665_vm13, %v4543_v25  ;;  %4576 = vst.msk [vmem:[%s8894_s19 + $0x68] sm:$0xff] %vm1665_vm13, %v4544_v49 }
 0x546   : > { %4577 = vst.msk [vmem:[%s8894_s19 + $0x70] sm:$0xff] %vm1665_vm13, %v4545_v60  ;;  %4578 = vst.msk [vmem:[%s8894_s19 + $0x78] sm:$0xff] %vm1665_vm13, %v4546_v35 }
 0x547   : > { %4579 = vst.msk [vmem:[%s8894_s19 + $0x80] sm:$0xff] %vm1665_vm13, %v4547_v38  ;;  %4580 = vst.msk [vmem:[%s8894_s19 + $0x88] sm:$0xff] %vm1665_vm13, %v4548_v39 }
 0x548   : > { %4581 = vst.msk [vmem:[%s8894_s19 + $0x90] sm:$0xff] %vm1665_vm13, %v4549_v19  ;;  %4582 = vst.msk [vmem:[%s8894_s19 + $0x98] sm:$0xff] %vm1665_vm13, %v4550_v24 }
 0x549   : > { %4583 = vst.msk [vmem:[%s8894_s19 + $0xa0] sm:$0xff] %vm1665_vm13, %v4551_v48  ;;  %4584 = vst.msk [vmem:[%s8894_s19 + $0xa8] sm:$0xff] %vm1665_vm13, %v4552_v30 }
 0x54a   : > { %4585 = vst.msk [vmem:[%s8894_s19 + $0xb0] sm:$0xff] %vm1665_vm13, %v4553_v63  ;;  %4586 = vst.msk [vmem:[%s8894_s19 + $0xb8] sm:$0xff] %vm1665_vm13, %v4554_v1 }
 0x54b   : > { %4587 = vst.msk [vmem:[%s8894_s19 + $0xc0] sm:$0xff] %vm1665_vm13, %v4555_v10  ;;  %4588 = vst.msk [vmem:[%s8894_s19 + $0xc8] sm:$0xff] %vm1665_vm13, %v4556_v3 }
 0x54c   : > { %4589 = vst.msk [vmem:[%s8894_s19 + $0xd0] sm:$0xff] %vm1665_vm13, %v4557_v58  ;;  %4590 = vst.msk [vmem:[%s8894_s19 + $0xd8] sm:$0xff] %vm1665_vm13, %v4558_v59 }
 0x54d   : > { %4591 = vst.msk [vmem:[%s8894_s19 + $0xe0] sm:$0xff] %vm1665_vm13, %v4559_v21  ;;  %4592 = vst.msk [vmem:[%s8894_s19 + $0xe8] sm:$0xff] %vm1665_vm13, %v4560_v53 }
 0x54e   : > { %4593 = vst.msk [vmem:[%s8894_s19 + $0xf0] sm:$0xff] %vm1665_vm13, %v4561_v27  ;;  %4594 = vst.msk [vmem:[%s8894_s19 + $0xf8] sm:$0xff] %vm1665_vm13, %v4562_v36 }
 0x54f PF: > { %s13_s12 = sadd.s32 1, %s5185_s12  }
 0x550   : > { %p10_p5 = scmp.ge.s32.totalorder %s13_s12, 4  }
 0x552   :  { %12 = sbr.rel (!%p10_p5) target bundleno = 1 (0x1), region = 64 }

</bundles_post_ra>
